<compile_context>
chip_gen: v7x
topology: tpu7x:2x2x1
jax: 0.10.0
libtpu: 0.0.40
codegen_flags: <defaults>
</compile_context>

<pallas_src>
import functools

import jax
import jax.numpy as jnp
from jax.experimental import pallas as pl
from jax.experimental.pallas import tpu as pltpu


# Keep well under v7x's 64 MiB physical VMEM (v5e/v6e have 128 MiB).
_VMEM_LIMIT_BYTES = 48 * 1024 * 1024


def _row_tile(n):
    """Destination-row tile size: largest of {128,...,8} dividing n, else n."""
    for t in (128, 64, 32, 16, 8):
        if n % t == 0:
            return t
    return n


# ----------------------------------------------------------------------------
# GAT layer kernel (one grid step = one tile of destination rows).
#   h = x @ W                                (MXU, x & W resident in VMEM)
#   alpha = h @ Amap                         (MXU, block-structured head map)
#   e[i,j] = leaky_relu(a_dst[i] + a_src[j]) + mask_bias[i,j]
#   out    = softmax_row(e) @ h_head         (deferred normalization)
# ----------------------------------------------------------------------------
def gat_kernel(x_ref, w_ref, amap_ref, bias_ref, adjb_ref, out_ref, *,
               heads, ch, tile_n, concat, neg_slope, apply_out_lrelu):
    i = pl.program_id(0)
    row0 = pl.multiple_of(i * tile_n, tile_n)

    w = w_ref[...]                                                  # [Fin, H*C]
    amap = amap_ref[...]                                            # [H*C, 2H]

    # Feature transform for all source nodes (resident operands -> MXU only).
    x_all = x_ref[...].astype(jnp.float32)                          # [N, Fin]
    h_all = jnp.dot(x_all, w, preferred_element_type=jnp.float32)   # [N, H*C]

    # Per-head source logits for ALL nodes, via one MXU matmul; a single
    # transpose puts them in row layout (reused by every head below).
    a_src_row = jnp.dot(h_all, amap[:, :heads],
                        preferred_element_type=jnp.float32).T       # [H, N]

    # Destination logits for just this row tile (dynamic ref slice).
    x_tile = x_ref[pl.ds(row0, tile_n), :].astype(jnp.float32)      # [TM, Fin]
    h_tile = jnp.dot(x_tile, w, preferred_element_type=jnp.float32)  # [TM, H*C]
    a_dst_tile = jnp.dot(h_tile, amap[:, heads:],
                         preferred_element_type=jnp.float32)        # [TM, H]

    # Additive adjacency mask (0 on edges, -1e30 elsewhere), hoisted out of
    # the head loop — no per-head compare/select over [TM, N].
    mbias = adjb_ref[...].astype(jnp.float32)                       # [TM, N]

    head_outs = []
    acc = None
    for hd in range(heads):
        hh = h_all[:, hd * ch:(hd + 1) * ch]                        # [N, C]

        # e[i, j] = leaky_relu(alpha_dst[i] + alpha_src[j]) + mask_bias
        e = a_dst_tile[:, hd:hd + 1] + a_src_row[hd:hd + 1, :]      # [TM, N]
        e = jnp.where(e >= 0, e, neg_slope * e)
        e = e + mbias

        # Row softmax over incoming edges with DEFERRED normalization:
        # aggregate with unnormalized p, then scale by an EUP reciprocal.
        e = e - jnp.max(e, axis=-1, keepdims=True)
        p = jnp.exp(e)                                              # masked -> 0
        inv_l = pl.reciprocal(jnp.sum(p, axis=-1, keepdims=True), approx=True)

        o = jnp.dot(p, hh, preferred_element_type=jnp.float32)      # [TM, C]
        o = o * inv_l

        if concat:
            head_outs.append(o)
        else:
            acc = o if acc is None else acc + o

    if concat:
        res = jnp.concatenate(head_outs, axis=-1) + bias_ref[...]   # lane-dense
    else:
        res = acc * (1.0 / heads) + bias_ref[...]
    if apply_out_lrelu:
        res = jnp.where(res >= 0, res, neg_slope * res)
    out_ref[...] = res.astype(out_ref.dtype)                        # one wide store


def gat_layer(x, w, amap, bias, adj_bias, *, heads, ch, concat, neg_slope,
              apply_out_lrelu, out_dtype=jnp.float32):
    n, fin = x.shape
    out_dim = heads * ch if concat else ch
    tile_n = _row_tile(n)
    grid = (n // tile_n,)

    kernel = functools.partial(
        gat_kernel, heads=heads, ch=ch, tile_n=tile_n, concat=concat,
        neg_slope=neg_slope, apply_out_lrelu=apply_out_lrelu)

    return pl.pallas_call(
        kernel,
        out_shape=jax.ShapeDtypeStruct((n, out_dim), out_dtype),
        grid=grid,
        in_specs=[
            pl.BlockSpec((n, fin), lambda i: (0, 0)),               # x (resident)
            pl.BlockSpec((fin, heads * ch), lambda i: (0, 0)),      # W (resident)
            pl.BlockSpec((heads * ch, 2 * heads), lambda i: (0, 0)),  # head map
            pl.BlockSpec((1, out_dim), lambda i: (0, 0)),           # bias
            pl.BlockSpec((tile_n, n), lambda i: (i, 0)),            # adj bias tile
        ],
        out_specs=pl.BlockSpec((tile_n, out_dim), lambda i: (i, 0)),
        compiler_params=pltpu.CompilerParams(
            dimension_semantics=("parallel",),
            vmem_limit_bytes=_VMEM_LIMIT_BYTES),
    )(x, w, amap, bias, adj_bias)


# ----------------------------------------------------------------------------
# Projection head: ALL Linear + PReLU layers fused into one kernel,
# gridded over row tiles (weights resident, activations stay in registers/VMEM).
# ----------------------------------------------------------------------------
def project_kernel(x_ref, *refs, num_layers):
    out_ref = refs[-1]
    y = x_ref[...].astype(jnp.float32)
    for l in range(num_layers):
        w_ref, b_ref, a_ref = refs[3 * l], refs[3 * l + 1], refs[3 * l + 2]
        y = jnp.dot(y, w_ref[...], preferred_element_type=jnp.float32) + b_ref[...]
        a = a_ref[0]                           # PReLU scalar weight (SMEM)
        y = jnp.where(y >= 0, y, a * y)
    out_ref[...] = y.astype(out_ref.dtype)


def project_mlp(x, layers):
    n, din = x.shape
    tile_n = _row_tile(n)
    grid = (n // tile_n,)
    dout = layers[-1]["w"].shape[1]

    in_specs = [pl.BlockSpec((tile_n, din), lambda i: (i, 0))]
    args = [x]
    for p in layers:
        in_specs += [
            pl.BlockSpec(p["w"].shape, lambda i: (0, 0)),
            pl.BlockSpec(p["b"].shape, lambda i: (0, 0)),
            pl.BlockSpec(memory_space=pltpu.MemorySpace.SMEM),
        ]
        args += [p["w"], p["b"], p["a"]]

    kernel = functools.partial(project_kernel, num_layers=len(layers))
    return pl.pallas_call(
        kernel,
        out_shape=jax.ShapeDtypeStruct((n, dout), jnp.float32),
        grid=grid,
        in_specs=in_specs,
        out_specs=pl.BlockSpec((tile_n, dout), lambda i: (i, 0)),
        compiler_params=pltpu.CompilerParams(
            dimension_semantics=("parallel",),
            vmem_limit_bytes=_VMEM_LIMIT_BYTES),
    )(*args)


# ----------------------------------------------------------------------------
# Model: Encoder (GAT stack) + projection MLP with PReLU.
# ----------------------------------------------------------------------------
def model_forward(x, adj_bias, params, *, heads, neg_slope):
    convs = params["convs"]
    k = len(convs)
    for i, c in enumerate(convs):
        is_last = (i == k - 1)
        x = gat_layer(
            x, c["w"], c["amap"], c["bias"], adj_bias,
            heads=heads, ch=c["ch"], concat=c["concat"],
            neg_slope=neg_slope, apply_out_lrelu=(not is_last),
            # bf16 storage between GAT layers (halves HBM traffic); all
            # in-kernel math stays f32.  Final encoder output kept f32.
            out_dtype=(jnp.float32 if is_last else jnp.bfloat16))
    if params["project"]:
        x = project_mlp(x, params["project"])
    return x


def _attention_map(att_src, att_dst):
    """Block-structured map so alpha = (x @ W) @ Amap computes all heads on MXU.

    Amap[h*C + c, h]         = att_src[h, c]
    Amap[h*C + c, H + h]     = att_dst[h, c]
    """
    heads, ch = att_src.shape
    eye = jnp.eye(heads, dtype=jnp.float32)
    a_src = (att_src[:, :, None] * eye[:, None, :]).reshape(heads * ch, heads)
    a_dst = (att_dst[:, :, None] * eye[:, None, :]).reshape(heads * ch, heads)
    return jnp.concatenate([a_src, a_dst], axis=1)                  # [H*C, 2H]


def init_params(key, in_channels, hidden_channels, heads, project_hidden):
    params = {"convs": [], "project": []}
    k = len(hidden_channels)
    fin = in_channels
    for i in range(k):
        ch = hidden_channels[i] // heads
        # Mirrors Encoder: layer 0 uses concat=True; layers 1..k-2 concat=True;
        # the last layer (i == k-1, for k > 1) averages heads (concat=False).
        concat = True if i == 0 else (i < k - 1)
        out_dim = heads * ch if concat else ch
        key, k1, k2, k3 = jax.random.split(key, 4)
        scale = jnp.sqrt(6.0 / (fin + heads * ch))
        w = jax.random.uniform(k1, (fin, heads * ch), jnp.float32, -scale, scale)
        att_src = jax.random.uniform(k2, (heads, ch), jnp.float32, -0.3, 0.3)
        att_dst = jax.random.uniform(k3, (heads, ch), jnp.float32, -0.3, 0.3)
        bias = jnp.zeros((1, out_dim), jnp.float32)
        params["convs"].append(dict(
            w=w, amap=_attention_map(att_src, att_dst), bias=bias,
            concat=concat, ch=ch))
        fin = out_dim
    for dout in project_hidden:
        key, k1, k2 = jax.random.split(key, 3)
        scale = jnp.sqrt(1.0 / fin)
        w = jax.random.uniform(k1, (fin, dout), jnp.float32, -scale, scale)
        b = jax.random.uniform(k2, (1, dout), jnp.float32, -scale, scale)
        a = jnp.full((1,), 0.25, jnp.float32)      # nn.PReLU() default init
        params["project"].append(dict(w=w, b=b, a=a))
        fin = dout
    return params


def build_adjacency_bias(n_nodes, edge_index, dtype=jnp.bfloat16):
    """Additive mask: 0 where edge dst<-src exists (plus self-loops), -1e30 else."""
    adj = jnp.zeros((n_nodes, n_nodes), jnp.bool_)
    src, dst = edge_index
    adj = adj.at[dst, src].set(True)
    adj = adj.at[jnp.arange(n_nodes), jnp.arange(n_nodes)].set(True)
    return jnp.where(adj, 0.0, -1e30).astype(dtype)


if __name__ == "__main__":
    key = jax.random.PRNGKey(0)

    # Small synthetic graph / model config (lane-dense hidden width H*C = 128).
    N = 256                      # nodes (2 dst-row tiles of 128 -> real grid)
    IN_CHANNELS = 32
    HIDDEN = [128, 128]          # GATConv(32, 32, heads=4, concat) ; GATConv(128, 32, heads=4, mean)
    HEADS = 4
    NEG_SLOPE = 0.2
    PROJECT_HIDDEN = [64, 32]    # encoder out dim is HIDDEN[-1]//HEADS = 32

    key, kx, kp = jax.random.split(key, 3)
    x = jax.random.normal(kx, (N, IN_CHANNELS), jnp.float32)

    # Deterministic ring graph (bidirectional edges).
    src = jnp.concatenate([jnp.arange(N), (jnp.arange(N) + 1) % N])
    dst = jnp.concatenate([(jnp.arange(N) + 1) % N, jnp.arange(N)])
    adj_bias = build_adjacency_bias(N, (src, dst))

    params = init_params(kp, IN_CHANNELS, HIDDEN, HEADS, PROJECT_HIDDEN)

    out = model_forward(x, adj_bias, params, heads=HEADS, neg_slope=NEG_SLOPE)
    out = jax.block_until_ready(out)

    assert out.shape == (N, PROJECT_HIDDEN[-1])
    assert bool(jnp.all(jnp.isfinite(out)))
    print("KERNEL_OK")
</pallas_src>

<mosaic_0001>
module attributes {stable_mosaic.version = 11 : i64} {
  func.func @gat_kernel(%arg0: i32, %arg1: memref<256x32xf32, #tpu.memory_space<vmem>>, %arg2: memref<32x128xf32, #tpu.memory_space<vmem>>, %arg3: memref<128x8xf32, #tpu.memory_space<vmem>>, %arg4: memref<1x128xf32, #tpu.memory_space<vmem>>, %arg5: memref<128x256xbf16, #tpu.memory_space<vmem>>, %arg6: memref<128x128xbf16, #tpu.memory_space<vmem>>) attributes {dimension_semantics = [#tpu.dimension_semantics<parallel>], iteration_bounds = array<i64: 2>, scalar_prefetch = 0 : i64, scratch_operands = 0 : i64, tpu.core_type = #tpu.core_type<tc>, window_params = [{pipeline_mode = #tpu.pipeline_mode<synchronous>, transform_indices = @transform_0, window_bounds = array<i64: 256, 32>}, {pipeline_mode = #tpu.pipeline_mode<synchronous>, transform_indices = @transform_1, window_bounds = array<i64: 32, 128>}, {pipeline_mode = #tpu.pipeline_mode<synchronous>, transform_indices = @transform_2, window_bounds = array<i64: 128, 8>}, {pipeline_mode = #tpu.pipeline_mode<synchronous>, transform_indices = @transform_3, window_bounds = array<i64: 1, 128>}, {transform_indices = @transform_4, window_bounds = array<i64: 128, 256>}, {transform_indices = @transform_5, window_bounds = array<i64: 128, 128>}]} {
    %c128_i32 = arith.constant 128 : i32
    %0 = arith.muli %arg0, %c128_i32 : i32
    %1 = tpu.assume_multiple %0, 128 : i32
    %c0 = arith.constant 0 : index
    %c0_0 = arith.constant 0 : index
    %2 = vector.load %arg2[%c0, %c0_0] : memref<32x128xf32, #tpu.memory_space<vmem>>, vector<32x128xf32>
    %c0_1 = arith.constant 0 : index
    %c0_2 = arith.constant 0 : index
    %3 = vector.load %arg3[%c0_1, %c0_2] : memref<128x8xf32, #tpu.memory_space<vmem>>, vector<128x8xf32>
    %c0_3 = arith.constant 0 : index
    %c0_4 = arith.constant 0 : index
    %4 = vector.load %arg1[%c0_3, %c0_4] : memref<256x32xf32, #tpu.memory_space<vmem>>, vector<256x32xf32>
    %cst = arith.constant dense<0.000000e+00> : vector<256x128xf32>
    %5 = tpu.matmul %4, %2, %cst {dimension_numbers = #tpu.dot_dimension_numbers<[1], [0], [0], [1], [0, 0, 1, 1], [], []>} : vector<256x32xf32>, vector<32x128xf32>, vector<256x128xf32> -> vector<256x128xf32>
    %6 = vector.extract_strided_slice %3 {offsets = [0, 0], sizes = [128, 4], strides = [1, 1]} : vector<128x8xf32> to vector<128x4xf32>
    %cst_5 = arith.constant dense<0.000000e+00> : vector<256x4xf32>
    %7 = tpu.matmul %5, %6, %cst_5 {dimension_numbers = #tpu.dot_dimension_numbers<[1], [0], [0], [1], [0, 0, 1, 1], [], []>} : vector<256x128xf32>, vector<128x4xf32>, vector<256x4xf32> -> vector<256x4xf32>
    %8 = tpu.transpose %7, [1, 0] : vector<256x4xf32> -> vector<4x256xf32>
    %9 = arith.index_cast %1 : i32 to index
    %c0_6 = arith.constant 0 : index
    %10 = vector.load %arg1[%9, %c0_6] : memref<256x32xf32, #tpu.memory_space<vmem>>, vector<128x32xf32>
    %cst_7 = arith.constant dense<0.000000e+00> : vector<128x128xf32>
    %11 = tpu.matmul %10, %2, %cst_7 {dimension_numbers = #tpu.dot_dimension_numbers<[1], [0], [0], [1], [0, 0, 1, 1], [], []>} : vector<128x32xf32>, vector<32x128xf32>, vector<128x128xf32> -> vector<128x128xf32>
    %12 = vector.extract_strided_slice %3 {offsets = [0, 4], sizes = [128, 4], strides = [1, 1]} : vector<128x8xf32> to vector<128x4xf32>
    %cst_8 = arith.constant dense<0.000000e+00> : vector<128x4xf32>
    %13 = tpu.matmul %11, %12, %cst_8 {dimension_numbers = #tpu.dot_dimension_numbers<[1], [0], [0], [1], [0, 0, 1, 1], [], []>} : vector<128x128xf32>, vector<128x4xf32>, vector<128x4xf32> -> vector<128x4xf32>
    %c0_9 = arith.constant 0 : index
    %c0_10 = arith.constant 0 : index
    %14 = vector.load %arg5[%c0_9, %c0_10] : memref<128x256xbf16, #tpu.memory_space<vmem>>, vector<128x256xbf16>
    %15 = arith.extf %14 : vector<128x256xbf16> to vector<128x256xf32>
    %16 = vector.extract_strided_slice %5 {offsets = [0, 0], sizes = [256, 32], strides = [1, 1]} : vector<256x128xf32> to vector<256x32xf32>
    %17 = vector.extract_strided_slice %13 {offsets = [0, 0], sizes = [128, 1], strides = [1, 1]} : vector<128x4xf32> to vector<128x1xf32>
    %18 = vector.extract_strided_slice %8 {offsets = [0, 0], sizes = [1, 256], strides = [1, 1]} : vector<4x256xf32> to vector<1x256xf32>
    %19 = vector.broadcast %17 : vector<128x1xf32> to vector<128x256xf32>
    %20 = vector.broadcast %18 : vector<1x256xf32> to vector<128x256xf32>
    %21 = arith.addf %19, %20 : vector<128x256xf32>
    %cst_11 = arith.constant 0.000000e+00 : f32
    %22 = vector.broadcast %cst_11 : f32 to vector<128x256xf32>
    %23 = arith.cmpf oge, %21, %22 : vector<128x256xf32>
    %cst_12 = arith.constant 2.000000e-01 : f32
    %24 = vector.broadcast %cst_12 : f32 to vector<128x256xf32>
    %25 = arith.mulf %24, %21 : vector<128x256xf32>
    %26 = arith.select %23, %21, %25 : vector<128x256xi1>, vector<128x256xf32>
    %27 = arith.addf %26, %15 : vector<128x256xf32>
    %cst_13 = arith.constant dense<0xFF800000> : vector<128xf32>
    %28 = vector.multi_reduction <maximumf>, %27, %cst_13 [1] : vector<128x256xf32> to vector<128xf32>
    %29 = vector.shape_cast %28 : vector<128xf32> to vector<128x1xf32>
    %30 = vector.broadcast %29 : vector<128x1xf32> to vector<128x256xf32>
    %31 = arith.subf %27, %30 : vector<128x256xf32>
    %32 = math.exp %31 : vector<128x256xf32>
    %cst_14 = arith.constant dense<0.000000e+00> : vector<128xf32>
    %33 = vector.multi_reduction <add>, %32, %cst_14 [1] : vector<128x256xf32> to vector<128xf32>
    %34 = vector.shape_cast %33 : vector<128xf32> to vector<128x1xf32>
    %35 = tpu.reciprocal %34 {approx = true} : vector<128x1xf32> -> vector<128x1xf32>
    %cst_15 = arith.constant dense<0.000000e+00> : vector<128x32xf32>
    %36 = tpu.matmul %32, %16, %cst_15 {dimension_numbers = #tpu.dot_dimension_numbers<[1], [0], [0], [1], [0, 0, 1, 1], [], []>} : vector<128x256xf32>, vector<256x32xf32>, vector<128x32xf32> -> vector<128x32xf32>
    %37 = vector.broadcast %35 : vector<128x1xf32> to vector<128x32xf32>
    %38 = arith.mulf %36, %37 : vector<128x32xf32>
    %39 = vector.extract_strided_slice %5 {offsets = [0, 32], sizes = [256, 32], strides = [1, 1]} : vector<256x128xf32> to vector<256x32xf32>
    %40 = vector.extract_strided_slice %13 {offsets = [0, 1], sizes = [128, 1], strides = [1, 1]} : vector<128x4xf32> to vector<128x1xf32>
    %41 = vector.extract_strided_slice %8 {offsets = [1, 0], sizes = [1, 256], strides = [1, 1]} : vector<4x256xf32> to vector<1x256xf32>
    %42 = vector.broadcast %40 : vector<128x1xf32> to vector<128x256xf32>
    %43 = vector.broadcast %41 : vector<1x256xf32> to vector<128x256xf32>
    %44 = arith.addf %42, %43 : vector<128x256xf32>
    %cst_16 = arith.constant 0.000000e+00 : f32
    %45 = vector.broadcast %cst_16 : f32 to vector<128x256xf32>
    %46 = arith.cmpf oge, %44, %45 : vector<128x256xf32>
    %cst_17 = arith.constant 2.000000e-01 : f32
    %47 = vector.broadcast %cst_17 : f32 to vector<128x256xf32>
    %48 = arith.mulf %47, %44 : vector<128x256xf32>
    %49 = arith.select %46, %44, %48 : vector<128x256xi1>, vector<128x256xf32>
    %50 = arith.addf %49, %15 : vector<128x256xf32>
    %cst_18 = arith.constant dense<0xFF800000> : vector<128xf32>
    %51 = vector.multi_reduction <maximumf>, %50, %cst_18 [1] : vector<128x256xf32> to vector<128xf32>
    %52 = vector.shape_cast %51 : vector<128xf32> to vector<128x1xf32>
    %53 = vector.broadcast %52 : vector<128x1xf32> to vector<128x256xf32>
    %54 = arith.subf %50, %53 : vector<128x256xf32>
    %55 = math.exp %54 : vector<128x256xf32>
    %cst_19 = arith.constant dense<0.000000e+00> : vector<128xf32>
    %56 = vector.multi_reduction <add>, %55, %cst_19 [1] : vector<128x256xf32> to vector<128xf32>
    %57 = vector.shape_cast %56 : vector<128xf32> to vector<128x1xf32>
    %58 = tpu.reciprocal %57 {approx = true} : vector<128x1xf32> -> vector<128x1xf32>
    %cst_20 = arith.constant dense<0.000000e+00> : vector<128x32xf32>
    %59 = tpu.matmul %55, %39, %cst_20 {dimension_numbers = #tpu.dot_dimension_numbers<[1], [0], [0], [1], [0, 0, 1, 1], [], []>} : vector<128x256xf32>, vector<256x32xf32>, vector<128x32xf32> -> vector<128x32xf32>
    %60 = vector.broadcast %58 : vector<128x1xf32> to vector<128x32xf32>
    %61 = arith.mulf %59, %60 : vector<128x32xf32>
    %62 = vector.extract_strided_slice %5 {offsets = [0, 64], sizes = [256, 32], strides = [1, 1]} : vector<256x128xf32> to vector<256x32xf32>
    %63 = vector.extract_strided_slice %13 {offsets = [0, 2], sizes = [128, 1], strides = [1, 1]} : vector<128x4xf32> to vector<128x1xf32>
    %64 = vector.extract_strided_slice %8 {offsets = [2, 0], sizes = [1, 256], strides = [1, 1]} : vector<4x256xf32> to vector<1x256xf32>
    %65 = vector.broadcast %63 : vector<128x1xf32> to vector<128x256xf32>
    %66 = vector.broadcast %64 : vector<1x256xf32> to vector<128x256xf32>
    %67 = arith.addf %65, %66 : vector<128x256xf32>
    %cst_21 = arith.constant 0.000000e+00 : f32
    %68 = vector.broadcast %cst_21 : f32 to vector<128x256xf32>
    %69 = arith.cmpf oge, %67, %68 : vector<128x256xf32>
    %cst_22 = arith.constant 2.000000e-01 : f32
    %70 = vector.broadcast %cst_22 : f32 to vector<128x256xf32>
    %71 = arith.mulf %70, %67 : vector<128x256xf32>
    %72 = arith.select %69, %67, %71 : vector<128x256xi1>, vector<128x256xf32>
    %73 = arith.addf %72, %15 : vector<128x256xf32>
    %cst_23 = arith.constant dense<0xFF800000> : vector<128xf32>
    %74 = vector.multi_reduction <maximumf>, %73, %cst_23 [1] : vector<128x256xf32> to vector<128xf32>
    %75 = vector.shape_cast %74 : vector<128xf32> to vector<128x1xf32>
    %76 = vector.broadcast %75 : vector<128x1xf32> to vector<128x256xf32>
    %77 = arith.subf %73, %76 : vector<128x256xf32>
    %78 = math.exp %77 : vector<128x256xf32>
    %cst_24 = arith.constant dense<0.000000e+00> : vector<128xf32>
    %79 = vector.multi_reduction <add>, %78, %cst_24 [1] : vector<128x256xf32> to vector<128xf32>
    %80 = vector.shape_cast %79 : vector<128xf32> to vector<128x1xf32>
    %81 = tpu.reciprocal %80 {approx = true} : vector<128x1xf32> -> vector<128x1xf32>
    %cst_25 = arith.constant dense<0.000000e+00> : vector<128x32xf32>
    %82 = tpu.matmul %78, %62, %cst_25 {dimension_numbers = #tpu.dot_dimension_numbers<[1], [0], [0], [1], [0, 0, 1, 1], [], []>} : vector<128x256xf32>, vector<256x32xf32>, vector<128x32xf32> -> vector<128x32xf32>
    %83 = vector.broadcast %81 : vector<128x1xf32> to vector<128x32xf32>
    %84 = arith.mulf %82, %83 : vector<128x32xf32>
    %85 = vector.extract_strided_slice %5 {offsets = [0, 96], sizes = [256, 32], strides = [1, 1]} : vector<256x128xf32> to vector<256x32xf32>
    %86 = vector.extract_strided_slice %13 {offsets = [0, 3], sizes = [128, 1], strides = [1, 1]} : vector<128x4xf32> to vector<128x1xf32>
    %87 = vector.extract_strided_slice %8 {offsets = [3, 0], sizes = [1, 256], strides = [1, 1]} : vector<4x256xf32> to vector<1x256xf32>
    %88 = vector.broadcast %86 : vector<128x1xf32> to vector<128x256xf32>
    %89 = vector.broadcast %87 : vector<1x256xf32> to vector<128x256xf32>
    %90 = arith.addf %88, %89 : vector<128x256xf32>
    %cst_26 = arith.constant 0.000000e+00 : f32
    %91 = vector.broadcast %cst_26 : f32 to vector<128x256xf32>
    %92 = arith.cmpf oge, %90, %91 : vector<128x256xf32>
    %cst_27 = arith.constant 2.000000e-01 : f32
    %93 = vector.broadcast %cst_27 : f32 to vector<128x256xf32>
    %94 = arith.mulf %93, %90 : vector<128x256xf32>
    %95 = arith.select %92, %90, %94 : vector<128x256xi1>, vector<128x256xf32>
    %96 = arith.addf %95, %15 : vector<128x256xf32>
    %cst_28 = arith.constant dense<0xFF800000> : vector<128xf32>
    %97 = vector.multi_reduction <maximumf>, %96, %cst_28 [1] : vector<128x256xf32> to vector<128xf32>
    %98 = vector.shape_cast %97 : vector<128xf32> to vector<128x1xf32>
    %99 = vector.broadcast %98 : vector<128x1xf32> to vector<128x256xf32>
    %100 = arith.subf %96, %99 : vector<128x256xf32>
    %101 = math.exp %100 : vector<128x256xf32>
    %cst_29 = arith.constant dense<0.000000e+00> : vector<128xf32>
    %102 = vector.multi_reduction <add>, %101, %cst_29 [1] : vector<128x256xf32> to vector<128xf32>
    %103 = vector.shape_cast %102 : vector<128xf32> to vector<128x1xf32>
    %104 = tpu.reciprocal %103 {approx = true} : vector<128x1xf32> -> vector<128x1xf32>
    %cst_30 = arith.constant dense<0.000000e+00> : vector<128x32xf32>
    %105 = tpu.matmul %101, %85, %cst_30 {dimension_numbers = #tpu.dot_dimension_numbers<[1], [0], [0], [1], [0, 0, 1, 1], [], []>} : vector<128x256xf32>, vector<256x32xf32>, vector<128x32xf32> -> vector<128x32xf32>
    %106 = vector.broadcast %104 : vector<128x1xf32> to vector<128x32xf32>
    %107 = arith.mulf %105, %106 : vector<128x32xf32>
    %108 = tpu.concatenate %38, %61, %84, %107 in 1 : vector<128x32xf32>, vector<128x32xf32>, vector<128x32xf32>, vector<128x32xf32> -> vector<128x128xf32>
    %c0_31 = arith.constant 0 : index
    %c0_32 = arith.constant 0 : index
    %109 = vector.load %arg4[%c0_31, %c0_32] : memref<1x128xf32, #tpu.memory_space<vmem>>, vector<1x128xf32>
    %110 = vector.broadcast %109 : vector<1x128xf32> to vector<128x128xf32>
    %111 = arith.addf %108, %110 : vector<128x128xf32>
    %cst_33 = arith.constant 0.000000e+00 : f32
    %112 = vector.broadcast %cst_33 : f32 to vector<128x128xf32>
    %113 = arith.cmpf oge, %111, %112 : vector<128x128xf32>
    %cst_34 = arith.constant 2.000000e-01 : f32
    %114 = vector.broadcast %cst_34 : f32 to vector<128x128xf32>
    %115 = arith.mulf %114, %111 : vector<128x128xf32>
    %116 = arith.select %113, %111, %115 : vector<128x128xi1>, vector<128x128xf32>
    %117 = arith.truncf %116 : vector<128x128xf32> to vector<128x128xbf16>
    %c0_35 = arith.constant 0 : index
    %c0_36 = arith.constant 0 : index
    %118 = vector.load %arg6[%c0_35, %c0_36] : memref<128x128xbf16, #tpu.memory_space<vmem>>, vector<128x128xbf16>
    tpu.vector_store %arg6[%c0_35, %c0_36], %117 {strides = array<i32>} : memref<128x128xbf16, #tpu.memory_space<vmem>>, vector<128x128xbf16>,
    return
  }
  func.func @transform_0(%arg0: i32) -> (i32, i32) {
    %c0_i32 = arith.constant 0 : i32
    %c0_i32_0 = arith.constant 0 : i32
    %c0_i32_1 = arith.constant 0 : i32
    return %c0_i32, %c0_i32_0 : i32, i32
  }
  func.func @transform_1(%arg0: i32) -> (i32, i32) {
    %c0_i32 = arith.constant 0 : i32
    %c0_i32_0 = arith.constant 0 : i32
    %c0_i32_1 = arith.constant 0 : i32
    return %c0_i32, %c0_i32_0 : i32, i32
  }
  func.func @transform_2(%arg0: i32) -> (i32, i32) {
    %c0_i32 = arith.constant 0 : i32
    %c0_i32_0 = arith.constant 0 : i32
    %c0_i32_1 = arith.constant 0 : i32
    return %c0_i32, %c0_i32_0 : i32, i32
  }
  func.func @transform_3(%arg0: i32) -> (i32, i32) {
    %c0_i32 = arith.constant 0 : i32
    %c0_i32_0 = arith.constant 0 : i32
    %c0_i32_1 = arith.constant 0 : i32
    return %c0_i32, %c0_i32_0 : i32, i32
  }
  func.func @transform_4(%arg0: i32) -> (i32, i32) {
    %c0_i32 = arith.constant 0 : i32
    %c0_i32_0 = arith.constant 0 : i32
    return %arg0, %c0_i32 : i32, i32
  }
  func.func @transform_5(%arg0: i32) -> (i32, i32) {
    %c0_i32 = arith.constant 0 : i32
    %c0_i32_0 = arith.constant 0 : i32
    return %arg0, %c0_i32 : i32, i32
  }
}

</mosaic_0001>

<bundles_post_ra>
// kernel: tpu_custom_call.1
= control target key start
LH: loop header
LB: loop body
LE: loop exit
PB: predicated region body
PF: predicated region fallthrough
CT: control target
= control target key end

     0   :  { %10 = vsyncpa [#allocation3], 0  ;;  %s9565_s0 = inlined_call_operand.vmem [shape: f32[256,32], index: 0, kind: input, shape index: {}]   ;;  %s9566_s1 = inlined_call_operand.vmem [shape: f32[32,128], index: 1, kind: input, shape index: {}]   ;;  %s9567_s2 = inlined_call_operand.vmem [shape: f32[128,8], index: 2, kind: input, shape index: {}]   ;;  %s9568_s3 = inlined_call_operand.vmem [shape: f32[1,128], index: 3, kind: input, shape index: {}]   ;;  %s9569_s4 = inlined_call_operand.vmem [shape: bf16[256,256], index: 4, kind: input, shape index: {}]   ;;  %s9570_s5 = inlined_call_operand.hbm [shape: bf16[256,128], index: 5, kind: output, shape index: {}]  }
   0x1   :  { %12 = vsyncpa [#allocation3 + $0x1], 0  ;;  %s6496_s18 = smov 0   ;;  %s6498_s19 = smov 0  }
   0x2   :  { %s6500_s20 = smov 0   ;;  %s6502_s21 = smov 0  }
   0x3 LB: > { %s6517_s22 = sadd.s32 4294967295, %s6454_s21   ;;  %s4571_s23 = sadd.s32 4294967294, %s6454_s21   ;;  %s6454_s21 = sphi %s6502_s21, %s10183_s21   ;;  %s6450_s20 = sphi %s6500_s20, %s10182_s20   ;;  %s6446_s19 = sphi %s6498_s19, %s10181_s19   ;;  %s6442_s18 = sphi %s6496_s18, %s10180_s18  }
   0x4   : > { %s6521_s24 = sadd.s32 1, %s6454_s21   ;;  %s135_s25 = sadd.s32 1, %s6450_s20 }
   0x5   : > { %s132_s26 = ssub.s32 %s6454_s21, %s6521_s24  ;;  %p145_p0 = scmp.ne.s32.totalorder %s6450_s20, %s6446_s19 }
   0x6   : > { %p133_p1 = scmp.eq.s32.totalorder %s132_s26, 0  ;;  %p146_p2 = scmp.eq.s32.totalorder %s6517_s22, 1 }
   0x7   : > { %p151_p3 = scmp.ne.s32.totalorder %s6446_s19, %s6442_s18  ;;  %p152_p4 = scmp.eq.s32.totalorder %s4571_s23, 1 }
   0x8   : > { %s6532_s27 = scalar_select %p133_p1, %s6450_s20, %s135_s25  }
   0x9   : > { %p6534_p5 = por %p146_p2, %p145_p0  ;;  %p6538_p6 = por %p152_p4, %p151_p3 }
   0xa   : > { %p4574_p7 = scmp.ge.s32.totalorder %s6454_s21, 1  ;;  %p192_p8 = scmp.lt.s32.totalorder %s6454_s21, 3 }
   0xc   : > { %p193_p9 = pnand %p4574_p7, %p192_p8 }
   0xe   : > { %196 = sbr.rel (%p193_p9) target bundleno = 1639 (0x667), region = 40 }
  0x15   : > { %v230_v0 = vld [vmem:[%s9566_s1] sm:$0xff]  ;;  %v231_v1 = vld [vmem:[%s9566_s1 + $0x8] sm:$0xff]  ;;  %v232_v2 = vld [vmem:[%s9566_s1 + $0x10] sm:$0xff]  ;;  %vm282_vm0 = vcmask 261120   ;;  %s6456_s11 = smov 124   ;;  %s6457_s16 = smov 64  }
  0x16   : > { %v6553_v3 = vpack.c.bf16 %v231_v1, %v230_v0  ;;  %v233_v4 = vld [vmem:[%s9566_s1 + $0x18] sm:$0xff]  ;;  %v250_v5 = vld [vmem:[%s9565_s0] sm:$0xff]  ;;  %v251_v7 = vld [vmem:[%s9565_s0 + $0x8] sm:$0xff]  ;;  %s4579_s17 = sshll.u32 %s6517_s22, 7  ;;  %s6459_s30 = smov 32  }
  0x17   : > { %v6561_v6 = vpack.c.bf16 %v233_v4, %v232_v2  ;;  %5179 = vmatprep.mubr.msk.f32.mxu0 %vm282_vm0, %v250_v5  ;;  %v252_v8 = vld [vmem:[%s9565_s0 + $0x10] sm:$0xff]  ;;  %v253_v9 = vld [vmem:[%s9565_s0 + $0x18] sm:$0xff]  ;;  %v234_v10 = vld [vmem:[%s9567_s2] sm:$0xff]  ;;  %s6777_s26 = scalar_lea.vmem %s9565_s0, %s4579_s17  ;;  %s4576_s6 = sshll.u32 %s6517_s22, 4 }
  0x18   : > { %5396 = vmatprep.subr.bf16.mxu0 %v6553_v3  ;;  %v235_v11 = vld [vmem:[%s9567_s2 + $0x8] sm:$0xff]  ;;  %v236_v12 = vld [vmem:[%s9567_s2 + $0x10] sm:$0xff]  ;;  %v254_v13 = vld [vmem:[%s9565_s0 + $0x20] sm:$0xff]  ;;  %p222_p10 = scmp.lt.s32.totalorder %s4576_s6, 31  ;;  %s218_s14 = sand.u32 1, %s6446_s19  }
  0x19   : > { %5398 = vmatpush3.bf16.msra.mxu0 %v6553_v3  ;;  %v5403_v14 = vpack.c.bf16 %v235_v11, %v234_v10  ;;  %v237_v15 = vld [vmem:[%s9567_s2 + $0x18] sm:$0xff]  ;;  %v238_v17 = vld [vmem:[%s9567_s2 + $0x20] sm:$0xff]  ;;  %v239_v18 = vld [vmem:[%s9567_s2 + $0x28] sm:$0xff]  ;;  %v5667_v20 = vpack.i.bf16 %v235_v11, %v234_v10  ;;  %s4575_s15 = sshll.u32 %s218_s14, 6 }
  0x1a   : > { %5400 = vmatprep.subr.bf16.mxu0 %v6561_v6  ;;  %v5407_v16 = vpack.c.bf16 %v237_v15, %v236_v12  ;;  %v5672_v19 = vpack.i.bf16 %v237_v15, %v236_v12  ;;  %v255_v21 = vld [vmem:[%s9565_s0 + $0x28] sm:$0xff]  ;;  %v256_v22 = vld [vmem:[%s9565_s0 + $0x30] sm:$0xff]  ;;  %v5411_v23 = vpack.c.bf16 %v239_v18, %v238_v17  ;;  %v245_v25 = vld [vmem:[%s9567_s2 + $0x58] sm:$0xff]  ;;  %v5677_v26 = vpack.i.bf16 %v239_v18, %v238_v17  ;;  %s10185_s6 = smov (!%p222_p10, %s4576_s6), 31  ;;  %s9430_s17 = scalar_lea.vmem [#allocation2], %s4575_s15 }
  0x1b   : > { %v244_v24 = vld [vmem:[%s9567_s2 + $0x50] sm:$0xff]  ;;  %v241_v28 = vld [vmem:[%s9567_s2 + $0x38] sm:$0xff]  ;;  %5668 = vrot.lane.b32.xlu0 %v5667_v20, %s6456_s11  ;;  %5603 = vmatprep.subr.bf16.mxu1 %v5403_v14  ;;  %v258_v33 = vld [vmem:[%s9565_s0 + $0x40] sm:$0xff]  ;;  %s4650_s7 = sshll.u32 %s10185_s6, 3  ;;  %s4507_s23 = sshll.u32 %s9430_s17, 4  ;;  %s9517_s23 = int_to_ptr.vmem [resolvable:$true] %s4507_s23 }
  0x1c   : > { %5673 = vrot.lane.b32.xlu1 %v5672_v19, %s6456_s11  ;;  %v240_v27 = vld [vmem:[%s9567_s2 + $0x30] sm:$0xff]  ;;  %v5692_v29 = vpack.i.bf16 %v245_v25, %v244_v24  ;;  %v249_v31 = vld [vmem:[%s9567_s2 + $0x78] sm:$0xff]  ;;  %5611 = vmatpush3.bf16.msra.mxu1 %v5403_v14  ;;  %v242_v36 = vld [vmem:[%s9567_s2 + $0x40] sm:$0xff]  ;;  %v5423_v47 = vpack.c.bf16 %v245_v25, %v244_v24  ;;  %s7237_s10 = scalar_lea.vmem %s9569_s4, %s4650_s7  ;;  %s9522_s6 = scalar_lea.sflag [#allocation3], %s218_s14 }
  0x1d   : > { %5402 = vmatpush3.bf16.msra.mxu0 %v6561_v6  ;;  %v248_v30 = vld [vmem:[%s9567_s2 + $0x70] sm:$0xff]  ;;  %v257_v32 = vld [vmem:[%s9565_s0 + $0x38] sm:$0xff]  ;;  %v5415_v34 = vpack.c.bf16 %v241_v28, %v240_v27  ;;  %v5682_v35 = vpack.i.bf16 %v241_v28, %v240_v27  ;;  %v243_v37 = vld [vmem:[%s9567_s2 + $0x48] sm:$0xff]  ;;  %5604 = vmatprep.subr.bf16.mxu1 %v5407_v16  ;;  %s6464_s7 = smov [#allocation2]  }
  0x1e   : > { %5404 = vmatprep.subr.bf16.mxu0 %v5403_v14  ;;  %v5702_v38 = vpack.i.bf16 %v249_v31, %v248_v30  ;;  %v259_v39 = vld [vmem:[%s9565_s0 + $0x48] sm:$0xff]  ;;  %v260_v40 = vld [vmem:[%s9565_s0 + $0x50] sm:$0xff]  ;;  %v5419_v41 = vpack.c.bf16 %v243_v37, %v242_v36  ;;  %v5687_v42 = vpack.i.bf16 %v243_v37, %v242_v36  ;;  %v261_v43 = vld [vmem:[%s9565_s0 + $0x58] sm:$0xff]  ;;  %v5431_v54 = vpack.c.bf16 %v249_v31, %v248_v30  ;;  %s6396_s8 = sshll.u32 %s6464_s7, 4  ;;  %s6397_s8 = int_to_ptr.vmem [resolvable:$false] %s6396_s8 }
  0x1f   : > { %5693 = vrot.lane.b32.xlu0 %v5692_v29, %s6456_s11  ;;  %v246_v44 = vld [vmem:[%s9567_s2 + $0x60] sm:$0xff]  ;;  %v247_v45 = vld [vmem:[%s9567_s2 + $0x68] sm:$0xff]  ;;  %v264_v50 = vld [vmem:[%s9565_s0 + $0x70] sm:$0xff]  ;;  %s6398_s9 = scalar_lea.vmem %s6397_s8, 2048  ;;  %p6399_p0 = scmp.lt.s32.totalorder %s9517_s23, %s6397_s8 }
  0x20   : > { %5180 = vmatmul.mubr.msk.f32.vlgmr.msra.gmra.mrb[0].mxu0 %vm282_vm0, %v251_v7  ;;  %5678 = vrot.lane.b32.xlu1 %v5677_v26, %s6456_s11  ;;  %v262_v46 = vld [vmem:[%s9565_s0 + $0x60] sm:$0xff]  ;;  %v5697_v48 = vpack.i.bf16 %v247_v45, %v246_v44  ;;  %v263_v49 = vld [vmem:[%s9565_s0 + $0x68] sm:$0xff]  ;;  %v5427_v51 = vpack.c.bf16 %v247_v45, %v246_v44  ;;  %v265_v52 = vld [vmem:[%s9565_s0 + $0x78] sm:$0xff] }
  0x21   : > { %5182 = vmatprep.mubr.msk.f32.mxu0 %vm282_vm0, %v252_v8  ;;  %5406 = vmatpush3.bf16.msra.mxu0 %v5403_v14  ;;  %v266_v53 = vld [vmem:[%s9565_s0 + $0x80] sm:$0xff]  ;;  %v267_v55 = vld [vmem:[%s9565_s0 + $0x88] sm:$0xff]  ;;  %v268_v56 = vld [vmem:[%s9565_s0 + $0x90] sm:$0xff] }
  0x22   : > { %5408 = vmatprep.subr.bf16.mxu0 %v5407_v16  ;;  %5612 = vmatpush3.bf16.msra.mxu1 %v5407_v16  ;;  %v269_v57 = vld [vmem:[%s9565_s0 + $0x98] sm:$0xff]  ;;  %v270_v58 = vld [vmem:[%s9565_s0 + $0xa0] sm:$0xff]  ;;  %v271_v59 = vld [vmem:[%s9565_s0 + $0xa8] sm:$0xff] }
  0x23   : > { %5703 = vrot.lane.b32.xlu0 %v5702_v38, %s6456_s11  ;;  %5605 = vmatprep.subr.bf16.mxu1 %v5411_v23  ;;  %v272_v60 = vld [vmem:[%s9565_s0 + $0xb0] sm:$0xff]  ;;  %v273_v61 = vld [vmem:[%s9565_s0 + $0xb8] sm:$0xff]  ;;  %v274_v62 = vld [vmem:[%s9565_s0 + $0xc0] sm:$0xff] }
  0x24   : > { %5183 = vmatmul.mubr.msk.f32.gmra.mrb[2].mxu0 %vm282_vm0, %v253_v9  ;;  %5683 = vrot.lane.b32.xlu1 %v5682_v35, %s6456_s11  ;;  %v275_v63 = vld [vmem:[%s9565_s0 + $0xc8] sm:$0xff]  ;;  %v276_v0 = vld [vmem:[%s9565_s0 + $0xd0] sm:$0xff]  ;;  %v277_v1 = vld [vmem:[%s9565_s0 + $0xd8] sm:$0xff] }
  0x25   : > { %5185 = vmatprep.mubr.msk.f32.mxu0 %vm282_vm0, %v254_v13  ;;  %5410 = vmatpush3.bf16.msra.mxu0 %v5407_v16  ;;  %v278_v2 = vld [vmem:[%s9565_s0 + $0xe0] sm:$0xff]  ;;  %v279_v4 = vld [vmem:[%s9565_s0 + $0xe8] sm:$0xff]  ;;  %v280_v5 = vld [vmem:[%s9565_s0 + $0xf0] sm:$0xff] }
  0x26   : > { %5412 = vmatprep.subr.bf16.mxu0 %v5411_v23  ;;  %5613 = vmatpush3.bf16.msra.mxu1 %v5411_v23  ;;  %v281_v7 = vld [vmem:[%s9565_s0 + $0xf8] sm:$0xff]  ;;  %v894_v18 = vld [vmem:[%s6777_s26] sm:$0xff]  ;;  %v899_v37 = vld [vmem:[%s6777_s26 + $0x28] sm:$0xff] }
  0x27   : > { %5606 = vmatprep.subr.bf16.mxu1 %v5415_v34  ;;  %v897_v29 = vld [vmem:[%s6777_s26 + $0x18] sm:$0xff]  ;;  %v898_v31 = vld [vmem:[%s6777_s26 + $0x20] sm:$0xff] }
  0x28   : > { %5186 = vmatmul.mubr.msk.f32.gmra.mrb[4].mxu0 %vm282_vm0, %v255_v21  ;;  %5688 = vrot.lane.b32.xlu1 %v5687_v42, %s6456_s11  ;;  %v901_v45 = vld [vmem:[%s6777_s26 + $0x38] sm:$0xff] }
  0x29   : > { %5188 = vmatprep.mubr.msk.f32.mxu0 %vm282_vm0, %v256_v22  ;;  %5414 = vmatpush3.bf16.msra.mxu0 %v5411_v23  ;;  %v896_v23 = vld [vmem:[%s6777_s26 + $0x10] sm:$0xff] }
  0x2a   : > { %5416 = vmatprep.subr.bf16.mxu0 %v5415_v34  ;;  %5614 = vmatpush3.bf16.msra.mxu1 %v5415_v34 }
  0x2b   : > { %5607 = vmatprep.subr.bf16.mxu1 %v5419_v41 }
  0x2c   : > { %5189 = vmatmul.mubr.msk.f32.gmra.mrb[6].mxu0 %vm282_vm0, %v257_v32  ;;  %5698 = vrot.lane.b32.xlu1 %v5697_v48, %s6456_s11  ;;  %s6458_s11 = smov 96   ;;  %v902_v48 = vld [vmem:[%s6777_s26 + $0x40] sm:$0xff] }
  0x2d   : > { %5191 = vmatprep.mubr.msk.f32.mxu0 %vm282_vm0, %v258_v33  ;;  %5418 = vmatpush3.bf16.msra.mxu0 %v5415_v34 }
  0x2e   : > { %5420 = vmatprep.subr.bf16.mxu0 %v5419_v41  ;;  %5615 = vmatpush3.bf16.msra.mxu1 %v5419_v41 }
  0x2f   : > { %5608 = vmatprep.subr.bf16.mxu1 %v5423_v47 }
  0x30   : > { %5192 = vmatmul.mubr.msk.f32.gmra.mrb[8].mxu0 %vm282_vm0, %v259_v39  ;;  %v900_v39 = vld [vmem:[%s6777_s26 + $0x30] sm:$0xff] }
  0x31   : > { %5194 = vmatprep.mubr.msk.f32.mxu0 %vm282_vm0, %v260_v40  ;;  %5422 = vmatpush3.bf16.msra.mxu0 %v5419_v41 }
  0x32   : > { %5424 = vmatprep.subr.bf16.mxu0 %v5423_v47  ;;  %5616 = vmatpush3.bf16.msra.mxu1 %v5423_v47 }
  0x33   : > { %5609 = vmatprep.subr.bf16.mxu1 %v5427_v51 }
  0x34   : > { %5195 = vmatmul.mubr.msk.f32.gmra.mrb[10].mxu0 %vm282_vm0, %v261_v43 }
  0x35   : > { %5197 = vmatprep.mubr.msk.f32.mxu0 %vm282_vm0, %v262_v46  ;;  %5426 = vmatpush3.bf16.msra.mxu0 %v5423_v47 }
  0x36   : > { %5428 = vmatprep.subr.bf16.mxu0 %v5427_v51  ;;  %5617 = vmatpush3.bf16.msra.mxu1 %v5427_v51 }
  0x37   : > { %5610 = vmatprep.subr.bf16.mxu1 %v5431_v54 }
  0x38   : > { %5198 = vmatmul.mubr.msk.f32.gmra.mrb[12].mxu0 %vm282_vm0, %v263_v49 }
  0x39   : > { %5200 = vmatprep.mubr.msk.f32.mxu0 %vm282_vm0, %v264_v50  ;;  %5430 = vmatpush3.bf16.msra.mxu0 %v5427_v51 }
  0x3a   : > { %5432 = vmatprep.subr.bf16.mxu0 %v5431_v54  ;;  %5618 = vmatpush3.bf16.msra.mxu1 %v5431_v54 }
  0x3c   : > { %5201 = vmatmul.mubr.msk.f32.gmra.mrb[14].mxu0 %vm282_vm0, %v265_v52 }
  0x3d   : > { %5203 = vmatprep.mubr.msk.f32.mxu0 %vm282_vm0, %v266_v53  ;;  %5434 = vmatpush3.bf16.msra.mxu0 %v5431_v54 }
  0x3e   : > { %5436 = vmatprep.subr.bf16.mxu0 %v6553_v3 }
  0x40   : > { %5204 = vmatmul.mubr.msk.f32.gmra.mrb[16].mxu0 %vm282_vm0, %v267_v55  ;;  %v903_v55 = vld [vmem:[%s6777_s26 + $0x48] sm:$0xff] }
  0x41   : > { %5206 = vmatprep.mubr.msk.f32.mxu0 %vm282_vm0, %v268_v56 }
  0x44   : > { %5207 = vmatmul.mubr.msk.f32.gmra.mrb[18].mxu0 %vm282_vm0, %v269_v57  ;;  %v904_v57 = vld [vmem:[%s6777_s26 + $0x50] sm:$0xff] }
  0x45   : > { %5209 = vmatprep.mubr.msk.f32.mxu0 %vm282_vm0, %v270_v58 }
  0x48   : > { %5210 = vmatmul.mubr.msk.f32.gmra.mrb[20].mxu0 %vm282_vm0, %v271_v59 }
  0x49   : > { %5212 = vmatprep.mubr.msk.f32.mxu0 %vm282_vm0, %v272_v60 }
  0x4c   : > { %5213 = vmatmul.mubr.msk.f32.gmra.mrb[22].mxu0 %vm282_vm0, %v273_v61 }
  0x4d   : > { %5215 = vmatprep.mubr.msk.f32.mxu0 %vm282_vm0, %v274_v62  ;;  %v905_v62 = vld [vmem:[%s6777_s26 + $0x58] sm:$0xff] }
  0x50   : > { %5216 = vmatmul.mubr.msk.f32.gmra.mrb[24].mxu0 %vm282_vm0, %v275_v63 }
  0x51   : > { %5218 = vmatprep.mubr.msk.f32.mxu0 %vm282_vm0, %v276_v0 }
  0x54   : > { %5219 = vmatmul.mubr.msk.f32.gmra.mrb[26].mxu0 %vm282_vm0, %v277_v1  ;;  %v906_v1 = vld [vmem:[%s6777_s26 + $0x60] sm:$0xff] }
  0x55   : > { %5221 = vmatprep.mubr.msk.f32.mxu0 %vm282_vm0, %v278_v2 }
  0x58   : > { %5222 = vmatmul.mubr.msk.f32.gmra.mrb[28].mxu0 %vm282_vm0, %v279_v4 }
  0x59   : > { %5224 = vmatprep.mubr.msk.f32.mxu0 %vm282_vm0, %v280_v5  ;;  %v907_v5 = vld [vmem:[%s6777_s26 + $0x68] sm:$0xff] }
  0x5c   : > { %5225 = vmatmul.mubr.msk.f32.gmra.mrb[30].mxu0 %vm282_vm0, %v281_v7 }
  0x8d   : > { %v5669_v21 = vpop.permute.xlu0 %5668 }
  0x8e   : > { %v5671_v24 = vunpack.i.h.bf16 %v5669_v21  ;;  %v5670_v25 = vunpack.i.l.bf16 %v5669_v21  ;;  %v5674_v34 = vpop.permute.xlu1 %5673 }
  0x8f   : > { %v5676_v40 = vunpack.i.h.bf16 %v5674_v34  ;;  %v5675_v41 = vunpack.i.l.bf16 %v5674_v34 }
  0x90   : > { %v5443_v32 = vpack.c.bf16 %v5671_v24, %v5670_v25 }
  0x91   : > { %v5447_v51 = vpack.c.bf16 %v5676_v40, %v5675_v41 }
  0x92   : > { %5444 = vmatprep.subr.bf16.mxu1 %v5443_v32  ;;  %v5679_v46 = vpop.permute.xlu1 %5678 }
  0x93   : > { %v5681_v49 = vunpack.i.h.bf16 %v5679_v46  ;;  %v5680_v50 = vunpack.i.l.bf16 %v5679_v46 }
  0x95   : > { %v6880_v58 = vpack.c.bf16 %v5681_v49, %v5680_v50 }
  0xf3   : > { %v6749_v8 = vpop.f32.mrb[0].mxu0 }
  0xf4   : > { %v6751_v9 = vpop.f32.mrb[1].mxu0 }
  0xf5   : > { %5259 = vmatprep.mubr.f32.mxu0 %v6751_v9  ;;  %v5712_v10 = vpack.i.bf16 %v6749_v8, %v6751_v9  ;;  %v5477_v11 = vpack.c.bf16 %v6749_v8, %v6751_v9 }
  0xf6   : > { %5260 = vmatmul.mubr.f32.vlgmr.msra.gmra.mrb[32].mxu0 %v6749_v8 }
  0xf7   : > { %5438 = vmatpush3.bf16.msra.mxu0 %v6553_v3  ;;  %5713 = vrot.lane.b32.xlu1 %v5712_v10, %s6457_s16  ;;  %v6761_v12 = vpop.f32.mrb[2].mxu0 }
  0xf8   : > { %5708 = vrot.lane.b32.xlu0 %v5712_v10, %s6458_s11  ;;  %v6765_v13 = vpop.f32.mrb[3].mxu0  ;;  %5440 = vmatprep.subr.bf16.mxu0 %v6561_v6 }
  0xf9   : > { %5262 = vmatprep.mubr.f32.mxu0 %v6765_v13  ;;  %v5722_v14 = vpack.i.bf16 %v6761_v12, %v6765_v13  ;;  %v5481_v3 = vpack.c.bf16 %v6761_v12, %v6765_v13 }
  0xfa   : > { %5263 = vmatmul.mubr.f32.gmra.mrb[34].mxu0 %v6761_v12 }
  0xfb   : > { %5718 = vrot.lane.b32.xlu1 %v5712_v10, %s6459_s30  ;;  %v6780_v15 = vpop.f32.mrb[4].mxu0  ;;  %5442 = vmatpush3.bf16.msra.mxu0 %v6561_v6  ;;  %v895_v6 = vld [vmem:[%s6777_s26 + $0x8] sm:$0xff] }
  0xfc   : > { %v6783_v16 = vpop.f32.mrb[5].mxu0 }
  0xfd   : > { %5265 = vmatprep.mubr.f32.mxu0 %v6783_v16  ;;  %v6788_v17 = vpack.i.bf16 %v6780_v15, %v6783_v16  ;;  %v5485_v19 = vpack.c.bf16 %v6780_v15, %v6783_v16 }
  0xfe   : > { %5266 = vmatmul.mubr.f32.gmra.mrb[36].mxu0 %v6780_v15 }
  0xff   : > { %5723 = vrot.lane.b32.xlu1 %v5722_v14, %s6458_s11  ;;  %5748 = vrot.lane.b32.xlu0 %v6788_v17, %s6459_s30  ;;  %v6798_v20 = vpop.f32.mrb[6].mxu0 }
 0x100   : > { %5315 = vmatprep.mubr.msk.f32.mxu0 %vm282_vm0, %v894_v18  ;;  %v6801_v22 = vpop.f32.mrb[7].mxu0 }
 0x101   : > { %v6806_v26 = vpack.i.bf16 %v6798_v20, %v6801_v22  ;;  %5268 = vmatprep.mubr.f32.mxu1 %v6801_v22  ;;  %v5489_v27 = vpack.c.bf16 %v6798_v20, %v6801_v22 }
 0x102   : > { %5316 = vmatmul.mubr.msk.f32.vlgmr.msra.gmra.mrb[38].mxu0 %vm282_vm0, %v895_v6  ;;  %5269 = vmatmul.mubr.f32.vlgmr.msra.gmra.mrb[0].mxu1 %v6798_v20  ;;  %v909_v6 = vld [vmem:[%s6777_s26 + $0x78] sm:$0xff] }
 0x103   : > { %5728 = vrot.lane.b32.xlu1 %v5722_v14, %s6457_s16  ;;  %v6814_v28 = vpop.f32.mrb[8].mxu0  ;;  %5318 = vmatprep.mubr.msk.f32.mxu0 %vm282_vm0, %v896_v23 }
 0x104   : > { %v6818_v30 = vpop.f32.mrb[9].mxu0  ;;  %5446 = vmatpush3.bf16.msra.mxu1 %v5443_v32 }
 0x105   : > { %v6823_v33 = vpack.i.bf16 %v6814_v28, %v6818_v30  ;;  %5271 = vmatprep.mubr.f32.mxu1 %v6818_v30  ;;  %v5493_v35 = vpack.c.bf16 %v6814_v28, %v6818_v30  ;;  %5448 = vmatprep.subr.bf16.mxu1 %v5447_v51 }
 0x106   : > { %5319 = vmatmul.mubr.msk.f32.gmra.mrb[40].mxu0 %vm282_vm0, %v897_v29  ;;  %5272 = vmatmul.mubr.f32.gmra.mrb[2].mxu1 %v6814_v28 }
 0x107   : > { %5733 = vrot.lane.b32.xlu1 %v5722_v14, %s6459_s30  ;;  %v6831_v36 = vpop.f32.mrb[10].mxu0  ;;  %5321 = vmatprep.mubr.msk.f32.mxu0 %vm282_vm0, %v898_v31 }
 0x108   : > { %v6835_v38 = vpop.f32.mrb[11].mxu0  ;;  %5768 = vrot.lane.b32.xlu0 %v6823_v33, %s6458_s11  ;;  %5450 = vmatpush3.bf16.msra.mxu1 %v5447_v51 }
 0x109   : > { %v6842_v42 = vpack.i.bf16 %v6831_v36, %v6835_v38  ;;  %5274 = vmatprep.mubr.f32.mxu1 %v6835_v38  ;;  %v5497_v43 = vpack.c.bf16 %v6831_v36, %v6835_v38  ;;  %5452 = vmatprep.subr.bf16.mxu1 %v6880_v58 }
 0x10a   : > { %5322 = vmatmul.mubr.msk.f32.gmra.mrb[42].mxu0 %vm282_vm0, %v899_v37  ;;  %5275 = vmatmul.mubr.f32.gmra.mrb[4].mxu1 %v6831_v36  ;;  %v5694_v36 = vpop.permute.xlu0 %5693 }
 0x10b   : > { %5738 = vrot.lane.b32.xlu1 %v6788_v17, %s6458_s11  ;;  %v6851_v44 = vpop.f32.mrb[12].mxu0  ;;  %5324 = vmatprep.mubr.msk.f32.mxu0 %vm282_vm0, %v900_v39 }
 0x10c   : > { %v6855_v47 = vpop.f32.mrb[13].mxu0  ;;  %5773 = vrot.lane.b32.xlu0 %v6823_v33, %s6457_s16  ;;  %5454 = vmatpush3.bf16.msra.mxu1 %v6880_v58 }
 0x10d   : > { %v6862_v52 = vpack.i.bf16 %v6851_v44, %v6855_v47  ;;  %5277 = vmatprep.mubr.f32.mxu1 %v6855_v47  ;;  %v5501_v53 = vpack.c.bf16 %v6851_v44, %v6855_v47 }
 0x10e   : > { %5325 = vmatmul.mubr.msk.f32.gmra.mrb[44].mxu0 %vm282_vm0, %v901_v45  ;;  %5278 = vmatmul.mubr.f32.gmra.mrb[6].mxu1 %v6851_v44  ;;  %v5704_v50 = vpop.permute.xlu0 %5703 }
 0x10f   : > { %5743 = vrot.lane.b32.xlu1 %v6788_v17, %s6457_s16  ;;  %v6871_v54 = vpop.f32.mrb[14].mxu0  ;;  %5327 = vmatprep.mubr.msk.f32.mxu0 %vm282_vm0, %v902_v48  ;;  %v908_v17 = vld [vmem:[%s6777_s26 + $0x70] sm:$0xff]  ;;  %v5706_v51 = vunpack.i.h.bf16 %v5704_v50 }
 0x110   : > { %v6875_v56 = vpop.f32.mrb[15].mxu0  ;;  %5788 = vrot.lane.b32.xlu0 %v6842_v42, %s6457_s16 }
 0x111   : > { %v6884_v59 = vpack.i.bf16 %v6871_v54, %v6875_v56  ;;  %5280 = vmatprep.mubr.f32.mxu1 %v6875_v56  ;;  %v5505_v60 = vpack.c.bf16 %v6871_v54, %v6875_v56 }
 0x112   : > { %5328 = vmatmul.mubr.msk.f32.gmra.mrb[46].mxu0 %vm282_vm0, %v903_v55  ;;  %5281 = vmatmul.mubr.f32.gmra.mrb[8].mxu1 %v6871_v54 }
 0x113   : > { %9776 = vst [vmem:[#allocation5_spill] sm:$0xff] %v6884_v59  ;;  %v5205_v61 = vpop.f32.mrb[16].mxu0  ;;  %5753 = vrot.lane.b32.xlu1 %v6806_v26, %s6458_s11  ;;  %5330 = vmatprep.mubr.msk.f32.mxu0 %vm282_vm0, %v904_v57 }
 0x114   : > { %v525_v63 = vpop.f32.mrb[17].mxu0  ;;  %5798 = vrot.lane.b32.xlu0 %v6862_v52, %s6458_s11 }
 0x115   : > { %v5475_v0 = vpack.c.bf16 %v5205_v61, %v525_v63  ;;  %v6899_v2 = vpack.i.bf16 %v5205_v61, %v525_v63  ;;  %5283 = vmatprep.mubr.f32.mxu1 %v525_v63 }
 0x116   : > { %5331 = vmatmul.mubr.msk.f32.gmra.mrb[48].mxu0 %vm282_vm0, %v905_v62  ;;  %5284 = vmatmul.mubr.f32.gmra.mrb[10].mxu1 %v5205_v61 }
 0x117   : > { %v5208_v4 = vpop.f32.mrb[18].mxu0  ;;  %5476 = vmatprep.subr.bf16.mxu0 %v5475_v0  ;;  %5758 = vrot.lane.b32.xlu1 %v6806_v26, %s6457_s16 }
 0x118   : > { %v535_v7 = vpop.f32.mrb[19].mxu0  ;;  %5478 = vmatpush3.bf16.msra.mxu0 %v5477_v11  ;;  %5333 = vmatprep.mubr.msk.f32.mxu0 %vm282_vm0, %v906_v1 }
 0x119   : > { %v5479_v10 = vpack.c.bf16 %v5208_v4, %v535_v7  ;;  %5803 = vrot.lane.b32.xlu0 %v6862_v52, %s6457_s16  ;;  %v6911_v14 = vpack.i.bf16 %v5208_v4, %v535_v7  ;;  %5286 = vmatprep.mubr.f32.mxu1 %v535_v7 }
 0x11a   : > { %5334 = vmatmul.mubr.msk.f32.gmra.mrb[50].mxu0 %vm282_vm0, %v907_v5  ;;  %5287 = vmatmul.mubr.f32.gmra.mrb[12].mxu1 %v5208_v4 }
 0x11b   : > { %v5211_v18 = vpop.f32.mrb[20].mxu0  ;;  %5480 = vmatprep.subr.bf16.mxu0 %v5479_v10  ;;  %5763 = vrot.lane.b32.xlu1 %v6806_v26, %s6459_s30 }
 0x11c   : > { %v545_v8 = vpop.f32.mrb[21].mxu0  ;;  %5482 = vmatpush3.bf16.msra.mxu0 %v5481_v3  ;;  %5336 = vmatprep.mubr.msk.f32.mxu0 %vm282_vm0, %v908_v17 }
 0x11d   : > { %v5483_v9 = vpack.c.bf16 %v5211_v18, %v545_v8  ;;  %5818 = vrot.lane.b32.xlu0 %v6899_v2, %s6458_s11  ;;  %v6924_v11 = vpack.i.bf16 %v5211_v18, %v545_v8  ;;  %5289 = vmatprep.mubr.f32.mxu1 %v545_v8 }
 0x11e   : > { %5337 = vmatmul.mubr.msk.f32.gmra.mrb[52].mxu0 %vm282_vm0, %v909_v6  ;;  %5290 = vmatmul.mubr.f32.gmra.mrb[14].mxu1 %v5211_v18 }
 0x11f   : > { %5484 = vmatprep.subr.bf16.mxu0 %v5483_v9  ;;  %5778 = vrot.lane.b32.xlu1 %v6823_v33, %s6459_s30  ;;  %v5214_v21 = vpop.f32.mrb[22].mxu0 }
 0x120   : > { %5486 = vmatpush3.bf16.msra.mxu0 %v5485_v19  ;;  %v555_v12 = vpop.f32.mrb[23].mxu0  ;;  %v5684_v19 = vpop.permute.xlu1 %5683 }
 0x121   : > { %5828 = vrot.lane.b32.xlu0 %v6899_v2, %s6459_s30  ;;  %v6934_v13 = vpack.i.bf16 %v5214_v21, %v555_v12  ;;  %v5487_v3 = vpack.c.bf16 %v5214_v21, %v555_v12  ;;  %5292 = vmatprep.mubr.f32.mxu1 %v555_v12  ;;  %v5685_v29 = vunpack.i.l.bf16 %v5684_v19 }
 0x122   : > { %5293 = vmatmul.mubr.f32.gmra.mrb[16].mxu1 %v5214_v21 }
 0x123   : > { %5783 = vrot.lane.b32.xlu1 %v6842_v42, %s6458_s11  ;;  %v5217_v23 = vpop.f32.mrb[24].mxu0  ;;  %5488 = vmatprep.subr.bf16.mxu0 %v5487_v3 }
 0x124   : > { %v565_v24 = vpop.f32.mrb[25].mxu0  ;;  %5490 = vmatpush3.bf16.msra.mxu0 %v5489_v27  ;;  %v5686_v27 = vunpack.i.h.bf16 %v5684_v19  ;;  %v5689_v28 = vpop.permute.xlu1 %5688 }
 0x125   : > { %5843 = vrot.lane.b32.xlu0 %v6911_v14, %s6459_s30  ;;  %v5491_v15 = vpack.c.bf16 %v5217_v23, %v565_v24  ;;  %v6943_v16 = vpack.i.bf16 %v5217_v23, %v565_v24  ;;  %5295 = vmatprep.mubr.f32.mxu1 %v565_v24  ;;  %v5691_v34 = vunpack.i.h.bf16 %v5689_v28 }
 0x126   : > { %5296 = vmatmul.mubr.f32.gmra.mrb[18].mxu1 %v5217_v23  ;;  %v5455_v37 = vpack.c.bf16 %v5686_v27, %v5685_v29 }
 0x127   : > { %5793 = vrot.lane.b32.xlu1 %v6842_v42, %s6459_s30  ;;  %v5220_v25 = vpop.f32.mrb[26].mxu0  ;;  %5492 = vmatprep.subr.bf16.mxu0 %v5491_v15  ;;  %v5696_v42 = vunpack.i.h.bf16 %v5694_v36 }
 0x128   : > { %v575_v26 = vpop.f32.mrb[27].mxu0  ;;  %5494 = vmatpush3.bf16.msra.mxu0 %v5493_v35  ;;  %v5690_v35 = vunpack.i.l.bf16 %v5689_v28  ;;  %5456 = vmatprep.subr.bf16.mxu1 %v5455_v37  ;;  %v5699_v46 = vpop.permute.xlu1 %5698 }
 0x129   : > { %5848 = vrot.lane.b32.xlu0 %v6924_v11, %s6458_s11  ;;  %v5495_v20 = vpack.c.bf16 %v5220_v25, %v575_v26  ;;  %v6952_v22 = vpack.i.bf16 %v5220_v25, %v575_v26  ;;  %5298 = vmatprep.mubr.f32.mxu1 %v575_v26  ;;  %v5701_v47 = vunpack.i.h.bf16 %v5699_v46  ;;  %v5700_v48 = vunpack.i.l.bf16 %v5699_v46 }
 0x12a   : > { %5299 = vmatmul.mubr.f32.gmra.mrb[20].mxu1 %v5220_v25  ;;  %v5459_v45 = vpack.c.bf16 %v5691_v34, %v5690_v35 }
 0x12b   : > { %5808 = vrot.lane.b32.xlu1 %v6862_v52, %s6459_s30  ;;  %v5223_v31 = vpop.f32.mrb[28].mxu0  ;;  %5496 = vmatprep.subr.bf16.mxu0 %v5495_v20  ;;  %v5467_v49 = vpack.c.bf16 %v5701_v47, %v5700_v48  ;;  %v5705_v52 = vunpack.i.l.bf16 %v5704_v50 }
 0x12c   : > { %v585_v32 = vpop.f32.mrb[29].mxu0  ;;  %5498 = vmatpush3.bf16.msra.mxu0 %v5497_v43  ;;  %v5695_v43 = vunpack.i.l.bf16 %v5694_v36  ;;  %5458 = vmatpush3.bf16.msra.mxu1 %v5455_v37 }
 0x12d   : > { %5858 = vrot.lane.b32.xlu0 %v6924_v11, %s6459_s30  ;;  %v5499_v30 = vpack.c.bf16 %v5223_v31, %v585_v32  ;;  %v5917_v33 = vpack.i.bf16 %v5223_v31, %v585_v32  ;;  %5301 = vmatprep.mubr.f32.mxu1 %v585_v32 }
 0x12e   : > { %5302 = vmatmul.mubr.f32.gmra.mrb[22].mxu1 %v5223_v31  ;;  %5460 = vmatprep.subr.bf16.mxu1 %v5459_v45  ;;  %v5463_v44 = vpack.c.bf16 %v5696_v42, %v5695_v43 }
 0x12f   : > { %5813 = vrot.lane.b32.xlu1 %v6884_v59, %s6458_s11  ;;  %v5226_v39 = vpop.f32.mrb[30].mxu0  ;;  %5500 = vmatprep.subr.bf16.mxu0 %v5499_v30 }
 0x130   : > { %v595_v40 = vpop.f32.mrb[31].mxu0  ;;  %5502 = vmatpush3.bf16.msra.mxu0 %v5501_v53  ;;  %5462 = vmatpush3.bf16.msra.mxu1 %v5459_v45  ;;  %v5471_v53 = vpack.c.bf16 %v5706_v51, %v5705_v52 }
 0x131   : > { %5868 = vrot.lane.b32.xlu0 %v6934_v13, %s6457_s16  ;;  %v5503_v38 = vpack.c.bf16 %v5226_v39, %v595_v40  ;;  %v6968_v41 = vpack.i.bf16 %v5226_v39, %v595_v40  ;;  %5304 = vmatprep.mubr.f32.mxu1 %v595_v40 }
 0x132   : > { %5305 = vmatmul.mubr.f32.gmra.mrb[24].mxu1 %v5226_v39  ;;  %5464 = vmatprep.subr.bf16.mxu1 %v5463_v44 }
 0x133   : > { %9777 = vst [vmem:[#allocation6_spill] sm:$0xff] %v6968_v41  ;;  %5823 = vrot.lane.b32.xlu1 %v6899_v2, %s6457_s16  ;;  %5504 = vmatprep.subr.bf16.mxu0 %v5503_v38 }
 0x134   : > { %5506 = vmatpush3.bf16.msra.mxu0 %v5505_v60  ;;  %5466 = vmatpush3.bf16.msra.mxu1 %v5463_v44 }
 0x135   : > { %5878 = vrot.lane.b32.xlu0 %v6943_v16, %s6458_s11  ;;  %5468 = vmatprep.subr.bf16.mxu1 %v5467_v49 }
 0x137   : > { %5833 = vrot.lane.b32.xlu1 %v6911_v14, %s6458_s11 }
 0x138   : > { %5470 = vmatpush3.bf16.msra.mxu1 %v5467_v49 }
 0x139   : > { %5883 = vrot.lane.b32.xlu0 %v6943_v16, %s6457_s16  ;;  %5472 = vmatprep.subr.bf16.mxu1 %v5471_v53 }
 0x13b   : > { %5838 = vrot.lane.b32.xlu1 %v6911_v14, %s6457_s16 }
 0x13c   : > { %5474 = vmatpush3.bf16.msra.mxu1 %v5471_v53 }
 0x13d   : > { %5898 = vrot.lane.b32.xlu0 %v6952_v22, %s6457_s16 }
 0x13f   : > { %5853 = vrot.lane.b32.xlu1 %v6924_v11, %s6457_s16 }
 0x141   : > { %5908 = vrot.lane.b32.xlu0 %v5917_v33, %s6458_s11 }
 0x143   : > { %5863 = vrot.lane.b32.xlu1 %v6934_v13, %s6458_s11 }
 0x145   : > { %5913 = vrot.lane.b32.xlu0 %v5917_v33, %s6457_s16 }
 0x147   : > { %5873 = vrot.lane.b32.xlu1 %v6934_v13, %s6459_s30 }
 0x149   : > { %5928 = vrot.lane.b32.xlu0 %v6968_v41, %s6457_s16 }
 0x14b   : > { %5888 = vrot.lane.b32.xlu1 %v6943_v16, %s6459_s30 }
 0x14f   : > { %5893 = vrot.lane.b32.xlu1 %v6952_v22, %s6458_s11 }
 0x153   : > { %5903 = vrot.lane.b32.xlu1 %v6952_v22, %s6459_s30 }
 0x157   : > { %5918 = vrot.lane.b32.xlu1 %v5917_v33, %s6459_s30 }
 0x15b   : > { %5923 = vrot.lane.b32.xlu1 %v6968_v41, %s6458_s11  ;;  %v9804_v41 = vmov 3  }
 0x169   : > { %v7005_v54 = vpop.permute.xlu1 %5713 }
 0x16a   : > { %v7011_v57 = vpop.permute.xlu0 %5708 }
 0x16b   : > { %v5711_v43 = vunpack.i.h.bf16 %v7011_v57  ;;  %v5710_v45 = vunpack.i.l.bf16 %v7011_v57 }
 0x16d   : > { %v7007_v55 = vpop.permute.xlu1 %5718  ;;  %v5509_v53 = vpack.c.bf16 %v5711_v43, %v5710_v45 }
 0x171   : > { %v7009_v56 = vpop.permute.xlu1 %5723  ;;  %v7015_v60 = vpop.permute.xlu0 %5748 }
 0x175   : > { %v7013_v58 = vpop.permute.xlu1 %5728 }
 0x176   : > { %9778 = vst [vmem:[#allocation7_spill] sm:$0xff] %v7013_v58 }
 0x179   : > { %v7017_v61 = vpop.permute.xlu1 %5733 }
 0x17a   : > { %9779 = vst [vmem:[#allocation8_spill] sm:$0xff] %v7017_v61  ;;  %v7019_v62 = vpop.permute.xlu0 %5768 }
 0x17d   : > { %v7021_v63 = vpop.permute.xlu1 %5738 }
 0x17e   : > { %v7023_v0 = vpop.permute.xlu0 %5773 }
 0x17f   : > { %9780 = vst [vmem:[#allocation9_spill] sm:$0xff] %v7023_v0 }
 0x181   : > { %v7025_v1 = vpop.permute.xlu1 %5743 }
 0x182   : > { %9781 = vst [vmem:[#allocation10_spill] sm:$0xff] %v7025_v1  ;;  %v7027_v2 = vpop.permute.xlu0 %5788 }
 0x183   : > { %9782 = vst [vmem:[#allocation11_spill] sm:$0xff] %v7027_v2 }
 0x185   : > { %v7029_v4 = vpop.permute.xlu1 %5753 }
 0x186   : > { %v7031_v5 = vpop.permute.xlu0 %5798 }
 0x189   : > { %v7033_v7 = vpop.permute.xlu1 %5758 }
 0x18a   : > { %9783 = vst [vmem:[#allocation12_spill] sm:$0xff] %v7033_v7 }
 0x18b   : > { %v7035_v10 = vpop.permute.xlu0 %5803 }
 0x18c   : > { %9784 = vst [vmem:[#allocation13_spill] sm:$0xff] %v7035_v10 }
 0x18d   : > { %v7037_v14 = vpop.permute.xlu1 %5763 }
 0x18e   : > { %9785 = vst [vmem:[#allocation14_spill] sm:$0xff] %v7037_v14 }
 0x18f   : > { %v5819_v17 = vpop.permute.xlu0 %5818 }
 0x190   : > { %v5821_v18 = vunpack.i.h.bf16 %v5819_v17  ;;  %v5820_v6 = vunpack.i.l.bf16 %v5819_v17  ;;  %v5726_v17 = vunpack.i.h.bf16 %v7009_v56 }
 0x191   : > { %v7039_v8 = vpop.permute.xlu1 %5778 }
 0x192   : > { %9786 = vst [vmem:[#allocation15_spill] sm:$0xff] %v7039_v8  ;;  %v5507_v9 = vpack.c.bf16 %v5821_v18, %v5820_v6  ;;  %v5725_v18 = vunpack.i.l.bf16 %v7009_v56  ;;  %v5740_v56 = vunpack.i.l.bf16 %v7021_v63 }
 0x193   : > { %v7049_v19 = vpop.permute.xlu0 %5828 }
 0x194   : > { %5508 = vmatprep.subr.bf16.mxu1 %v5507_v9 }
 0x195   : > { %v7041_v11 = vpop.permute.xlu1 %5783 }
 0x197   : > { %v7053_v26 = vpop.permute.xlu0 %5843 }
 0x198   : > { %9790 = vst [vmem:[#allocation19_spill] sm:$0xff] %v7053_v26  ;;  %v1318_v26 = vld [vmem:[%s7237_s10 + $0x30] sm:$0xff] }
 0x199   : > { %v7043_v21 = vpop.permute.xlu1 %5793  ;;  %v7538_v0 = vunpack.c.h.bf16 %v1318_v26 }
 0x19a   : > { %9787 = vst [vmem:[#allocation16_spill] sm:$0xff] %v7043_v21 }
 0x19b   : > { %v5849_v22 = vpop.permute.xlu0 %5848 }
 0x19c   : > { %v5851_v48 = vunpack.i.h.bf16 %v5849_v22  ;;  %v5850_v49 = vunpack.i.l.bf16 %v5849_v22  ;;  %v5513_v22 = vpack.c.bf16 %v5726_v17, %v5725_v18 }
 0x19d   : > { %v7045_v12 = vpop.permute.xlu1 %5808 }
 0x19e   : > { %9788 = vst [vmem:[#allocation17_spill] sm:$0xff] %v7045_v12 }
 0x19f   : > { %v7057_v29 = vpop.permute.xlu0 %5858 }
 0x1a0   : > { %9792 = vst [vmem:[#allocation21_spill] sm:$0xff] %v7057_v29  ;;  %v1314_v29 = vld [vmem:[%s7237_s10 + $0x10] sm:$0xff] }
 0x1a1   : > { %v7047_v13 = vpop.permute.xlu1 %5813 }
 0x1a3   : > { %v7061_v32 = vpop.permute.xlu0 %5868 }
 0x1a4   : > { %9794 = vst [vmem:[#allocation23_spill] sm:$0xff] %v7061_v32 }
 0x1a5   : > { %v5824_v3 = vpop.permute.xlu1 %5823 }
 0x1a6   : > { %v5826_v23 = vunpack.i.h.bf16 %v5824_v3  ;;  %v5825_v24 = vunpack.i.l.bf16 %v5824_v3 }
 0x1a7   : > { %v7065_v37 = vpop.permute.xlu0 %5878 }
 0x1a8   : > { %v5539_v15 = vpack.c.bf16 %v5826_v23, %v5825_v24  ;;  %v5515_v24 = vpack.c.bf16 %v5851_v48, %v5850_v49 }
 0x1a9   : > { %v5834_v16 = vpop.permute.xlu1 %5833 }
 0x1aa   : > { %5540 = vmatprep.subr.bf16.mxu0 %v5539_v15  ;;  %v5836_v40 = vunpack.i.h.bf16 %v5834_v16  ;;  %v5835_v36 = vunpack.i.l.bf16 %v5834_v16 }
 0x1ab   : > { %v7071_v44 = vpop.permute.xlu0 %5883 }
 0x1ac   : > { %9796 = vst [vmem:[#allocation25_spill] sm:$0xff] %v7071_v44  ;;  %v5511_v51 = vpack.c.bf16 %v5836_v40, %v5835_v36  ;;  %v5880_v40 = vunpack.i.l.bf16 %v7065_v37 }
 0x1ad   : > { %v7051_v25 = vpop.permute.xlu1 %5838 }
 0x1ae   : > { %9789 = vst [vmem:[#allocation18_spill] sm:$0xff] %v7051_v25 }
 0x1b1   : > { %v7055_v20 = vpop.permute.xlu1 %5853 }
 0x1b2   : > { %9791 = vst [vmem:[#allocation20_spill] sm:$0xff] %v7055_v20 }
 0x1b5   : > { %v5864_v27 = vpop.permute.xlu1 %5863 }
 0x1b6   : > { %v5866_v3 = vunpack.i.h.bf16 %v5864_v27  ;;  %v5865_v23 = vunpack.i.l.bf16 %v5864_v27  ;;  %v5881_v27 = vunpack.i.h.bf16 %v7065_v37 }
 0x1b8   : > { %v5519_v36 = vpack.c.bf16 %v5866_v3, %v5865_v23 }
 0x1b9   : > { %v7059_v31 = vpop.permute.xlu1 %5873 }
 0x1ba   : > { %9793 = vst [vmem:[#allocation22_spill] sm:$0xff] %v7059_v31 }
 0x1bd   : > { %v7063_v33 = vpop.permute.xlu1 %5888 }
 0x1be   : > { %9795 = vst [vmem:[#allocation24_spill] sm:$0xff] %v7063_v33 }
 0x1c1   : > { %v7067_v42 = vpop.permute.xlu1 %5893 }
 0x1c2   : > { %v5896_v37 = vunpack.i.h.bf16 %v7067_v42 }
 0x1c5   : > { %v7077_v57 = vpop.permute.xlu1 %5903 }
 0x1c6   : > { %9797 = vst [vmem:[#allocation26_spill] sm:$0xff] %v7077_v57 }
 0x1c9   : > { %v5261_v28 = vpop.f32.mrb[32].mxu0  ;;  %v7095_v48 = vpop.permute.xlu1 %5918 }
 0x1ca   : > { %v670_v30 = vpop.f32.mrb[33].mxu0  ;;  %9799 = vst [vmem:[#allocation28_spill] sm:$0xff] %v7095_v48 }
 0x1cb   : > { %829 = vxpose.xlu0.b32.start [1/16] (narrow) %v670_v30, 8  ;;  %v7085_v30 = vpop.permute.xlu0 %5898 }
 0x1cc   : > { %9798 = vst [vmem:[#allocation27_spill] sm:$0xff] %v7085_v30 }
 0x1cd   : > { %v5264_v34 = vpop.f32.mrb[34].mxu0 }
 0x1ce   : > { %v680_v35 = vpop.f32.mrb[35].mxu0 }
 0x1cf   : > { %830 = vxpose.xlu0.b32.cont [2/16] (narrow) %v5261_v28, 8  ;;  %v5741_v28 = vunpack.i.h.bf16 %v7021_v63  ;;  %v5756_v63 = vunpack.i.h.bf16 %v7029_v4  ;;  %v5909_v3 = vpop.permute.xlu0 %5908 }
 0x1d1   : > { %v5267_v39 = vpop.f32.mrb[36].mxu0 }
 0x1d2   : > { %v690_v38 = vpop.f32.mrb[37].mxu0 }
 0x1d3   : > { %831 = vxpose.xlu0.b32.cont [3/16] (narrow) %v680_v35, 8 }
 0x1d5   : > { %v5317_v46 = vpop.f32.mrb[38].mxu0  ;;  %v7073_v47 = vpop.f32.mrb[0].mxu1 }
 0x1d6   : > { %v1024_v50 = vpop.f32.mrb[39].mxu0  ;;  %v700_v52 = vpop.f32.mrb[1].mxu1 }
 0x1d7   : > { %832 = vxpose.xlu0.b32.cont [4/16] (narrow) %v5264_v34, 8  ;;  %5371 = vmatprep.mubr.f32.mxu1 %v1024_v50 }
 0x1d8   : > { %5372 = vmatmul.mubr.f32.vlgmr.msra.gmra.mrb[26].mxu1 %v5317_v46  ;;  %v5517_v46 = vpack.c.bf16 %v5741_v28, %v5740_v56 }
 0x1d9   : > { %5510 = vmatpush3.bf16.msra.mxu1 %v5509_v53  ;;  %v5320_v6 = vpop.f32.mrb[40].mxu0  ;;  %v7079_v9 = vpop.f32.mrb[2].mxu1  ;;  %v5523_v53 = vpack.c.bf16 %v5881_v27, %v5880_v40  ;;  %v5786_v27 = vunpack.i.h.bf16 %v7041_v11 }
 0x1da   : > { %5512 = vmatprep.subr.bf16.mxu1 %v5511_v51  ;;  %v1034_v15 = vpop.f32.mrb[41].mxu0  ;;  %v7081_v16 = vpop.f32.mrb[3].mxu1  ;;  %v5895_v51 = vunpack.i.l.bf16 %v7067_v42  ;;  %v5911_v42 = vunpack.i.h.bf16 %v5909_v3 }
 0x1db   : > { %833 = vxpose.xlu0.b32.cont [5/16] (narrow) %v690_v38, 8  ;;  %5374 = vmatprep.mubr.f32.mxu1 %v1034_v15  ;;  %v5755_v38 = vunpack.i.l.bf16 %v7029_v4  ;;  %v5771_v4 = vunpack.i.h.bf16 %v7019_v62  ;;  %v5910_v15 = vunpack.i.l.bf16 %v5909_v3  ;;  %v5924_v40 = vpop.permute.xlu1 %5923  ;;  %v5830_v3 = vunpack.i.l.bf16 %v7049_v19 }
 0x1dc   : > { %5375 = vmatmul.mubr.f32.gmra.mrb[28].mxu1 %v5320_v6 }
 0x1dd   : > { %5514 = vmatpush3.bf16.msra.mxu1 %v5513_v22  ;;  %v5323_v34 = vpop.f32.mrb[42].mxu0  ;;  %v7087_v35 = vpop.f32.mrb[4].mxu1  ;;  %v5521_v6 = vpack.c.bf16 %v5756_v63, %v5755_v38  ;;  %v5527_v22 = vpack.c.bf16 %v5896_v37, %v5895_v51  ;;  %v5531_v63 = vpack.c.bf16 %v5911_v42, %v5910_v15  ;;  %v5801_v51 = vunpack.i.h.bf16 %v7031_v5 }
 0x1de   : > { %5516 = vmatprep.subr.bf16.mxu1 %v5515_v24  ;;  %v1044_v43 = vpop.f32.mrb[43].mxu0  ;;  %v7091_v45 = vpop.f32.mrb[5].mxu1 }
 0x1df   : > { %834 = vxpose.xlu0.b32.cont [6/16] (narrow) %v5267_v39, 8  ;;  %5377 = vmatprep.mubr.f32.mxu1 %v1044_v43  ;;  %v5770_v39 = vunpack.i.l.bf16 %v7019_v62  ;;  %v5785_v62 = vunpack.i.l.bf16 %v7041_v11  ;;  %v5926_v43 = vunpack.i.h.bf16 %v5924_v40 }
 0x1e0   : > { %5378 = vmatmul.mubr.f32.gmra.mrb[30].mxu1 %v5323_v34 }
 0x1e1   : > { %5518 = vmatpush3.bf16.msra.mxu1 %v5517_v46  ;;  %v5326_v49 = vpop.f32.mrb[44].mxu0  ;;  %v7097_v50 = vpop.f32.mrb[6].mxu1  ;;  %v5525_v34 = vpack.c.bf16 %v5771_v4, %v5770_v39  ;;  %v5925_v46 = vunpack.i.l.bf16 %v5924_v40  ;;  %v5529_v37 = vpack.c.bf16 %v5786_v27, %v5785_v62  ;;  %v5816_v4 = vunpack.i.h.bf16 %v7047_v13 }
 0x1e2   : > { %5520 = vmatprep.subr.bf16.mxu1 %v5519_v36  ;;  %v1054_v17 = vpop.f32.mrb[45].mxu0  ;;  %v7101_v18 = vpop.f32.mrb[7].mxu1  ;;  %v5815_v39 = vunpack.i.l.bf16 %v7047_v13 }
 0x1e3   : > { %5380 = vmatprep.mubr.f32.mxu1 %v1054_v17  ;;  %835 = vxpose.xlu0.b32.cont [7/16] (narrow) %v700_v52, 8 }
 0x1e4   : > { %5381 = vmatmul.mubr.f32.gmra.mrb[32].mxu1 %v5326_v49 }
 0x1e5   : > { %5522 = vmatpush3.bf16.msra.mxu1 %v5521_v6  ;;  %v5329_v23 = vpop.f32.mrb[46].mxu0  ;;  %v7105_v24 = vpop.f32.mrb[8].mxu1 }
 0x1e6   : > { %5524 = vmatprep.subr.bf16.mxu1 %v5523_v53  ;;  %v1064_v28 = vpop.f32.mrb[47].mxu0  ;;  %v7107_v56 = vpop.f32.mrb[9].mxu1  ;;  %v5800_v53 = vunpack.i.l.bf16 %v7031_v5  ;;  %v5831_v5 = vunpack.i.h.bf16 %v7049_v19 }
 0x1e7   : > { %5383 = vmatprep.mubr.f32.mxu1 %v1064_v28  ;;  %836 = vxpose.xlu0.b32.cont [8/16] (narrow) %v7073_v47, 8  ;;  %v5535_v47 = vpack.c.bf16 %v5926_v43, %v5925_v46 }
 0x1e8   : > { %5384 = vmatmul.mubr.f32.gmra.mrb[34].mxu1 %v5329_v23  ;;  %v5533_v6 = vpack.c.bf16 %v5801_v51, %v5800_v53  ;;  %v5571_v13 = vpack.c.bf16 %v5831_v5, %v5830_v3 }
 0x1e9   : > { %5526 = vmatpush3.bf16.msra.mxu1 %v5525_v34  ;;  %v5332_v52 = vpop.f32.mrb[48].mxu0  ;;  %v5285_v36 = vpop.f32.mrb[10].mxu1 }
 0x1ea   : > { %5528 = vmatprep.subr.bf16.mxu1 %v5527_v22  ;;  %v1074_v38 = vpop.f32.mrb[49].mxu0  ;;  %v750_v49 = vpop.f32.mrb[11].mxu1  ;;  %v5537_v22 = vpack.c.bf16 %v5816_v4, %v5815_v39 }
 0x1eb   : > { %5386 = vmatprep.mubr.f32.mxu1 %v1074_v38  ;;  %837 = vxpose.xlu0.b32.cont [9/16] (narrow) %v7081_v16, 8  ;;  %v9575_v38 = vmov 1  }
 0x1ec   : > { %5387 = vmatmul.mubr.f32.gmra.mrb[36].mxu1 %v5332_v52  ;;  %861 = vxpose.xlu1.b32.start [1/16] (narrow) %v750_v49, 8 }
 0x1ed   : > { %5530 = vmatpush3.bf16.msra.mxu1 %v5529_v37  ;;  %v5335_v11 = vpop.f32.mrb[50].mxu0  ;;  %v5288_v23 = vpop.f32.mrb[12].mxu1 }
 0x1ee   : > { %5532 = vmatprep.subr.bf16.mxu1 %v5531_v63  ;;  %v1084_v17 = vpop.f32.mrb[51].mxu0  ;;  %v760_v15 = vpop.f32.mrb[13].mxu1  ;;  %v9577_v63 = vmov 3  }
 0x1ef   : > { %5389 = vmatprep.mubr.f32.mxu1 %v1084_v17  ;;  %838 = vxpose.xlu0.b32.cont [10/16] (narrow) %v7079_v9, 8 }
 0x1f0   : > { %5390 = vmatmul.mubr.f32.gmra.mrb[38].mxu1 %v5335_v11  ;;  %862 = vxpose.xlu1.b32.cont [2/16] (narrow) %v5285_v36, 8 }
 0x1f1   : > { %5534 = vmatpush3.bf16.msra.mxu1 %v5533_v6  ;;  %v5338_v16 = vpop.f32.mrb[52].mxu0  ;;  %v5291_v9 = vpop.f32.mrb[14].mxu1 }
 0x1f2   : > { %5536 = vmatprep.subr.bf16.mxu1 %v5535_v47  ;;  %v1094_v42 = vpop.f32.mrb[53].mxu0  ;;  %v770_v28 = vpop.f32.mrb[15].mxu1 }
 0x1f3   : > { %5392 = vmatprep.mubr.f32.mxu1 %v1094_v42  ;;  %839 = vxpose.xlu0.b32.cont [11/16] (narrow) %v7091_v45, 8  ;;  %v7212_v42 = vpop.permute.xlu0 %5913 }
 0x1f4   : > { %5393 = vmatmul.mubr.f32.gmra.mrb[40].mxu1 %v5338_v16  ;;  %863 = vxpose.xlu1.b32.cont [3/16] (narrow) %v760_v15, 8  ;;  %9800 = vst [vmem:[#allocation29_spill] sm:$0xff] %v7212_v42 }
 0x1f5   : > { %5538 = vmatpush3.bf16.msra.mxu1 %v5537_v22  ;;  %v5294_v19 = vpop.f32.mrb[16].mxu1 }
 0x1f6   : > { %5572 = vmatprep.subr.bf16.mxu1 %v5571_v13  ;;  %v780_v34 = vpop.f32.mrb[17].mxu1 }
 0x1f7   : > { %840 = vxpose.xlu0.b32.cont [12/16] (narrow) %v7087_v35, 8  ;;  %v7218_v22 = vpop.permute.xlu0 %5928 }
 0x1f8   : > { %864 = vxpose.xlu1.b32.cont [4/16] (narrow) %v5288_v23, 8  ;;  %v1440_v23 = vlaneseq  ;;  %9801 = vst [vmem:[#allocation30_spill] sm:$0xff] %v7218_v22 }
 0x1f9   : > { %v5297_v27 = vpop.f32.mrb[18].mxu1 }
 0x1fa   : > { %v790_v62 = vpop.f32.mrb[19].mxu1  ;;  %v7216_v15 = vshrl.u32 %v1440_v23, 7 }
 0x1fb   : > { %841 = vxpose.xlu0.b32.cont [13/16] (narrow) %v7101_v18, 8  ;;  %v9573_v18 = vmov 2  }
 0x1fc   : > { %865 = vxpose.xlu1.b32.cont [5/16] (narrow) %v770_v28, 8  ;;  %v2772_v13 = vsub.s32 2, %v7216_v15  ;;  %v3469_v12 = vsub.s32 3, %v7216_v15 }
 0x1fd   : > { %v5300_v45 = vpop.f32.mrb[20].mxu1 }
 0x1fe   : > { %v800_v40 = vpop.f32.mrb[21].mxu1 }
 0x1ff   : > { %842 = vxpose.xlu0.b32.cont [14/16] (narrow) %v7097_v50, 8  ;;  %v9571_v50 = vmov 0  }
 0x200   : > { %866 = vxpose.xlu1.b32.cont [6/16] (narrow) %v5291_v9, 8 }
 0x201   : > { %v5303_v52 = vpop.f32.mrb[22].mxu1 }
 0x202   : > { %v810_v36 = vpop.f32.mrb[23].mxu1 }
 0x203   : > { %843 = vxpose.xlu0.b32.cont [15/16] (narrow) %v7107_v56, 8 }
 0x204   : > { %867 = vxpose.xlu1.b32.cont [7/16] (narrow) %v780_v34, 8 }
 0x205   : > { %v5306_v35 = vpop.f32.mrb[24].mxu1 }
 0x206   : > { %v820_v43 = vpop.f32.mrb[25].mxu1 }
 0x207   : > { %844 = vxpose.xlu0.b32.end [16/16] (narrow) %v7105_v24, 8 }
 0x208   : > { %868 = vxpose.xlu1.b32.cont [8/16] (narrow) %v5294_v19, 8 }
 0x20c   : > { %869 = vxpose.xlu1.b32.cont [9/16] (narrow) %v790_v62, 8 }
 0x210   : > { %870 = vxpose.xlu1.b32.cont [10/16] (narrow) %v5297_v27, 8 }
 0x214   : > { %871 = vxpose.xlu1.b32.cont [11/16] (narrow) %v800_v40, 8 }
 0x218   : > { %872 = vxpose.xlu1.b32.cont [12/16] (narrow) %v5300_v45, 8  ;;  %v1313_v45 = vld [vmem:[%s7237_s10 + $0x8] sm:$0xff] }
 0x21c   : > { %873 = vxpose.xlu1.b32.cont [13/16] (narrow) %v810_v36, 8 }
 0x220   : > { %874 = vxpose.xlu1.b32.cont [14/16] (narrow) %v5303_v52, 8 }
 0x224   : > { %875 = vxpose.xlu1.b32.cont [15/16] (narrow) %v820_v43, 8  ;;  %v7247_v43 = vunpack.c.l.bf16 %v1313_v45 }
 0x228   : > { %876 = vxpose.xlu1.b32.end [16/16] (narrow) %v5306_v35, 8 }
 0x230   : > { %5932 = vset.pattern.permute.xlu0 %v9571_v50 }
 0x246   : > { %5934 = vset.pattern.permute.xlu1 %v9573_v18 }
 0x24b   : > { %v7225_v28 = vpop.trf.xlu0 }
 0x24c   : > { %v7231_v34 = vrot.slane %v7225_v28, %v2772_v13  ;;  %v7315_v8 = vrot.slane %v7225_v28, %v3469_v12 }
 0x24e   : > { %9807 = vst [vmem:[#allocation34_spill] sm:$0xff] %v7315_v8 }
 0x26c   : > { %v7223_v9 = vpop.trf.xlu1 }
 0x26d   : > { %v7228_v19 = vrot.slane %v7223_v9, %v2772_v13 }
 0x2ab   : > { %v5373_v56 = vpop.f32.mrb[26].mxu1 }
 0x2ac   : > { %2711 = vperm.xlu1 %5934, %v5373_v56   ;;  %1367 = vperm.xlu0 %5932, %v5373_v56   ;;  %v1233_v24 = vpop.f32.mrb[27].mxu1 }
 0x2af   : > { %v5376_v46 = vpop.f32.mrb[28].mxu1 }
 0x2b0   : > { %5935 = vset.pattern.permute.xlu1 %v9577_v63  ;;  %5933 = vset.pattern.permute.xlu0 %v9575_v38  ;;  %v1243_v49 = vpop.f32.mrb[29].mxu1 }
 0x2b1   : > { %3408 = vperm.xlu1 %5935, %v5373_v56   ;;  %1982 = vperm.xlu0 %5933, %v5373_v56   ;;  %v7249_v56 = vunpack.c.h.bf16 %v1313_v45 }
 0x2b3   : > { %v5379_v37 = vpop.f32.mrb[30].mxu1 }
 0x2b4   : > { %v1253_v51 = vpop.f32.mrb[31].mxu1 }
 0x2b5   : > { %5936 = vset.pattern.permute.xlu1 %v9571_v50  ;;  %5938 = vset.pattern.permute.xlu0 %v9573_v18 }
 0x2b6   : > { %2707 = vperm.xlu0 %5938, %v1233_v24   ;;  %1362 = vperm.xlu1 %5936, %v1233_v24  }
 0x2b7   : > { %v7132_v53 = vpop.f32.mrb[32].mxu1 }
 0x2b8   : > { %v7134_v11 = vpop.f32.mrb[33].mxu1 }
 0x2ba   : > { %5939 = vset.pattern.permute.xlu0 %v9577_v63  ;;  %5937 = vset.pattern.permute.xlu1 %v9575_v38 }
 0x2bb   : > { %3404 = vperm.xlu0 %5939, %v1233_v24   ;;  %1978 = vperm.xlu1 %5937, %v1233_v24   ;;  %v7138_v47 = vpop.f32.mrb[34].mxu1  ;;  %v1442_v24 = vsub.s32 0, %v7216_v15 }
 0x2bc   : > { %v7140_v17 = vpop.f32.mrb[35].mxu1 }
 0x2bd   : > { %v7269_v23 = vrot.slane %v7225_v28, %v1442_v24 }
 0x2bf   : > { %5942 = vset.pattern.permute.xlu0 %v9573_v18  ;;  %5940 = vset.pattern.permute.xlu1 %v9571_v50  ;;  %v7144_v6 = vpop.f32.mrb[36].mxu1 }
 0x2c0   : > { %2719 = vperm.xlu0 %5942, %v5376_v46   ;;  %1377 = vperm.xlu1 %5940, %v5376_v46   ;;  %v7146_v4 = vpop.f32.mrb[37].mxu1 }
 0x2c3   : > { %v7148_v39 = vpop.f32.mrb[38].mxu1 }
 0x2c4   : > { %5943 = vset.pattern.permute.xlu0 %v9577_v63  ;;  %5941 = vset.pattern.permute.xlu1 %v9575_v38  ;;  %v7152_v5 = vpop.f32.mrb[39].mxu1 }
 0x2c5   : > { %3416 = vperm.xlu0 %5943, %v5376_v46   ;;  %1990 = vperm.xlu1 %5941, %v5376_v46  }
 0x2c7   : > { %v7154_v3 = vpop.f32.mrb[40].mxu1 }
 0x2c8   : > { %v7156_v16 = vpop.f32.mrb[41].mxu1 }
 0x2c9   : > { %5950 = vset.pattern.permute.xlu0 %v9573_v18  ;;  %5944 = vset.pattern.permute.xlu1 %v9571_v50 }
 0x2ca   : > { %1372 = vperm.xlu1 %5944, %v1243_v49   ;;  %2727 = vperm.xlu0 %5950, %v5379_v37  }
 0x2ce   : > { %5945 = vset.pattern.permute.xlu1 %v9575_v38  ;;  %5952 = vset.pattern.permute.xlu0 %v9571_v50 }
 0x2cf   : > { %1986 = vperm.xlu1 %5945, %v1243_v49   ;;  %1382 = vperm.xlu0 %5952, %v1253_v51  }
 0x2d3   : > { %5946 = vset.pattern.permute.xlu1 %v9573_v18  ;;  %1392 = vperm.xlu0 %5952, %v7134_v11  }
 0x2d4   : > { %2715 = vperm.xlu1 %5946, %v1243_v49  }
 0x2d7   : > { %5962 = vset.pattern.permute.xlu0 %v9577_v63 }
 0x2d8   : > { %5947 = vset.pattern.permute.xlu1 %v9577_v63  ;;  %3428 = vperm.xlu0 %5962, %v7134_v11  }
 0x2d9   : > { %3412 = vperm.xlu1 %5947, %v1243_v49  }
 0x2dc   : > { %3440 = vperm.xlu0 %5962, %v7138_v47  }
 0x2dd   : > { %5948 = vset.pattern.permute.xlu1 %v9571_v50 }
 0x2de   : > { %1387 = vperm.xlu1 %5948, %v5379_v37  }
 0x2e0   : > { %5966 = vset.pattern.permute.xlu0 %v9571_v50 }
 0x2e1   : > { %1402 = vperm.xlu0 %5966, %v7140_v17  }
 0x2e2   : > { %5949 = vset.pattern.permute.xlu1 %v9575_v38 }
 0x2e3   : > { %1998 = vperm.xlu1 %5949, %v5379_v37  }
 0x2e5   : > { %5968 = vset.pattern.permute.xlu0 %v9573_v18 }
 0x2e6   : > { %2739 = vperm.xlu0 %5968, %v7140_v17  }
 0x2e7   : > { %5951 = vset.pattern.permute.xlu1 %v9577_v63 }
 0x2e8   : > { %3424 = vperm.xlu1 %5951, %v5379_v37  }
 0x2ea   : > { %2751 = vperm.xlu0 %5968, %v7144_v6  }
 0x2ec   : > { %5953 = vset.pattern.permute.xlu1 %v9575_v38 }
 0x2ed   : > { %1994 = vperm.xlu1 %5953, %v1253_v51  }
 0x2ee   : > { %5973 = vset.pattern.permute.xlu0 %v9571_v50 }
 0x2ef   : > { %1412 = vperm.xlu0 %5973, %v7146_v4  }
 0x2f1   : > { %5954 = vset.pattern.permute.xlu1 %v9573_v18 }
 0x2f2   : > { %2723 = vperm.xlu1 %5954, %v1253_v51  }
 0x2f3   : > { %5974 = vset.pattern.permute.xlu0 %v9575_v38 }
 0x2f4   : > { %2018 = vperm.xlu0 %5974, %v7146_v4  }
 0x2f6   : > { %5955 = vset.pattern.permute.xlu1 %v9577_v63 }
 0x2f7   : > { %3420 = vperm.xlu1 %5955, %v1253_v51  }
 0x2f8   : > { %5981 = vset.pattern.permute.xlu0 %v9571_v50 }
 0x2f9   : > { %1422 = vperm.xlu0 %5981, %v7152_v5  }
 0x2fb   : > { %5956 = vset.pattern.permute.xlu1 %v9571_v50 }
 0x2fc   : > { %1397 = vperm.xlu1 %5956, %v7132_v53  }
 0x2fd   : > { %5982 = vset.pattern.permute.xlu0 %v9575_v38 }
 0x2fe   : > { %2026 = vperm.xlu0 %5982, %v7152_v5  }
 0x300   : > { %5957 = vset.pattern.permute.xlu1 %v9575_v38 }
 0x301   : > { %2006 = vperm.xlu1 %5957, %v7132_v53  }
 0x302   : > { %5984 = vset.pattern.permute.xlu0 %v9577_v63 }
 0x303   : > { %3452 = vperm.xlu0 %5984, %v7152_v5  }
 0x305   : > { %5958 = vset.pattern.permute.xlu1 %v9573_v18 }
 0x306   : > { %2735 = vperm.xlu1 %5958, %v7132_v53  }
 0x307   : > { %3464 = vperm.xlu0 %5984, %v7154_v3  }
 0x30a   : > { %5959 = vset.pattern.permute.xlu1 %v9577_v63 }
 0x30b   : > { %3432 = vperm.xlu1 %5959, %v7132_v53   ;;  %5988 = vset.pattern.permute.xlu0 %v9571_v50 }
 0x30c   : > { %1432 = vperm.xlu0 %5988, %v7156_v16  }
 0x30f   : > { %5960 = vset.pattern.permute.xlu1 %v9575_v38 }
 0x310   : > { %2002 = vperm.xlu1 %5960, %v7134_v11   ;;  %5989 = vset.pattern.permute.xlu0 %v9575_v38 }
 0x311   : > { %2034 = vperm.xlu0 %5989, %v7156_v16  }
 0x314   : > { %5961 = vset.pattern.permute.xlu1 %v9573_v18 }
 0x315   : > { %2731 = vperm.xlu1 %5961, %v7134_v11   ;;  %5990 = vset.pattern.permute.xlu0 %v9573_v18 }
 0x316   : > { %2763 = vperm.xlu0 %5990, %v7156_v16  }
 0x319   : > { %5963 = vset.pattern.permute.xlu1 %v9571_v50 }
 0x31a   : > { %1407 = vperm.xlu1 %5963, %v7138_v47   ;;  %6007 = vset.pattern.permute.xlu0 %v9577_v63 }
 0x31e   : > { %5964 = vset.pattern.permute.xlu1 %v9575_v38 }
 0x31f   : > { %2014 = vperm.xlu1 %5964, %v7138_v47  }
 0x323   : > { %5965 = vset.pattern.permute.xlu1 %v9573_v18 }
 0x324   : > { %2743 = vperm.xlu1 %5965, %v7138_v47   ;;  %v2043_v47 = vsub.s32 1, %v7216_v15 }
 0x328   : > { %5967 = vset.pattern.permute.xlu1 %v9575_v38 }
 0x329   : > { %2010 = vperm.xlu1 %5967, %v7140_v17  }
 0x32b   : > { %v2712_v27 = vpop.permute.xlu1 %2711  ;;  %v7240_v62 = vpop.permute.xlu0 %1367 }
 0x32c   : > { %v2780_v40 = vadd.f32 %v7231_v34, %v2712_v27  ;;  %v2781_v52 = vadd.f32 %v7228_v19, %v2712_v27 }
 0x32d   : > { %5969 = vset.pattern.permute.xlu1 %v9577_v63 }
 0x32e   : > { %v2844_v36 = vmul.f32 0.2, %v2780_v40  ;;  %v2845_v35 = vmul.f32 0.2, %v2781_v52  ;;  %3436 = vperm.xlu1 %5969, %v7140_v17   ;;  %vm2812_vm1 = vcmp.ge.f32.partialorder %v2780_v40, 0.0  ;;  %vm2813_vm2 = vcmp.ge.f32.partialorder %v2781_v52, 0.0 }
 0x32f   : > { %v7266_v17 = vrot.slane %v7223_v9, %v1442_v24 }
 0x330   : > { %v7252_v46 = vpop.permute.xlu1 %3408  ;;  %v7254_v49 = vpop.permute.xlu0 %1982  ;;  %v2876_v37 = vsel %vm2812_vm1, %v2780_v40, %v2844_v36  ;;  %v2877_v51 = vsel %vm2813_vm2, %v2781_v52, %v2845_v35  ;;  %v1312_v36 = vld [vmem:[%s7237_s10] sm:$0xff]  ;;  %v7278_v35 = vrot.slane %v7223_v9, %v2043_v47 }
 0x331   : > { %v7258_v53 = vadd.f32 %v2876_v37, %v7247_v43  ;;  %v7261_v11 = vadd.f32 %v2877_v51, %v7249_v56  ;;  %v7281_v37 = vrot.slane %v7225_v28, %v2043_v47  ;;  %v7290_v63 = vunpack.c.h.bf16 %v1312_v36 }
 0x332   : > { %5970 = vset.pattern.permute.xlu1 %v9571_v50 }
 0x333   : > { %9802 = vst [vmem:[#allocation31_spill] sm:$0xff] %v7258_v53  ;;  %9803 = vst [vmem:[#allocation32_spill] sm:$0xff] %v7261_v11  ;;  %1417 = vperm.xlu1 %5970, %v7144_v6   ;;  %v2941_v45 = vmax.f32 %v7258_v53, %v7261_v11 }
 0x335   : > { %v2708_v13 = vpop.permute.xlu0 %2707  ;;  %v1363_v27 = vpop.permute.xlu1 %1362  ;;  %2942 = vmax.xlane.f32.xlu0 %v2941_v45 }
 0x336   : > { %v1448_v40 = vadd.f32 %v7269_v23, %v1363_v27  ;;  %v1449_v52 = vadd.f32 %v7266_v17, %v1363_v27  ;;  %v2778_v24 = vadd.f32 %v7231_v34, %v2708_v13  ;;  %v2779_v51 = vadd.f32 %v7228_v19, %v2708_v13 }
 0x337   : > { %5971 = vset.pattern.permute.xlu1 %v9575_v38  ;;  %v7288_v38 = vunpack.c.l.bf16 %v1312_v36 }
 0x338   : > { %2022 = vperm.xlu1 %5971, %v7144_v6   ;;  %v1512_v50 = vmul.f32 0.2, %v1448_v40  ;;  %v1513_v18 = vmul.f32 0.2, %v1449_v52  ;;  %vm1480_vm3 = vcmp.ge.f32.partialorder %v1448_v40, 0.0  ;;  %vm1481_vm4 = vcmp.ge.f32.partialorder %v1449_v52, 0.0 }
 0x339   : > { %v2842_v53 = vmul.f32 0.2, %v2778_v24  ;;  %vm2810_vm5 = vcmp.ge.f32.partialorder %v2778_v24, 0.0  ;;  %v2843_v48 = vmul.f32 0.2, %v2779_v51  ;;  %vm2811_vm6 = vcmp.ge.f32.partialorder %v2779_v51, 0.0 }
 0x33a   : > { %v7286_v27 = vpop.permute.xlu0 %3404  ;;  %v1979_v45 = vpop.permute.xlu1 %1978  ;;  %v1544_v13 = vsel %vm1480_vm3, %v1448_v40, %v1512_v50  ;;  %v1545_v59 = vsel %vm1481_vm4, %v1449_v52, %v1513_v18  ;;  %v9805_v40 = vmov 2  }
 0x33b   : > { %v2049_v47 = vadd.f32 %v7281_v37, %v1979_v45  ;;  %v2050_v11 = vadd.f32 %v7278_v35, %v1979_v45  ;;  %v7298_v36 = vadd.f32 %v1544_v13, %v7288_v38  ;;  %v7301_v10 = vadd.f32 %v1545_v59, %v7290_v63 }
 0x33c   : > { %5972 = vset.pattern.permute.xlu1 %v9804_v41  ;;  %v7311_v13 = vrot.slane %v7223_v9, %v3469_v12  ;;  %v2875_v42 = vsel %vm2811_vm6, %v2779_v51, %v2843_v48 }
 0x33d   : > { %3448 = vperm.xlu1 %5972, %v7144_v6   ;;  %v2113_v22 = vmul.f32 0.2, %v2049_v47  ;;  %v2114_v21 = vmul.f32 0.2, %v2050_v11  ;;  %vm2081_vm7 = vcmp.ge.f32.partialorder %v2049_v47, 0.0  ;;  %vm2082_vm8 = vcmp.ge.f32.partialorder %v2050_v11, 0.0 }
 0x33e   : > { %v2874_v6 = vsel %vm2810_vm5, %v2778_v24, %v2842_v53  ;;  %v1608_v15 = vmax.f32 %v7298_v36, %v7301_v10  ;;  %9806 = vst [vmem:[#allocation33_spill] sm:$0xff] %v7311_v13  ;;  %v1315_v53 = vld [vmem:[%s7237_s10 + $0x18] sm:$0xff]  ;;  %v7331_v24 = vadd.f32 %v2875_v42, %v7290_v63 }
 0x33f   : > { %v7303_v45 = vpop.permute.xlu0 %2719  ;;  %v1378_v57 = vpop.permute.xlu1 %1377  ;;  %v2145_v52 = vsel %vm2081_vm7, %v2049_v47, %v2113_v22  ;;  %v2146_v59 = vsel %vm2082_vm8, %v2050_v11, %v2114_v21 }
 0x340   : > { %v1454_v50 = vadd.f32 %v7269_v23, %v1378_v57  ;;  %v1455_v18 = vadd.f32 %v7266_v17, %v1378_v57  ;;  %1609 = vmax.xlane.f32.xlu0 %v1608_v15  ;;  %v7318_v57 = vadd.f32 %v2874_v6, %v7288_v38  ;;  %v7322_v9 = vadd.f32 %v2145_v52, %v7288_v38 }
 0x341   : > { %5975 = vset.pattern.permute.xlu1 %v9805_v40  ;;  %v7325_v11 = vadd.f32 %v2146_v59, %v7290_v63  ;;  %9811 = vst [vmem:[#allocation38_spill] sm:$0xff] %v7331_v24  ;;  %v7337_v6 = vunpack.c.l.bf16 %v1315_v53  ;;  %v7339_v15 = vunpack.c.h.bf16 %v1315_v53 }
 0x342   : > { %2747 = vperm.xlu1 %5975, %v7146_v4   ;;  %v1518_v33 = vmul.f32 0.2, %v1454_v50  ;;  %v1519_v30 = vmul.f32 0.2, %v1455_v18  ;;  %9808 = vst [vmem:[#allocation35_spill] sm:$0xff] %v7318_v57  ;;  %vm1486_vm9 = vcmp.ge.f32.partialorder %v1454_v50, 0.0  ;;  %v2938_v44 = vmax.f32 %v7318_v57, %v7331_v24 }
 0x343   : > { %vm1487_vm10 = vcmp.ge.f32.partialorder %v1455_v18, 0.0  ;;  %9809 = vst [vmem:[#allocation36_spill] sm:$0xff] %v7322_v9  ;;  %9810 = vst [vmem:[#allocation37_spill] sm:$0xff] %v7325_v11  ;;  %v2209_v47 = vmax.f32 %v7322_v9, %v7325_v11 }
 0x344   : > { %v3417_v22 = vpop.permute.xlu0 %3416  ;;  %v1991_v21 = vpop.permute.xlu1 %1990  ;;  %v1550_v52 = vsel %vm1486_vm9, %v1454_v50, %v1518_v33  ;;  %v1551_v59 = vsel %vm1487_vm10, %v1455_v18, %v1519_v30  ;;  %v9814_v18 = vmov 0  }
 0x345   : > { %v3481_v12 = vadd.f32 %v7315_v8, %v3417_v22  ;;  %v2055_v48 = vadd.f32 %v7281_v37, %v1991_v21  ;;  %v2056_v28 = vadd.f32 %v7278_v35, %v1991_v21  ;;  %v3482_v51 = vadd.f32 %v7311_v13, %v3417_v22  ;;  %2210 = vmax.xlane.f32.xlu0 %v2209_v47 }
 0x346   : > { %5976 = vset.pattern.permute.xlu1 %v9804_v41  ;;  %v7350_v33 = vadd.f32 %v1551_v59, %v7339_v15 }
 0x347   : > { %3444 = vperm.xlu1 %5976, %v7146_v4   ;;  %vm2087_vm11 = vcmp.ge.f32.partialorder %v2055_v48, 0.0  ;;  %vm2088_vm12 = vcmp.ge.f32.partialorder %v2056_v28, 0.0  ;;  %v2119_v42 = vmul.f32 0.2, %v2055_v48  ;;  %v2120_v21 = vmul.f32 0.2, %v2056_v28 }
 0x348   : > { %vm3513_vm13 = vcmp.ge.f32.partialorder %v3481_v12, 0.0  ;;  %v3545_v22 = vmul.f32 0.2, %v3481_v12  ;;  %vm3514_vm14 = vcmp.ge.f32.partialorder %v3482_v51, 0.0  ;;  %v3546_v53 = vmul.f32 0.2, %v3482_v51 }
 0x349   : > { %v1373_v31 = vpop.permute.xlu1 %1372  ;;  %v7347_v4 = vadd.f32 %v1550_v52, %v7337_v6  ;;  %9813 = vst [vmem:[#allocation40_spill] sm:$0xff] %v7350_v33  ;;  %v2151_v47 = vsel %vm2087_vm11, %v2055_v48, %v2119_v42  ;;  %v2152_v24 = vsel %vm2088_vm12, %v2056_v28, %v2120_v21  ;;  %2939 = vmax.xlane.f32.xlu0 %v2938_v44  ;;  %v7372_v21 = vunpack.c.l.bf16 %v1314_v29 }
 0x34a   : > { %v1452_v30 = vadd.f32 %v7269_v23, %v1373_v31  ;;  %v1453_v50 = vadd.f32 %v7266_v17, %v1373_v31  ;;  %v3577_v57 = vsel %vm3513_vm13, %v3481_v12, %v3545_v22  ;;  %v7361_v59 = vadd.f32 %v2151_v47, %v7337_v6 }
 0x34b   : > { %9812 = vst [vmem:[#allocation39_spill] sm:$0xff] %v7347_v4  ;;  %5977 = vset.pattern.permute.xlu1 %v9814_v18  ;;  %v1617_v52 = vmax.f32 %v7347_v4, %v7350_v33  ;;  %v7364_v20 = vadd.f32 %v2152_v24, %v7339_v15  ;;  %v3578_v31 = vsel %vm3514_vm14, %v3482_v51, %v3546_v53  ;;  %v9817_v12 = vmov 1  }
 0x34c   : > { %1427 = vperm.xlu1 %5977, %v7148_v39   ;;  %9815 = vst [vmem:[#allocation41_spill] sm:$0xff] %v7361_v59  ;;  %v1516_v48 = vmul.f32 0.2, %v1452_v30  ;;  %v1517_v42 = vmul.f32 0.2, %v1453_v50  ;;  %vm1484_vm15 = vcmp.ge.f32.partialorder %v1452_v30, 0.0  ;;  %v7377_v51 = vadd.f32 %v3577_v57, %v7337_v6 }
 0x34d   : > { %9816 = vst [vmem:[#allocation42_spill] sm:$0xff] %v7364_v20  ;;  %vm1485_vm1 = vcmp.ge.f32.partialorder %v1453_v50, 0.0  ;;  %1618 = vmax.xlane.f32.xlu0 %v1617_v52  ;;  %v2218_v24 = vmax.f32 %v7361_v59, %v7364_v20  ;;  %v7380_v22 = vadd.f32 %v3578_v31, %v7339_v15  ;;  %v7382_v53 = vunpack.c.h.bf16 %v1314_v29 }
 0x34e   : > { %v1987_v32 = vpop.permute.xlu1 %1986  ;;  %9818 = vst [vmem:[#allocation43_spill] sm:$0xff] %v7377_v51  ;;  %v1548_v4 = vsel %vm1484_vm15, %v1452_v30, %v1516_v48  ;;  %v1549_v33 = vsel %vm1485_vm1, %v1453_v50, %v1517_v42 }
 0x34f   : > { %v2053_v44 = vadd.f32 %v7281_v37, %v1987_v32  ;;  %v2054_v28 = vadd.f32 %v7278_v35, %v1987_v32  ;;  %9819 = vst [vmem:[#allocation44_spill] sm:$0xff] %v7380_v22  ;;  %v3644_v57 = vmax.f32 %v7377_v51, %v7380_v22  ;;  %v7391_v31 = vadd.f32 %v1548_v4, %v7372_v21 }
 0x350   : > { %5978 = vset.pattern.permute.xlu1 %v9817_v12  ;;  %v7394_v29 = vadd.f32 %v1549_v33, %v7382_v53 }
 0x351   : > { %2030 = vperm.xlu1 %5978, %v7148_v39   ;;  %v2117_v32 = vmul.f32 0.2, %v2053_v44  ;;  %v2118_v47 = vmul.f32 0.2, %v2054_v28  ;;  %vm2085_vm2 = vcmp.ge.f32.partialorder %v2053_v44, 0.0  ;;  %vm2086_vm3 = vcmp.ge.f32.partialorder %v2054_v28, 0.0  ;;  %2219 = vmax.xlane.f32.xlu0 %v2218_v24 }
 0x352   : > { %9820 = vst [vmem:[#allocation45_spill] sm:$0xff] %v7391_v31  ;;  %9821 = vst [vmem:[#allocation46_spill] sm:$0xff] %v7394_v29  ;;  %v1614_v42 = vmax.f32 %v7391_v31, %v7394_v29 }
 0x353   : > { %v7384_v52 = vpop.permute.xlu1 %2715  ;;  %v2149_v59 = vsel %vm2085_vm2, %v2053_v44, %v2117_v32  ;;  %v2150_v20 = vsel %vm2086_vm3, %v2054_v28, %v2118_v47 }
 0x354   : > { %v7402_v24 = vadd.f32 %v2149_v59, %v7372_v21  ;;  %v7405_v4 = vadd.f32 %v2150_v20, %v7382_v53 }
 0x355   : > { %5979 = vset.pattern.permute.xlu1 %v9805_v40  ;;  %3645 = vmax.xlane.f32.xlu0 %v3644_v57 }
 0x356   : > { %2759 = vperm.xlu1 %5979, %v7148_v39   ;;  %9822 = vst [vmem:[#allocation47_spill] sm:$0xff] %v7402_v24  ;;  %9823 = vst [vmem:[#allocation48_spill] sm:$0xff] %v7405_v4  ;;  %v2215_v57 = vmax.f32 %v7402_v24, %v7405_v4  ;;  %v7437_v24 = vpop.permute.xlu0 %2727 }
 0x358   : > { %v3413_v30 = vpop.permute.xlu1 %3412 }
 0x359   : > { %v3479_v50 = vadd.f32 %v7315_v8, %v3413_v30  ;;  %v3480_v48 = vadd.f32 %v7311_v13, %v3413_v30  ;;  %1615 = vmax.xlane.f32.xlu0 %v1614_v42 }
 0x35a   : > { %5980 = vset.pattern.permute.xlu1 %v9804_v41 }
 0x35b   : > { %vm3511_vm4 = vcmp.ge.f32.partialorder %v3479_v50, 0.0  ;;  %vm3512_vm5 = vcmp.ge.f32.partialorder %v3480_v48, 0.0  ;;  %v3543_v33 = vmul.f32 0.2, %v3479_v50  ;;  %v3544_v44 = vmul.f32 0.2, %v3480_v48  ;;  %3456 = vperm.xlu1 %5980, %v7148_v39  }
 0x35c   : > { %v1317_v39 = vld [vmem:[%s7237_s10 + $0x28] sm:$0xff] }
 0x35d   : > { %v1388_v28 = vpop.permute.xlu1 %1387  ;;  %v3575_v32 = vsel %vm3511_vm4, %v3479_v50, %v3543_v33  ;;  %v3576_v47 = vsel %vm3512_vm5, %v3480_v48, %v3544_v44  ;;  %2216 = vmax.xlane.f32.xlu0 %v2215_v57 }
 0x35e   : > { %v1458_v59 = vadd.f32 %v7269_v23, %v1388_v28  ;;  %v1459_v30 = vadd.f32 %v7266_v17, %v1388_v28  ;;  %v7414_v20 = vadd.f32 %v3575_v32, %v7372_v21  ;;  %v7417_v22 = vadd.f32 %v3576_v47, %v7382_v53 }
 0x35f   : > { %5983 = vset.pattern.permute.xlu1 %v9805_v40  ;;  %v7426_v32 = vunpack.c.l.bf16 %v1317_v39  ;;  %v7428_v47 = vunpack.c.h.bf16 %v1317_v39 }
 0x360   : > { %9824 = vst [vmem:[#allocation49_spill] sm:$0xff] %v7414_v20  ;;  %9825 = vst [vmem:[#allocation50_spill] sm:$0xff] %v7417_v22  ;;  %2755 = vperm.xlu1 %5983, %v7152_v5   ;;  %vm1490_vm6 = vcmp.ge.f32.partialorder %v1458_v59, 0.0  ;;  %vm1491_vm7 = vcmp.ge.f32.partialorder %v1459_v30, 0.0  ;;  %v1522_v50 = vmul.f32 0.2, %v1458_v59  ;;  %v3641_v33 = vmax.f32 %v7414_v20, %v7417_v22  ;;  %v7447_v22 = vpop.permute.xlu0 %1382 }
 0x361   : > { %v1523_v48 = vmul.f32 0.2, %v1459_v30 }
 0x362   : > { %v7421_v42 = vpop.permute.xlu1 %1998  ;;  %v1554_v44 = vsel %vm1490_vm6, %v1458_v59, %v1522_v50  ;;  %3642 = vmax.xlane.f32.xlu0 %v3641_v33 }
 0x363   : > { %v1555_v28 = vsel %vm1491_vm7, %v1459_v30, %v1523_v48  ;;  %v7432_v5 = vadd.f32 %v1554_v44, %v7426_v32 }
 0x364   : > { %5985 = vset.pattern.permute.xlu1 %v9814_v18  ;;  %v7435_v57 = vadd.f32 %v1555_v28, %v7428_v47 }
 0x365   : > { %1437 = vperm.xlu1 %5985, %v7154_v3   ;;  %9826 = vst [vmem:[#allocation51_spill] sm:$0xff] %v7432_v5 }
 0x366   : > { %9827 = vst [vmem:[#allocation52_spill] sm:$0xff] %v7435_v57  ;;  %v1623_v18 = vmax.f32 %v7432_v5, %v7435_v57  ;;  %v1316_v5 = vld [vmem:[%s7237_s10 + $0x20] sm:$0xff] }
 0x367   : > { %v3425_v51 = vpop.permute.xlu1 %3424 }
 0x368   : > { %v3485_v59 = vadd.f32 %v7315_v8, %v3425_v51  ;;  %v3486_v30 = vadd.f32 %v7311_v13, %v3425_v51  ;;  %1624 = vmax.xlane.f32.xlu0 %v1623_v18 }
 0x369   : > { %5986 = vset.pattern.permute.xlu1 %v9817_v12 }
 0x36a   : > { %2038 = vperm.xlu1 %5986, %v7154_v3   ;;  %vm3517_vm8 = vcmp.ge.f32.partialorder %v3485_v59, 0.0  ;;  %vm3518_vm9 = vcmp.ge.f32.partialorder %v3486_v30, 0.0  ;;  %v3549_v39 = vmul.f32 0.2, %v3485_v59  ;;  %v3550_v50 = vmul.f32 0.2, %v3486_v30 }
 0x36c   : > { %v1995_v48 = vpop.permute.xlu1 %1994  ;;  %v3581_v28 = vsel %vm3517_vm8, %v3485_v59, %v3549_v39  ;;  %v3582_v51 = vsel %vm3518_vm9, %v3486_v30, %v3550_v50  ;;  %v7462_v39 = vunpack.c.l.bf16 %v1316_v5 }
 0x36d   : > { %v2057_v33 = vadd.f32 %v7281_v37, %v1995_v48  ;;  %v2058_v44 = vadd.f32 %v7278_v35, %v1995_v48  ;;  %v7451_v12 = vadd.f32 %v3581_v28, %v7426_v32  ;;  %v7454_v57 = vadd.f32 %v3582_v51, %v7428_v47 }
 0x36e   : > { %5987 = vset.pattern.permute.xlu1 %v9805_v40  ;;  %v7464_v40 = vunpack.c.h.bf16 %v1316_v5 }
 0x36f   : > { %9828 = vst [vmem:[#allocation53_spill] sm:$0xff] %v7451_v12  ;;  %9829 = vst [vmem:[#allocation54_spill] sm:$0xff] %v7454_v57  ;;  %vm2089_vm10 = vcmp.ge.f32.partialorder %v2057_v33, 0.0  ;;  %vm2090_vm11 = vcmp.ge.f32.partialorder %v2058_v44, 0.0  ;;  %v2121_v18 = vmul.f32 0.2, %v2057_v33  ;;  %2767 = vperm.xlu1 %5987, %v7154_v3   ;;  %v3650_v59 = vmax.f32 %v7451_v12, %v7454_v57  ;;  %v7473_v3 = vpop.permute.xlu0 %1392 }
 0x370   : > { %v2122_v20 = vmul.f32 0.2, %v2058_v44  ;;  %v1319_v57 = vld [vmem:[%s7237_s10 + $0x38] sm:$0xff] }
 0x371   : > { %v7460_v30 = vpop.permute.xlu1 %2723  ;;  %v2153_v50 = vsel %vm2089_vm10, %v2057_v33, %v2121_v18  ;;  %3651 = vmax.xlane.f32.xlu0 %v3650_v59  ;;  %v7491_v31 = vunpack.c.l.bf16 %v1319_v57 }
 0x372   : > { %v2154_v48 = vsel %vm2090_vm11, %v2058_v44, %v2122_v20  ;;  %v7468_v28 = vadd.f32 %v2153_v50, %v7462_v39 }
 0x373   : > { %5991 = vset.pattern.permute.xlu1 %v9804_v41  ;;  %v7471_v51 = vadd.f32 %v2154_v48, %v7464_v40  ;;  %v7480_v18 = vpop.permute.xlu0 %3428 }
 0x374   : > { %9830 = vst [vmem:[#allocation55_spill] sm:$0xff] %v7468_v28  ;;  %3460 = vperm.xlu1 %5991, %v7156_v16   ;;  %9832 = vst [vmem:[#allocation57_spill] sm:$0xff] %v7480_v18  ;;  %v1451_v18 = vadd.f32 %v7266_v17, %v7240_v62 }
 0x375   : > { %9831 = vst [vmem:[#allocation56_spill] sm:$0xff] %v7471_v51  ;;  %v2221_v20 = vmax.f32 %v7468_v28, %v7471_v51 }
 0x376   : > { %v3421_v12 = vpop.permute.xlu1 %3420  ;;  %vm1483_vm2 = vcmp.ge.f32.partialorder %v1451_v18, 0.0 }
 0x377   : > { %v3483_v5 = vadd.f32 %v7315_v8, %v3421_v12  ;;  %v3484_v33 = vadd.f32 %v7311_v13, %v3421_v12  ;;  %2222 = vmax.xlane.f32.xlu0 %v2221_v20  ;;  %v7493_v28 = vpop.permute.xlu0 %3440 }
 0x378   : > { %9835 = vst [vmem:[#allocation60_spill] sm:$0xff] %v7493_v28 }
 0x379   : > { %vm3515_vm12 = vcmp.ge.f32.partialorder %v3483_v5, 0.0  ;;  %vm3516_vm13 = vcmp.ge.f32.partialorder %v3484_v33, 0.0  ;;  %v3547_v41 = vmul.f32 0.2, %v3483_v5  ;;  %v3548_v44 = vmul.f32 0.2, %v3484_v33 }
 0x37b   : > { %v1398_v59 = vpop.permute.xlu1 %1397  ;;  %v3579_v50 = vsel %vm3515_vm12, %v3483_v5, %v3547_v41  ;;  %v3580_v48 = vsel %vm3516_vm13, %v3484_v33, %v3548_v44  ;;  %v7497_v33 = vunpack.c.h.bf16 %v1319_v57  ;;  %v2051_v57 = vadd.f32 %v7281_v37, %v7254_v49 }
 0x37c   : > { %v1462_v16 = vadd.f32 %v7269_v23, %v1398_v59  ;;  %v1463_v4 = vadd.f32 %v7266_v17, %v1398_v59  ;;  %v7486_v12 = vadd.f32 %v3579_v50, %v7462_v39  ;;  %v7489_v29 = vadd.f32 %v3580_v48, %v7464_v40 }
 0x37d   : > { %v1450_v48 = vadd.f32 %v7269_v23, %v7240_v62  ;;  %v3477_v62 = vadd.f32 %v7315_v8, %v7252_v46  ;;  %vm2083_vm3 = vcmp.ge.f32.partialorder %v2051_v57, 0.0 }
 0x37e   : > { %9833 = vst [vmem:[#allocation58_spill] sm:$0xff] %v7486_v12  ;;  %9834 = vst [vmem:[#allocation59_spill] sm:$0xff] %v7489_v29  ;;  %vm1494_vm14 = vcmp.ge.f32.partialorder %v1462_v16, 0.0  ;;  %vm1495_vm15 = vcmp.ge.f32.partialorder %v1463_v4, 0.0  ;;  %v1526_v20 = vmul.f32 0.2, %v1462_v16  ;;  %v3647_v41 = vmax.f32 %v7486_v12, %v7489_v29 }
 0x37f   : > { %v1527_v51 = vmul.f32 0.2, %v1463_v4  ;;  %vm1482_vm1 = vcmp.ge.f32.partialorder %v1450_v48, 0.0  ;;  %v3541_v29 = vmul.f32 0.2, %v3477_v62  ;;  %vm3509_vm5 = vcmp.ge.f32.partialorder %v3477_v62, 0.0 }
 0x380   : > { %v7495_v5 = vpop.permute.xlu1 %2006  ;;  %v1558_v44 = vsel %vm1494_vm14, %v1462_v16, %v1526_v20  ;;  %3648 = vmax.xlane.f32.xlu0 %v3647_v41  ;;  %v1514_v20 = vmul.f32 0.2, %v1450_v48  ;;  %v1515_v41 = vmul.f32 0.2, %v1451_v18 }
 0x381   : > { %v1559_v59 = vsel %vm1495_vm15, %v1463_v4, %v1527_v51  ;;  %v7502_v50 = vadd.f32 %v1558_v44, %v7491_v31  ;;  %v2052_v4 = vadd.f32 %v7278_v35, %v7254_v49  ;;  %v7517_v51 = vpop.permute.xlu0 %1402  ;;  %v3478_v44 = vadd.f32 %v7311_v13, %v7252_v46 }
 0x382   : > { %v7509_v28 = vadd.f32 %v1559_v59, %v7497_v33  ;;  %v2115_v59 = vmul.f32 0.2, %v2051_v57 }
 0x383   : > { %9836 = vst [vmem:[#allocation61_spill] sm:$0xff] %v7502_v50  ;;  %v2116_v49 = vmul.f32 0.2, %v2052_v4  ;;  %vm2084_vm4 = vcmp.ge.f32.partialorder %v2052_v4, 0.0  ;;  %v3542_v25 = vmul.f32 0.2, %v3478_v44 }
 0x384   : > { %9837 = vst [vmem:[#allocation62_spill] sm:$0xff] %v7509_v28  ;;  %v1629_v16 = vmax.f32 %v7502_v50, %v7509_v28  ;;  %v1546_v50 = vsel %vm1482_vm1, %v1450_v48, %v1514_v20  ;;  %v2147_v2 = vsel %vm2083_vm3, %v2051_v57, %v2115_v59  ;;  %vm3510_vm6 = vcmp.ge.f32.partialorder %v3478_v44, 0.0 }
 0x385   : > { %v7513_v14 = vpop.permute.xlu1 %2735  ;;  %v7527_v28 = vpop.permute.xlu0 %2739  ;;  %v2148_v7 = vsel %vm2084_vm4, %v2052_v4, %v2116_v49  ;;  %v7543_v20 = vadd.f32 %v2147_v2, %v7247_v43  ;;  %v3573_v57 = vsel %vm3509_vm5, %v3477_v62, %v3541_v29  ;;  %v1321_v4 = vld [vmem:[%s7237_s10 + $0x48] sm:$0xff]  ;;  %v2784_v2 = vadd.f32 %v7231_v34, %v7303_v45 }
 0x386   : > { %9838 = vst [vmem:[#allocation63_spill] sm:$0xff] %v7513_v14  ;;  %1630 = vmax.xlane.f32.xlu0 %v1629_v16  ;;  %9840 = vst [vmem:[#allocation65_spill] sm:$0xff] %v7527_v28  ;;  %v1547_v14 = vsel %vm1483_vm2, %v1451_v18, %v1515_v41  ;;  %v7531_v16 = vadd.f32 %v1546_v50, %v7247_v43  ;;  %v3475_v50 = vadd.f32 %v7315_v8, %v7286_v27 }
 0x387   : > { %v7534_v1 = vadd.f32 %v1547_v14, %v7249_v56  ;;  %9843 = vst [vmem:[#allocation68_spill] sm:$0xff] %v7543_v20  ;;  %v3476_v14 = vadd.f32 %v7311_v13, %v7286_v27  ;;  %v7551_v41 = vadd.f32 %v2148_v7, %v7249_v56  ;;  %v2785_v29 = vadd.f32 %v7228_v19, %v7303_v45 }
 0x388   : > { %9841 = vst [vmem:[#allocation66_spill] sm:$0xff] %v7531_v16  ;;  %v7559_v62 = vunpack.c.l.bf16 %v1321_v4  ;;  %v7561_v28 = vunpack.c.h.bf16 %v1321_v4  ;;  %v3539_v13 = vmul.f32 0.2, %v3475_v50  ;;  %vm3507_vm9 = vcmp.ge.f32.partialorder %v3475_v50, 0.0 }
 0x389   : > { %9842 = vst [vmem:[#allocation67_spill] sm:$0xff] %v7534_v1  ;;  %9844 = vst [vmem:[#allocation69_spill] sm:$0xff] %v7551_v41  ;;  %v7553_v59 = vpop.permute.xlu0 %2751  ;;  %v3540_v8 = vmul.f32 0.2, %v3476_v14  ;;  %vm3508_vm10 = vcmp.ge.f32.partialorder %v3476_v14, 0.0  ;;  %vm2816_vm11 = vcmp.ge.f32.partialorder %v2784_v2, 0.0 }
 0x38a   : > { %v7525_v12 = vpop.permute.xlu1 %3432  ;;  %9845 = vst [vmem:[#allocation70_spill] sm:$0xff] %v7553_v59  ;;  %vm2817_vm12 = vcmp.ge.f32.partialorder %v2785_v29, 0.0  ;;  %v2849_v4 = vmul.f32 0.2, %v2785_v29 }
 0x38b   : > { %9839 = vst [vmem:[#allocation64_spill] sm:$0xff] %v7525_v12  ;;  %v7536_v12 = vunpack.c.l.bf16 %v1318_v26  ;;  %v3574_v26 = vsel %vm3510_vm6, %v3478_v44, %v3542_v25  ;;  %v7566_v44 = vadd.f32 %v3573_v57, %v7247_v43  ;;  %v2212_v43 = vmax.f32 %v7543_v20, %v7551_v41 }
 0x38c   : > { %v7569_v59 = vadd.f32 %v3574_v26, %v7249_v56  ;;  %v2782_v56 = vadd.f32 %v7231_v34, %v7384_v52  ;;  %v2848_v57 = vmul.f32 0.2, %v2784_v2  ;;  %v7587_v26 = vadd.f32 %v7231_v34, %v7437_v24 }
 0x38d   : > { %9846 = vst [vmem:[#allocation71_spill] sm:$0xff] %v7566_v44  ;;  %v3571_v41 = vsel %vm3507_vm9, %v3475_v50, %v3539_v13  ;;  %v3572_v20 = vsel %vm3508_vm10, %v3476_v14, %v3540_v8 }
 0x38e   : > { %9847 = vst [vmem:[#allocation72_spill] sm:$0xff] %v7569_v59  ;;  %vm2814_vm13 = vcmp.ge.f32.partialorder %v2782_v56, 0.0  ;;  %v7608_v8 = vadd.f32 %v3571_v41, %v7288_v38  ;;  %v7611_v14 = vadd.f32 %v3572_v20, %v7290_v63  ;;  %v2852_v20 = vmul.f32 0.2, %v7587_v26 }
 0x38f   : > { %v2003_v46 = vpop.permute.xlu1 %2002  ;;  %v1456_v41 = vadd.f32 %v7269_v23, %v7447_v22  ;;  %vm2820_vm4 = vcmp.ge.f32.partialorder %v7587_v26, 0.0 }
 0x390   : > { %v2061_v18 = vadd.f32 %v7281_v37, %v2003_v46  ;;  %v2062_v48 = vadd.f32 %v7278_v35, %v2003_v46  ;;  %9850 = vst [vmem:[#allocation75_spill] sm:$0xff] %v7608_v8  ;;  %9851 = vst [vmem:[#allocation76_spill] sm:$0xff] %v7611_v14 }
 0x391   : > { %vm1488_vm6 = vcmp.ge.f32.partialorder %v1456_v41, 0.0 }
 0x392   : > { %vm2093_vm7 = vcmp.ge.f32.partialorder %v2061_v18, 0.0  ;;  %vm2094_vm8 = vcmp.ge.f32.partialorder %v2062_v48, 0.0  ;;  %v2125_v49 = vmul.f32 0.2, %v2061_v18  ;;  %v2126_v46 = vmul.f32 0.2, %v2062_v48 }
 0x394   : > { %v7563_v27 = vpop.permute.xlu1 %2731  ;;  %v2157_v7 = vsel %vm2093_vm7, %v2061_v18, %v2125_v49  ;;  %v2158_v25 = vsel %vm2094_vm8, %v2062_v48, %v2126_v46  ;;  %v1611_v18 = vmax.f32 %v7531_v16, %v7534_v1  ;;  %v2783_v48 = vadd.f32 %v7228_v19, %v7384_v52  ;;  %v7589_v49 = vpop.permute.xlu0 %1412 }
 0x395   : > { %v7572_v61 = vadd.f32 %v2157_v7, %v7536_v12  ;;  %v7575_v45 = vadd.f32 %v2158_v25, %v7538_v0  ;;  %v3638_v46 = vmax.f32 %v7566_v44, %v7569_v59  ;;  %v7595_v7 = vadd.f32 %v7228_v19, %v7437_v24 }
 0x396   : > { %v2059_v1 = vadd.f32 %v7281_v37, %v7421_v42  ;;  %vm2815_vm14 = vcmp.ge.f32.partialorder %v2783_v48, 0.0  ;;  %v2846_v24 = vmul.f32 0.2, %v2782_v56  ;;  %v2847_v16 = vmul.f32 0.2, %v2783_v48 }
 0x397   : > { %9848 = vst [vmem:[#allocation73_spill] sm:$0xff] %v7572_v61  ;;  %9849 = vst [vmem:[#allocation74_spill] sm:$0xff] %v7575_v45  ;;  %v2227_v52 = vmax.f32 %v7572_v61, %v7575_v45  ;;  %vm2821_vm5 = vcmp.ge.f32.partialorder %v7595_v7, 0.0 }
 0x398   : > { %1612 = vmax.xlane.f32.xlu1 %v1611_v18  ;;  %v2060_v18 = vadd.f32 %v7278_v35, %v7421_v42  ;;  %v2880_v42 = vsel %vm2816_vm11, %v2784_v2, %v2848_v57  ;;  %v2123_v45 = vmul.f32 0.2, %v2059_v1  ;;  %v7615_v11 = vpop.permute.xlu0 %2018  ;;  %vm2091_vm2 = vcmp.ge.f32.partialorder %v2059_v1, 0.0 }
 0x399   : > { %v1408_v25 = vpop.permute.xlu1 %1407  ;;  %2228 = vmax.xlane.f32.xlu0 %v2227_v52  ;;  %v1457_v2 = vadd.f32 %v7266_v17, %v7447_v22 }
 0x39a   : > { %v1466_v59 = vadd.f32 %v7269_v23, %v1408_v25  ;;  %v1467_v44 = vadd.f32 %v7266_v17, %v1408_v25  ;;  %v2881_v25 = vsel %vm2817_vm12, %v2785_v29, %v2849_v4  ;;  %v2124_v61 = vmul.f32 0.2, %v2060_v18 }
 0x39b   : > { %vm2092_vm3 = vcmp.ge.f32.partialorder %v2060_v18, 0.0  ;;  %v3635_v29 = vmax.f32 %v7608_v8, %v7611_v14  ;;  %v7641_v57 = vadd.f32 %v2881_v25, %v7339_v15  ;;  %v2155_v4 = vsel %vm2091_vm2, %v2059_v1, %v2123_v45 }
 0x39c   : > { %vm1498_vm15 = vcmp.ge.f32.partialorder %v1466_v59, 0.0  ;;  %vm1499_vm1 = vcmp.ge.f32.partialorder %v1467_v44, 0.0  ;;  %v1530_v13 = vmul.f32 0.2, %v1466_v59  ;;  %v1531_v50 = vmul.f32 0.2, %v1467_v44  ;;  %2213 = vmax.xlane.f32.xlu1 %v2212_v43 }
 0x39d   : > { %9855 = vst [vmem:[#allocation80_spill] sm:$0xff] %v7641_v57  ;;  %v2156_v22 = vsel %vm2092_vm3, %v2060_v18, %v2124_v61  ;;  %v7662_v45 = vadd.f32 %v2155_v4, %v7426_v32  ;;  %vm1489_vm7 = vcmp.ge.f32.partialorder %v1457_v2, 0.0  ;;  %v7678_v25 = vadd.f32 %v7269_v23, %v7473_v3 }
 0x39e   : > { %v7617_v52 = vpop.permute.xlu1 %2014  ;;  %v1562_v9 = vsel %vm1498_vm15, %v1466_v59, %v1530_v13  ;;  %v1563_v58 = vsel %vm1499_vm1, %v1467_v44, %v1531_v50  ;;  %v1320_v59 = vld [vmem:[%s7237_s10 + $0x40] sm:$0xff]  ;;  %v7634_v44 = vadd.f32 %v2880_v42, %v7337_v6  ;;  %v2853_v13 = vmul.f32 0.2, %v7595_v7 }
 0x39f   : > { %v7620_v38 = vadd.f32 %v1562_v9, %v7559_v62  ;;  %v7623_v63 = vadd.f32 %v1563_v58, %v7561_v28  ;;  %v2878_v9 = vsel %vm2814_vm13, %v2782_v56, %v2846_v24  ;;  %v2879_v58 = vsel %vm2815_vm14, %v2783_v48, %v2847_v16  ;;  %v7651_v16 = vpop.permute.xlu0 %1422  ;;  %9858 = vst [vmem:[#allocation83_spill] sm:$0xff] %v7662_v45 }
 0x3a0   : > { %3639 = vmax.xlane.f32.xlu1 %v3638_v46  ;;  %9854 = vst [vmem:[#allocation79_spill] sm:$0xff] %v7634_v44  ;;  %v1323_v46 = vld [vmem:[%s7237_s10 + $0x58] sm:$0xff]  ;;  %v7648_v6 = vunpack.c.l.bf16 %v1320_v59  ;;  %v7654_v15 = vadd.f32 %v2878_v9, %v7372_v21  ;;  %v7657_v61 = vadd.f32 %v2879_v58, %v7382_v53  ;;  %v7659_v1 = vunpack.c.h.bf16 %v1320_v59 }
 0x3a1   : > { %9852 = vst [vmem:[#allocation77_spill] sm:$0xff] %v7620_v38  ;;  %9853 = vst [vmem:[#allocation78_spill] sm:$0xff] %v7623_v63  ;;  %v1635_v43 = vmax.f32 %v7620_v38, %v7623_v63  ;;  %v7665_v56 = vadd.f32 %v2156_v22, %v7428_v47  ;;  %v7667_v48 = vunpack.c.l.bf16 %v1323_v46  ;;  %v7669_v18 = vunpack.c.h.bf16 %v1323_v46 }
 0x3a2   : > { %9856 = vst [vmem:[#allocation81_spill] sm:$0xff] %v7654_v15  ;;  %9857 = vst [vmem:[#allocation82_spill] sm:$0xff] %v7657_v61  ;;  %v1520_v24 = vmul.f32 0.2, %v1456_v41  ;;  %v1521_v42 = vmul.f32 0.2, %v1457_v2  ;;  %v2947_v21 = vmax.f32 %v7634_v44, %v7641_v57  ;;  %v2884_v53 = vsel %vm2820_vm4, %v7587_v26, %v2852_v20 }
 0x3a3   : > { %v7646_v50 = vpop.permute.xlu1 %2743  ;;  %1636 = vmax.xlane.f32.xlu0 %v1635_v43  ;;  %9859 = vst [vmem:[#allocation84_spill] sm:$0xff] %v7665_v56  ;;  %9860 = vst [vmem:[#allocation85_spill] sm:$0xff] %v7667_v48  ;;  %v2885_v59 = vsel %vm2821_vm5, %v7595_v7, %v2853_v13  ;;  %v2786_v9 = vadd.f32 %v7231_v34, %v7460_v30  ;;  %v2787_v26 = vadd.f32 %v7228_v19, %v7460_v30  ;;  %v7702_v30 = vpop.permute.xlu0 %2026 }
 0x3a4   : > { %3636 = vmax.xlane.f32.xlu1 %v3635_v29  ;;  %9861 = vst [vmem:[#allocation86_spill] sm:$0xff] %v7669_v18  ;;  %v7685_v29 = vadd.f32 %v7266_v17, %v7473_v3  ;;  %v2944_v58 = vmax.f32 %v7654_v15, %v7657_v61  ;;  %v2224_v7 = vmax.f32 %v7662_v45, %v7665_v56  ;;  %v1322_v15 = vld [vmem:[%s7237_s10 + $0x50] sm:$0xff]  ;;  %vm1492_vm12 = vcmp.ge.f32.partialorder %v7678_v25, 0.0 }
 0x3a5   : > { %v7698_v3 = vadd.f32 %v2884_v53, %v7426_v32  ;;  %v2069_v22 = vadd.f32 %v7281_v37, %v7615_v11  ;;  %v7705_v46 = vadd.f32 %v2885_v59, %v7428_v47  ;;  %v1552_v13 = vsel %vm1488_vm6, %v1456_v41, %v1520_v24 }
 0x3a6   : > { %vm2818_vm10 = vcmp.ge.f32.partialorder %v2786_v9, 0.0  ;;  %vm2819_vm11 = vcmp.ge.f32.partialorder %v2787_v26, 0.0  ;;  %v2850_v32 = vmul.f32 0.2, %v2786_v9  ;;  %v2070_v53 = vadd.f32 %v7278_v35, %v7615_v11 }
 0x3a7   : > { %9862 = vst [vmem:[#allocation87_spill] sm:$0xff] %v7698_v3  ;;  %9863 = vst [vmem:[#allocation88_spill] sm:$0xff] %v7705_v46  ;;  %v2851_v63 = vmul.f32 0.2, %v2787_v26  ;;  %v7715_v41 = vadd.f32 %v1552_v13, %v7462_v39  ;;  %vm1493_vm13 = vcmp.ge.f32.partialorder %v7685_v29, 0.0  ;;  %vm2101_vm14 = vcmp.ge.f32.partialorder %v2069_v22, 0.0 }
 0x3a8   : > { %v2011_v20 = vpop.permute.xlu1 %2010  ;;  %2948 = vmax.xlane.f32.xlu1 %v2947_v21  ;;  %v1553_v21 = vsel %vm1489_vm7, %v1457_v2, %v1521_v42  ;;  %v2063_v2 = vadd.f32 %v7281_v37, %v7495_v5  ;;  %v2133_v13 = vmul.f32 0.2, %v2069_v22  ;;  %vm2102_vm15 = vcmp.ge.f32.partialorder %v2070_v53, 0.0 }
 0x3a9   : > { %v2065_v43 = vadd.f32 %v7281_v37, %v2011_v20  ;;  %v2066_v4 = vadd.f32 %v7278_v35, %v2011_v20  ;;  %9864 = vst [vmem:[#allocation89_spill] sm:$0xff] %v7715_v41  ;;  %v7726_v11 = vadd.f32 %v1553_v21, %v7464_v40  ;;  %v2953_v21 = vmax.f32 %v7698_v3, %v7705_v46 }
 0x3aa   : > { %v2134_v8 = vmul.f32 0.2, %v2070_v53  ;;  %v2127_v57 = vmul.f32 0.2, %v2063_v2  ;;  %vm2095_vm1 = vcmp.ge.f32.partialorder %v2063_v2, 0.0 }
 0x3ab   : > { %vm2097_vm8 = vcmp.ge.f32.partialorder %v2065_v43, 0.0  ;;  %vm2098_vm9 = vcmp.ge.f32.partialorder %v2066_v4, 0.0  ;;  %v2129_v20 = vmul.f32 0.2, %v2065_v43  ;;  %v2130_v61 = vmul.f32 0.2, %v2066_v4 }
 0x3ac   : > { %2945 = vmax.xlane.f32.xlu1 %v2944_v58  ;;  %9867 = vst [vmem:[#allocation92_spill] sm:$0xff] %v7726_v11  ;;  %v7732_v58 = vunpack.c.l.bf16 %v1322_v15  ;;  %v1620_v38 = vmax.f32 %v7715_v41, %v7726_v11 }
 0x3ad   : > { %v7712_v14 = vpop.permute.xlu1 %3436  ;;  %v2161_v47 = vsel %vm2097_vm8, %v2065_v43, %v2129_v20  ;;  %v2162_v59 = vsel %vm2098_vm9, %v2066_v4, %v2130_v61  ;;  %v2064_v61 = vadd.f32 %v7278_v35, %v7495_v5  ;;  %v1524_v43 = vmul.f32 0.2, %v7678_v25  ;;  %v7736_v20 = vpop.permute.xlu0 %3452 }
 0x3ae   : > { %v7720_v24 = vadd.f32 %v2161_v47, %v7648_v6  ;;  %v7723_v42 = vadd.f32 %v2162_v59, %v7659_v1  ;;  %9868 = vst [vmem:[#allocation93_spill] sm:$0xff] %v7732_v58  ;;  %v1525_v4 = vmul.f32 0.2, %v7685_v29  ;;  %v2882_v59 = vsel %vm2818_vm10, %v2786_v9, %v2850_v32 }
 0x3af   : > { %v2883_v5 = vsel %vm2819_vm11, %v2787_v26, %v2851_v63  ;;  %vm2096_vm2 = vcmp.ge.f32.partialorder %v2064_v61, 0.0  ;;  %v7749_v9 = vadd.f32 %v2882_v59, %v7462_v39  ;;  %v2165_v26 = vsel %vm2101_vm14, %v2069_v22, %v2133_v13 }
 0x3b0   : > { %9865 = vst [vmem:[#allocation90_spill] sm:$0xff] %v7720_v24  ;;  %9866 = vst [vmem:[#allocation91_spill] sm:$0xff] %v7723_v42  ;;  %2225 = vmax.xlane.f32.xlu1 %v2224_v7  ;;  %v2233_v47 = vmax.f32 %v7720_v24, %v7723_v42  ;;  %v2128_v7 = vmul.f32 0.2, %v2064_v61  ;;  %v7752_v63 = vadd.f32 %v2883_v5, %v7464_v40  ;;  %v7764_v13 = vunpack.c.h.bf16 %v1322_v15 }
 0x3b1   : > { %9869 = vst [vmem:[#allocation94_spill] sm:$0xff] %v7749_v9  ;;  %v7755_v24 = vpop.permute.xlu0 %3464  ;;  %v2159_v39 = vsel %vm2095_vm1, %v2063_v2, %v2127_v57  ;;  %v7775_v57 = vadd.f32 %v2165_v26, %v7732_v58  ;;  %v1557_v15 = vsel %vm1493_vm13, %v7685_v29, %v1525_v4  ;;  %v2067_v2 = vadd.f32 %v7281_v37, %v7617_v52 }
 0x3b2   : > { %v1418_v44 = vpop.permute.xlu1 %1417  ;;  %2234 = vmax.xlane.f32.xlu0 %v2233_v47  ;;  %9870 = vst [vmem:[#allocation95_spill] sm:$0xff] %v7752_v63  ;;  %v2166_v47 = vsel %vm2102_vm15, %v2070_v53, %v2134_v8  ;;  %v2160_v22 = vsel %vm2096_vm2, %v2064_v61, %v2128_v7  ;;  %9871 = vst [vmem:[#allocation96_spill] sm:$0xff] %v7764_v13  ;;  %v2950_v42 = vmax.f32 %v7749_v9, %v7752_v63 }
 0x3b3   : > { %v1470_v56 = vadd.f32 %v7269_v23, %v1418_v44  ;;  %v1471_v46 = vadd.f32 %v7266_v17, %v1418_v44  ;;  %v2790_v44 = vadd.f32 %v7231_v34, %v7563_v27  ;;  %9874 = vst [vmem:[#allocation99_spill] sm:$0xff] %v7775_v57  ;;  %v7778_v8 = vadd.f32 %v2159_v39, %v7491_v31 }
 0x3b4   : > { %2954 = vmax.xlane.f32.xlu1 %v2953_v21  ;;  %v2791_v21 = vadd.f32 %v7228_v19, %v7563_v27  ;;  %v7790_v53 = vadd.f32 %v2160_v22, %v7497_v33  ;;  %v2068_v61 = vadd.f32 %v7278_v35, %v7617_v52  ;;  %v1465_v7 = vadd.f32 %v7266_v17, %v7517_v51 }
 0x3b5   : > { %vm1502_vm3 = vcmp.ge.f32.partialorder %v1470_v56, 0.0  ;;  %vm1503_vm4 = vcmp.ge.f32.partialorder %v1471_v46, 0.0  ;;  %v1534_v32 = vmul.f32 0.2, %v1470_v56  ;;  %v1535_v3 = vmul.f32 0.2, %v1471_v46  ;;  %v7800_v29 = vpop.permute.xlu0 %1432 }
 0x3b6   : > { %9875 = vst [vmem:[#allocation100_spill] sm:$0xff] %v7778_v8  ;;  %vm2822_vm5 = vcmp.ge.f32.partialorder %v2790_v44, 0.0  ;;  %9877 = vst [vmem:[#allocation102_spill] sm:$0xff] %v7790_v53  ;;  %vm2823_vm6 = vcmp.ge.f32.partialorder %v2791_v21, 0.0  ;;  %v2230_v52 = vmax.f32 %v7778_v8, %v7790_v53  ;;  %vm2099_vm8 = vcmp.ge.f32.partialorder %v2067_v2, 0.0 }
 0x3b7   : > { %v2023_v40 = vpop.permute.xlu1 %2022  ;;  %v1566_v59 = vsel %vm1502_vm3, %v1470_v56, %v1534_v32  ;;  %v1567_v5 = vsel %vm1503_vm4, %v1471_v46, %v1535_v3  ;;  %v7781_v56 = vadd.f32 %v2166_v47, %v7764_v13  ;;  %v2854_v3 = vmul.f32 0.2, %v2790_v44 }
 0x3b8   : > { %1621 = vmax.xlane.f32.xlu1 %v1620_v38  ;;  %v7769_v11 = vadd.f32 %v1566_v59, %v7667_v48  ;;  %v7772_v27 = vadd.f32 %v1567_v5, %v7669_v18  ;;  %v1556_v38 = vsel %vm1492_vm12, %v7678_v25, %v1524_v43  ;;  %v2855_v46 = vmul.f32 0.2, %v2791_v21 }
 0x3b9   : > { %9876 = vst [vmem:[#allocation101_spill] sm:$0xff] %v7781_v56  ;;  %v1464_v43 = vadd.f32 %v7269_v23, %v7517_v51  ;;  %v7807_v26 = vadd.f32 %v1556_v38, %v7536_v12  ;;  %v7812_v32 = vadd.f32 %v1557_v15, %v7538_v0  ;;  %v2886_v39 = vsel %vm2822_vm5, %v2790_v44, %v2854_v3  ;;  %v1324_v3 = vld [vmem:[%s7237_s10 + $0x60] sm:$0xff] }
 0x3ba   : > { %9872 = vst [vmem:[#allocation97_spill] sm:$0xff] %v7769_v11  ;;  %9873 = vst [vmem:[#allocation98_spill] sm:$0xff] %v7772_v27  ;;  %v1641_v25 = vmax.f32 %v7769_v11, %v7772_v27  ;;  %v2887_v47 = vsel %vm2823_vm6, %v2791_v21, %v2855_v46  ;;  %v2132_v5 = vmul.f32 0.2, %v2068_v61  ;;  %v2239_v51 = vmax.f32 %v7775_v57, %v7781_v56  ;;  %v7828_v46 = vpop.permute.xlu0 %2034 }
 0x3bb   : > { %9878 = vst [vmem:[#allocation103_spill] sm:$0xff] %v7807_v26  ;;  %9879 = vst [vmem:[#allocation104_spill] sm:$0xff] %v7812_v32  ;;  %vm1496_vm7 = vcmp.ge.f32.partialorder %v1464_v43, 0.0  ;;  %vm2100_vm9 = vcmp.ge.f32.partialorder %v2068_v61, 0.0  ;;  %v1528_v38 = vmul.f32 0.2, %v1464_v43  ;;  %v7822_v44 = vadd.f32 %v2886_v39, %v7536_v12 }
 0x3bc   : > { %v7802_v4 = vpop.permute.xlu1 %3448  ;;  %2951 = vmax.xlane.f32.xlu1 %v2950_v42  ;;  %1642 = vmax.xlane.f32.xlu0 %v1641_v25  ;;  %v2131_v42 = vmul.f32 0.2, %v2067_v2  ;;  %v1529_v15 = vmul.f32 0.2, %v1465_v7  ;;  %v7825_v21 = vadd.f32 %v2887_v47, %v7538_v0  ;;  %vm1497_vm10 = vcmp.ge.f32.partialorder %v1465_v7, 0.0 }
 0x3bd   : > { %9880 = vst [vmem:[#allocation105_spill] sm:$0xff] %v7822_v44  ;;  %v2071_v59 = vadd.f32 %v7281_v37, %v2023_v40  ;;  %v2164_v47 = vsel %vm2100_vm9, %v2068_v61, %v2132_v5  ;;  %v1468_v56 = vadd.f32 %v7269_v23, %v7589_v49  ;;  %v7841_v57 = vunpack.c.l.bf16 %v1324_v3 }
 0x3be   : > { %9881 = vst [vmem:[#allocation106_spill] sm:$0xff] %v7825_v21  ;;  %v2163_v63 = vsel %vm2099_vm8, %v2067_v2, %v2131_v42  ;;  %v2956_v22 = vmax.f32 %v7822_v44, %v7825_v21  ;;  %v1560_v2 = vsel %vm1496_vm7, %v1464_v43, %v1528_v38  ;;  %v1561_v61 = vsel %vm1497_vm10, %v1465_v7, %v1529_v15  ;;  %v1325_v42 = vld [vmem:[%s7237_s10 + $0x68] sm:$0xff]  ;;  %v7872_v38 = vpop.permute.xlu0 %2763 }
 0x3bf   : > { %v2135_v5 = vmul.f32 0.2, %v2071_v59  ;;  %v2074_v21 = vadd.f32 %v7278_v35, %v7702_v30  ;;  %vm2103_vm11 = vcmp.ge.f32.partialorder %v2071_v59, 0.0  ;;  %v1532_v43 = vmul.f32 0.2, %v1468_v56 }
 0x3c0   : > { %2231 = vmax.xlane.f32.xlu1 %v2230_v52  ;;  %2240 = vmax.xlane.f32.xlu0 %v2239_v51  ;;  %v2072_v52 = vadd.f32 %v7278_v35, %v2023_v40  ;;  %v1626_v51 = vmax.f32 %v7807_v26, %v7812_v32  ;;  %v7843_v40 = vunpack.c.h.bf16 %v1324_v3  ;;  %v1469_v32 = vadd.f32 %v7266_v17, %v7589_v49 }
 0x3c1   : > { %v7819_v25 = vpop.permute.xlu1 %2747  ;;  %v7858_v3 = vadd.f32 %v2164_v47, %v7561_v28  ;;  %v2073_v49 = vadd.f32 %v7281_v37, %v7702_v30  ;;  %v7866_v7 = vadd.f32 %v7269_v23, %v7651_v16  ;;  %v7874_v15 = vunpack.c.l.bf16 %v1325_v42 }
 0x3c2   : > { %v2136_v9 = vmul.f32 0.2, %v2072_v52  ;;  %vm2104_vm12 = vcmp.ge.f32.partialorder %v2072_v52, 0.0  ;;  %vm1500_vm13 = vcmp.ge.f32.partialorder %v1468_v56, 0.0  ;;  %v1533_v47 = vmul.f32 0.2, %v1469_v32 }
 0x3c3   : > { %9884 = vst [vmem:[#allocation109_spill] sm:$0xff] %v7858_v3  ;;  %9885 = vst [vmem:[#allocation110_spill] sm:$0xff] %v7874_v15  ;;  %v7877_v30 = vadd.f32 %v1560_v2, %v7648_v6  ;;  %v7880_v44 = vadd.f32 %v1561_v61, %v7659_v1  ;;  %vm1501_vm14 = vcmp.ge.f32.partialorder %v1469_v32, 0.0  ;;  %v2167_v53 = vsel %vm2103_vm11, %v2071_v59, %v2135_v5  ;;  %v7886_v2 = vpop.xlane.xlu0 %2942 }
 0x3c4   : > { %1627 = vmax.xlane.f32.xlu1 %v1626_v51  ;;  %v7855_v51 = vadd.f32 %v2163_v63, %v7559_v62  ;;  %v7870_v63 = vadd.f32 %v7266_v17, %v7651_v16  ;;  %v2168_v16 = vsel %vm2104_vm12, %v2072_v52, %v2136_v9  ;;  %vm2105_vm15 = vcmp.ge.f32.partialorder %v2073_v49, 0.0  ;;  %9888 = vst [vmem:[#allocation113_spill] sm:$0xff] %v7886_v2 }
 0x3c5   : > { %9886 = vst [vmem:[#allocation111_spill] sm:$0xff] %v7877_v30  ;;  %9887 = vst [vmem:[#allocation112_spill] sm:$0xff] %v7880_v44  ;;  %vm2106_vm1 = vcmp.ge.f32.partialorder %v2074_v21, 0.0  ;;  %v2137_v8 = vmul.f32 0.2, %v2073_v49  ;;  %vm1504_vm2 = vcmp.ge.f32.partialorder %v7866_v7, 0.0  ;;  %v7890_v41 = vunpack.c.h.bf16 %v1325_v42 }
 0x3c6   : > { %v7852_v39 = vpop.permute.xlu1 %3444  ;;  %9883 = vst [vmem:[#allocation108_spill] sm:$0xff] %v7855_v51  ;;  %v2236_v26 = vmax.f32 %v7855_v51, %v7858_v3  ;;  %vm1505_vm3 = vcmp.ge.f32.partialorder %v7870_v63, 0.0  ;;  %v1564_v9 = vsel %vm1500_vm13, %v1468_v56, %v1532_v43  ;;  %v1632_v59 = vmax.f32 %v7877_v30, %v7880_v44 }
 0x3c7   : > { %9882 = vst [vmem:[#allocation107_spill] sm:$0xff] %v7852_v39  ;;  %9889 = vst [vmem:[#allocation114_spill] sm:$0xff] %v7890_v41  ;;  %v7896_v52 = vadd.f32 %v2167_v53, %v7667_v48  ;;  %v7899_v5 = vadd.f32 %v2168_v16, %v7669_v18  ;;  %v1565_v3 = vsel %vm1501_vm14, %v1469_v32, %v1533_v47  ;;  %v1537_v42 = vmul.f32 0.2, %v7870_v63  ;;  %v1327_v39 = vld [vmem:[%s7237_s10 + $0x78] sm:$0xff] }
 0x3c8   : > { %2957 = vmax.xlane.f32.xlu1 %v2956_v22  ;;  %v2138_v22 = vmul.f32 0.2, %v2074_v21  ;;  %v7905_v56 = vadd.f32 %v1564_v9, %v7732_v58  ;;  %v2169_v43 = vsel %vm2105_vm15, %v2073_v49, %v2137_v8  ;;  %v7909_v32 = vadd.f32 %v1565_v3, %v7764_v13 }
 0x3c9   : > { %9890 = vst [vmem:[#allocation115_spill] sm:$0xff] %v7896_v52  ;;  %9891 = vst [vmem:[#allocation116_spill] sm:$0xff] %v7899_v5  ;;  %v2242_v8 = vmax.f32 %v7896_v52, %v7899_v5 }
 0x3ca   : > { %9892 = vst [vmem:[#allocation117_spill] sm:$0xff] %v7905_v56  ;;  %9893 = vst [vmem:[#allocation118_spill] sm:$0xff] %v7909_v32  ;;  %v2170_v47 = vsel %vm2106_vm1, %v2074_v21, %v2138_v22 }
 0x3cb   : > { %v1428_v27 = vpop.permute.xlu1 %1427 }
 0x3cc   : > { %v1474_v61 = vadd.f32 %v7269_v23, %v1428_v27  ;;  %v1475_v11 = vadd.f32 %v7266_v17, %v1428_v27  ;;  %2237 = vmax.xlane.f32.xlu1 %v2236_v26  ;;  %v1536_v26 = vmul.f32 0.2, %v7866_v7 }
 0x3cd   : > { %v1610_v53 = vpop.xlane.xlu0 %1609 }
 0x3ce   : > { %vm1506_vm4 = vcmp.ge.f32.partialorder %v1474_v61, 0.0  ;;  %vm1507_vm5 = vcmp.ge.f32.partialorder %v1475_v11, 0.0  ;;  %v1538_v51 = vmul.f32 0.2, %v1474_v61  ;;  %v1539_v27 = vmul.f32 0.2, %v1475_v11 }
 0x3cf   : > { %v1656_v45 = vsub.f32 %v7298_v36, %v1610_v53  ;;  %v1657_v18 = vsub.f32 %v7301_v10, %v1610_v53  ;;  %v7928_v10 = vadd.f32 %v2170_v47, %v7843_v40 }
 0x3d0   : > { %v2031_v44 = vpop.permute.xlu1 %2030  ;;  %1633 = vmax.xlane.f32.xlu1 %v1632_v59  ;;  %v1570_v16 = vsel %vm1506_vm4, %v1474_v61, %v1538_v51  ;;  %v1571_v30 = vsel %vm1507_vm5, %v1475_v11, %v1539_v27  ;;  %v7925_v51 = vadd.f32 %v2169_v43, %v7841_v57  ;;  %v5750_v61 = vunpack.i.l.bf16 %v7015_v60  ;;  %v9900_v43 = vld [vmem:[#allocation36_spill] sm:$0xff] }
 0x3d1   : > { %v2075_v48 = vadd.f32 %v7281_v37, %v2031_v44  ;;  %v2076_v9 = vadd.f32 %v7278_v35, %v2031_v44  ;;  %v7919_v49 = vadd.f32 %v1570_v16, %v7874_v15  ;;  %v7922_v11 = vadd.f32 %v1571_v30, %v7890_v41  ;;  %9897 = vst [vmem:[#allocation122_spill] sm:$0xff] %v7928_v10  ;;  %v9898_v30 = vld [vmem:[#allocation7_spill] sm:$0xff]  ;;  %v9901_v16 = vld [vmem:[#allocation37_spill] sm:$0xff] }
 0x3d2   : > { %9896 = vst [vmem:[#allocation121_spill] sm:$0xff] %v7925_v51  ;;  %v1688_v21 = vmul.f32 1.442695, %v1656_v45  ;;  %v1690_v36 = vmul.f32 1.442695, %v1657_v18  ;;  %v5731_v59 = vunpack.i.h.bf16 %v9898_v30  ;;  %v5730_v27 = vunpack.i.l.bf16 %v9898_v30  ;;  %v2211_v45 = vpop.xlane.xlu0 %2210 }
 0x3d3   : > { %9894 = vst [vmem:[#allocation119_spill] sm:$0xff] %v7919_v49  ;;  %9895 = vst [vmem:[#allocation120_spill] sm:$0xff] %v7922_v11  ;;  %vm2107_vm6 = vcmp.ge.f32.partialorder %v2075_v48, 0.0  ;;  %vm2108_vm7 = vcmp.ge.f32.partialorder %v2076_v9, 0.0  ;;  %v2139_v44 = vmul.f32 0.2, %v2075_v48  ;;  %v1647_v22 = vmax.f32 %v7919_v49, %v7922_v11 }
 0x3d4   : > { %v2140_v3 = vmul.f32 0.2, %v2076_v9  ;;  %2243 = vmax.xlane.f32.xlu1 %v2242_v8  ;;  %6008 = vpow2.f32 %v1688_v21  ;;  %v2257_v53 = vsub.f32 %v9900_v43, %v2211_v45  ;;  %v2258_v47 = vsub.f32 %v9901_v16, %v2211_v45 }
 0x3d5   : > { %v7935_v18 = vpop.permute.xlu1 %2759  ;;  %6010 = vpow2.f32 %v1690_v36  ;;  %1648 = vmax.xlane.f32.xlu0 %v1647_v22  ;;  %v1638_v8 = vmax.f32 %v7905_v56, %v7909_v32  ;;  %v2171_v11 = vsel %vm2107_vm6, %v2075_v48, %v2139_v44  ;;  %v1568_v21 = vsel %vm1504_vm2, %v7866_v7, %v1536_v26  ;;  %v9903_v48 = vld [vmem:[#allocation8_spill] sm:$0xff] }
 0x3d6   : > { %9899 = vst [vmem:[#allocation7_spill] sm:$0xff] %v7935_v18  ;;  %v2172_v49 = vsel %vm2108_vm7, %v2076_v9, %v2140_v3  ;;  %v1569_v36 = vsel %vm1505_vm3, %v7870_v63, %v1537_v42  ;;  %v2289_v30 = vmul.f32 1.442695, %v2257_v53  ;;  %v2291_v43 = vmul.f32 1.442695, %v2258_v47  ;;  %v9904_v3 = vld [vmem:[#allocation9_spill] sm:$0xff]  ;;  %v7957_v7 = vpop.xlane.xlu0 %2939 }
 0x3d7   : > { %v2245_v22 = vmax.f32 %v7925_v51, %v7928_v10  ;;  %v7952_v45 = vadd.f32 %v2171_v11, %v7874_v15  ;;  %v5736_v44 = vunpack.i.h.bf16 %v9903_v48  ;;  %v5735_v9 = vunpack.i.l.bf16 %v9903_v48  ;;  %9905 = vst [vmem:[#allocation37_spill] sm:$0xff] %v7957_v7  ;;  %v9907_v63 = vld [vmem:[#allocation10_spill] sm:$0xff]  ;;  %v9925_v15 = vld [vmem:[#allocation23_spill] sm:$0xff] }
 0x3d8   : > { %1639 = vmax.xlane.f32.xlu1 %v1638_v8  ;;  %v5776_v16 = vunpack.i.h.bf16 %v9904_v3  ;;  %v7960_v26 = vadd.f32 %v2172_v49, %v7890_v41  ;;  %v5746_v42 = vunpack.i.h.bf16 %v9907_v63  ;;  %v5745_v53 = vunpack.i.l.bf16 %v9907_v63 }
 0x3d9   : > { %9902 = vst [vmem:[#allocation36_spill] sm:$0xff] %v7952_v45  ;;  %v5775_v47 = vunpack.i.l.bf16 %v9904_v3  ;;  %6012 = vpow2.f32 %v2289_v30  ;;  %2246 = vmax.xlane.f32.xlu0 %v2245_v22  ;;  %v7970_v48 = vadd.f32 %v1568_v21, %v7841_v57  ;;  %v7973_v49 = vadd.f32 %v1569_v36, %v7843_v40  ;;  %v9913_v3 = vld [vmem:[#allocation12_spill] sm:$0xff] }
 0x3da   : > { %9906 = vst [vmem:[#allocation8_spill] sm:$0xff] %v7960_v26  ;;  %v7965_v11 = vpop.permute.xlu1 %3456  ;;  %6014 = vpow2.f32 %v2291_v43  ;;  %v2248_v8 = vmax.f32 %v7952_v45, %v7960_v26  ;;  %v9911_v10 = vunpack.i.l.bf16 %v7005_v54  ;;  %v9912_v63 = vunpack.i.h.bf16 %v7005_v54  ;;  %v7993_v5 = vpop.xlane.xlu0 %1618 }
 0x3db   : > { %9908 = vst [vmem:[#allocation9_spill] sm:$0xff] %v7965_v11  ;;  %9909 = vst [vmem:[#allocation10_spill] sm:$0xff] %v7970_v48  ;;  %v5761_v30 = vunpack.i.h.bf16 %v9913_v3  ;;  %v5760_v22 = vunpack.i.l.bf16 %v9913_v3  ;;  %v9914_v43 = vunpack.i.l.bf16 %v7007_v55  ;;  %v9915_v32 = vunpack.i.h.bf16 %v7007_v55  ;;  %v9919_v3 = vld [vmem:[#allocation18_spill] sm:$0xff] }
 0x3dc   : > { %9910 = vst [vmem:[#allocation123_spill] sm:$0xff] %v7973_v49  ;;  %v5541_v51 = vpack.c.bf16 %v9912_v63, %v9911_v10  ;;  %v9916_v21 = vunpack.i.h.bf16 %v7015_v60  ;;  %v5545_v36 = vpack.c.bf16 %v5731_v59, %v5730_v27  ;;  %v7991_v56 = vpack.c.bf16 %v5736_v44, %v5735_v9  ;;  %9917 = vst [vmem:[#allocation12_spill] sm:$0xff] %v7993_v5  ;;  %v9918_v10 = vld [vmem:[#allocation11_spill] sm:$0xff] }
 0x3dd   : > { %v7985_v26 = vpack.c.bf16 %v9915_v32, %v9914_v43  ;;  %2249 = vmax.xlane.f32.xlu1 %v2248_v8  ;;  %v7995_v54 = vpack.c.bf16 %v5776_v16, %v5775_v47  ;;  %v5841_v52 = vunpack.i.h.bf16 %v9919_v3  ;;  %v5840_v55 = vunpack.i.l.bf16 %v9919_v3  ;;  %v9920_v60 = vld [vmem:[#allocation19_spill] sm:$0xff]  ;;  %v9922_v47 = vld [vmem:[#allocation14_spill] sm:$0xff]  ;;  %v9923_v3 = vld [vmem:[#allocation21_spill] sm:$0xff] }
 0x3de   : > { %v7989_v45 = vpack.c.bf16 %v9916_v21, %v5750_v61  ;;  %v6009_v32 = vpop.eup %6008  ;;  %v8000_v43 = vpack.c.bf16 %v5746_v42, %v5745_v53  ;;  %v5846_v61 = vunpack.i.h.bf16 %v9920_v60  ;;  %v5845_v59 = vunpack.i.l.bf16 %v9920_v60  ;;  %v9924_v42 = vld [vmem:[#allocation20_spill] sm:$0xff]  ;;  %v8017_v11 = vpop.xlane.xlu0 %2219 }
 0x3df   : > { %v8004_v27 = vpop.permute.xlu1 %2755  ;;  %v1644_v44 = vmax.f32 %v7970_v48, %v7973_v49  ;;  %v6011_v9 = vpop.eup %6010  ;;  %v8008_v16 = vpack.c.bf16 %v5761_v30, %v5760_v22  ;;  %v5861_v63 = vunpack.i.h.bf16 %v9923_v3  ;;  %v5856_v53 = vunpack.i.h.bf16 %v9924_v42  ;;  %9926 = vst [vmem:[#allocation18_spill] sm:$0xff] %v8017_v11  ;;  %v9927_v22 = vld [vmem:[#allocation22_spill] sm:$0xff]  ;;  %v9928_v48 = vld [vmem:[#allocation25_spill] sm:$0xff]  ;;  %v9929_v11 = vld [vmem:[#allocation27_spill] sm:$0xff] }
 0x3e0   : > { %9921 = vst [vmem:[#allocation11_spill] sm:$0xff] %v8004_v27  ;;  %v5855_v41 = vunpack.i.l.bf16 %v9924_v42  ;;  %v5860_v60 = vunpack.i.l.bf16 %v9923_v3  ;;  %v5871_v27 = vunpack.i.h.bf16 %v9925_v15  ;;  %1880 = vmatprep.mubr.f32.mxu0 %v6011_v9  ;;  %v5870_v30 = vunpack.i.l.bf16 %v9925_v15 }
 0x3e1   : > { %1645 = vmax.xlane.f32.xlu1 %v1644_v44  ;;  %v5876_v8 = vunpack.i.h.bf16 %v9927_v22  ;;  %v5875_v21 = vunpack.i.l.bf16 %v9927_v22  ;;  %1881 = vmatmul.mubr.f32.vlgmr.msra.gmra.mrb[54].mxu0 %v6009_v32  ;;  %v5543_v49 = vpack.c.bf16 %v5841_v52, %v5840_v55  ;;  %v5886_v5 = vunpack.i.h.bf16 %v9928_v48 }
 0x3e2   : > { %v5885_v42 = vunpack.i.l.bf16 %v9928_v48  ;;  %v2077_v3 = vadd.f32 %v7281_v37, %v7828_v46  ;;  %5542 = vmatpush3.bf16.msra.mxu0 %v5541_v51  ;;  %v5575_v7 = vpack.c.bf16 %v5846_v61, %v5845_v59  ;;  %v2078_v22 = vadd.f32 %v7278_v35, %v7828_v46  ;;  %v9931_v59 = vld [vmem:[#allocation24_spill] sm:$0xff]  ;;  %v8036_v2 = vpop.xlane.xlu0 %3645 }
 0x3e3   : > { %v6013_v18 = vpop.eup %6012  ;;  %5544 = vmatprep.subr.bf16.mxu0 %v5543_v49  ;;  %v8030_v55 = vadd.f32 %v6011_v9, %v6009_v32  ;;  %v5547_v48 = vpack.c.bf16 %v5856_v53, %v5855_v41  ;;  %v5579_v61 = vpack.c.bf16 %v5861_v63, %v5860_v60  ;;  %v5891_v44 = vunpack.i.h.bf16 %v9931_v59  ;;  %9932 = vst [vmem:[#allocation14_spill] sm:$0xff] %v8036_v2  ;;  %v1326_v53 = vld [vmem:[%s7237_s10 + $0x70] sm:$0xff] }
 0x3e4   : > { %v1438_v52 = vpop.permute.xlu1 %1437  ;;  %v6015_v13 = vpop.eup %6014  ;;  %v5890_v15 = vunpack.i.l.bf16 %v9931_v59  ;;  %v5551_v46 = vpack.c.bf16 %v5871_v27, %v5870_v30  ;;  %v5583_v49 = vpack.c.bf16 %v5876_v8, %v5875_v21  ;;  %v2141_v32 = vmul.f32 0.2, %v2077_v3 }
 0x3e5   : > { %9930 = vst [vmem:[#allocation19_spill] sm:$0xff] %v8030_v55  ;;  %v1478_v58 = vadd.f32 %v7269_v23, %v1438_v52  ;;  %v1479_v51 = vadd.f32 %v7266_v17, %v1438_v52  ;;  %2609 = vmatprep.mubr.f32.mxu1 %v6015_v13  ;;  %v5555_v9 = vpack.c.bf16 %v5886_v5, %v5885_v42  ;;  %vm2109_vm9 = vcmp.ge.f32.partialorder %v2077_v3, 0.0 }
 0x3e6   : > { %5546 = vmatpush3.bf16.msra.mxu0 %v5545_v36  ;;  %2610 = vmatmul.mubr.f32.vlgmr.msra.gmra.mrb[42].mxu1 %v6013_v18  ;;  %v2142_v52 = vmul.f32 0.2, %v2078_v22  ;;  %vm2110_vm11 = vcmp.ge.f32.partialorder %v2078_v22, 0.0  ;;  %v8041_v27 = vunpack.c.l.bf16 %v1327_v39  ;;  %v8043_v21 = vadd.f32 %v6015_v13, %v6013_v18  ;;  %v8059_v13 = vpop.xlane.xlu0 %1615 }
 0x3e7   : > { %vm1510_vm8 = vcmp.ge.f32.partialorder %v1478_v58, 0.0  ;;  %v1542_v41 = vmul.f32 0.2, %v1478_v58  ;;  %5548 = vmatprep.subr.bf16.mxu0 %v5547_v48  ;;  %5574 = vmatpush3.bf16.msra.mxu1 %v7985_v26  ;;  %vm1511_vm10 = vcmp.ge.f32.partialorder %v1479_v51, 0.0  ;;  %v1543_v63 = vmul.f32 0.2, %v1479_v51 }
 0x3e8   : > { %5576 = vmatprep.subr.bf16.mxu1 %v5575_v7  ;;  %9933 = vst [vmem:[#allocation21_spill] sm:$0xff] %v8041_v27  ;;  %9934 = vst [vmem:[#allocation20_spill] sm:$0xff] %v8043_v21  ;;  %v1476_v36 = vadd.f32 %v7269_v23, %v7800_v29  ;;  %v1477_v5 = vadd.f32 %v7266_v17, %v7800_v29  ;;  %v8050_v42 = vunpack.c.h.bf16 %v1327_v39  ;;  %v8067_v39 = vunpack.c.h.bf16 %v1326_v53 }
 0x3e9   : > { %v2039_v60 = vpop.permute.xlu1 %2038  ;;  %v1574_v8 = vsel %vm1510_vm8, %v1478_v58, %v1542_v41  ;;  %v1575_v26 = vsel %vm1511_vm10, %v1479_v51, %v1543_v63  ;;  %v8057_v58 = vunpack.c.l.bf16 %v1326_v53  ;;  %v2173_v23 = vsel %vm2109_vm9, %v2077_v3, %v2141_v32 }
 0x3ea   : > { %v2079_v30 = vadd.f32 %v7281_v37, %v2039_v60  ;;  %9935 = vst [vmem:[#allocation23_spill] sm:$0xff] %v8050_v42  ;;  %5550 = vmatpush3.bf16.msra.mxu0 %v8000_v43  ;;  %v2080_v7 = vadd.f32 %v7278_v35, %v2039_v60  ;;  %v8055_v48 = vadd.f32 %v1574_v8, %v8041_v27  ;;  %9939 = vst [vmem:[#allocation24_spill] sm:$0xff] %v8067_v39  ;;  %v9945_v60 = vld [vmem:[#allocation29_spill] sm:$0xff] }
 0x3eb   : > { %9937 = vst [vmem:[#allocation25_spill] sm:$0xff] %v8057_v58  ;;  %5552 = vmatprep.subr.bf16.mxu0 %v5551_v46  ;;  %5578 = vmatpush3.bf16.msra.mxu1 %v7991_v56  ;;  %v8063_v17 = vadd.f32 %v1575_v26, %v8050_v42  ;;  %v2174_v37 = vsel %vm2110_vm11, %v2078_v22, %v2142_v52  ;;  %vm1508_vm14 = vcmp.ge.f32.partialorder %v1476_v36, 0.0  ;;  %v1540_v18 = vmul.f32 0.2, %v1476_v36 }
 0x3ec   : > { %9936 = vst [vmem:[#allocation22_spill] sm:$0xff] %v8055_v48  ;;  %vm2111_vm12 = vcmp.ge.f32.partialorder %v2079_v30, 0.0  ;;  %5580 = vmatprep.subr.bf16.mxu1 %v5579_v61  ;;  %vm2112_vm13 = vcmp.ge.f32.partialorder %v2080_v7, 0.0  ;;  %v2143_v35 = vmul.f32 0.2, %v2079_v30  ;;  %vm1509_vm15 = vcmp.ge.f32.partialorder %v1477_v5, 0.0 }
 0x3ed   : > { %9938 = vst [vmem:[#allocation27_spill] sm:$0xff] %v8063_v17  ;;  %v2144_v29 = vmul.f32 0.2, %v2080_v7  ;;  %v1541_v43 = vmul.f32 0.2, %v1477_v5  ;;  %v1653_v56 = vmax.f32 %v8055_v48, %v8063_v17  ;;  %v8073_v51 = vadd.f32 %v2173_v23, %v8057_v58  ;;  %v9942_v61 = vld [vmem:[#allocation15_spill] sm:$0xff]  ;;  %v8093_v23 = vpop.xlane.xlu0 %2216 }
 0x3ee   : > { %5554 = vmatpush3.bf16.msra.mxu0 %v8008_v16  ;;  %v8076_v3 = vadd.f32 %v2174_v37, %v8067_v39  ;;  %v2175_v22 = vsel %vm2111_vm12, %v2079_v30, %v2143_v35  ;;  %v5781_v46 = vunpack.i.h.bf16 %v9942_v61  ;;  %v5780_v32 = vunpack.i.l.bf16 %v9942_v61  ;;  %9947 = vst [vmem:[#allocation29_spill] sm:$0xff] %v8093_v23  ;;  %v9972_v48 = vld [vmem:[#allocation56_spill] sm:$0xff] }
 0x3ef   : > { %9940 = vst [vmem:[#allocation124_spill] sm:$0xff] %v8073_v51  ;;  %v5790_v41 = vunpack.i.l.bf16 %v9918_v10  ;;  %5556 = vmatprep.subr.bf16.mxu0 %v5555_v9  ;;  %5582 = vmatpush3.bf16.msra.mxu1 %v7989_v45  ;;  %v2176_v53 = vsel %vm2112_vm13, %v2080_v7, %v2144_v29  ;;  %v9943_v16 = vunpack.i.l.bf16 %v9922_v47  ;;  %v9944_v52 = vunpack.i.h.bf16 %v9922_v47  ;;  %v9951_v29 = vld [vmem:[#allocation26_spill] sm:$0xff] }
 0x3f0   : > { %9941 = vst [vmem:[#allocation125_spill] sm:$0xff] %v8076_v3  ;;  %v5916_v8 = vunpack.i.h.bf16 %v9945_v60  ;;  %v5915_v30 = vunpack.i.l.bf16 %v9945_v60  ;;  %5584 = vmatprep.subr.bf16.mxu1 %v5583_v49  ;;  %1654 = vmax.xlane.f32.xlu0 %v1653_v56  ;;  %v8091_v26 = vadd.f32 %v2175_v22, %v8041_v27  ;;  %v9948_v45 = vunpack.i.l.bf16 %v9929_v11  ;;  %v9959_v60 = vld [vmem:[#allocation28_spill] sm:$0xff] }
 0x3f1   : > { %v5585_v63 = vpack.c.bf16 %v9944_v52, %v9943_v16  ;;  %v9949_v9 = vunpack.i.h.bf16 %v9929_v11  ;;  %v8100_v37 = vadd.f32 %v2176_v53, %v8050_v42  ;;  %v1572_v47 = vsel %vm1508_vm14, %v1476_v36, %v1540_v18  ;;  %v9953_v18 = vld [vmem:[#allocation13_spill] sm:$0xff]  ;;  %v9954_v16 = vld [vmem:[#allocation16_spill] sm:$0xff]  ;;  %v8129_v52 = vpop.xlane.xlu0 %3642 }
 0x3f2   : > { %9946 = vst [vmem:[#allocation15_spill] sm:$0xff] %v8091_v26  ;;  %v1573_v35 = vsel %vm1509_vm15, %v1477_v5, %v1541_v43  ;;  %v5906_v49 = vunpack.i.h.bf16 %v9951_v29  ;;  %v5905_v56 = vunpack.i.l.bf16 %v9951_v29  ;;  %5558 = vmatpush3.bf16.msra.mxu0 %v7995_v54  ;;  %v5587_v22 = vpack.c.bf16 %v5891_v44, %v5890_v15  ;;  %9958 = vst [vmem:[#allocation16_spill] sm:$0xff] %v8129_v52 }
 0x3f3   : > { %v5559_v7 = vpack.c.bf16 %v9949_v9, %v9948_v45  ;;  %9950 = vst [vmem:[#allocation126_spill] sm:$0xff] %v8100_v37  ;;  %v2251_v11 = vmax.f32 %v8073_v51, %v8076_v3  ;;  %v5589_v61 = vpack.c.bf16 %v5781_v46, %v5780_v32  ;;  %v9952_v53 = vunpack.i.h.bf16 %v9918_v10  ;;  %5586 = vmatpush3.bf16.msra.mxu1 %v5585_v63  ;;  %v9957_v46 = vld [vmem:[#allocation30_spill] sm:$0xff]  ;;  %v9971_v51 = vld [vmem:[#allocation55_spill] sm:$0xff] }
 0x3f4   : > { %v5806_v5 = vunpack.i.h.bf16 %v9953_v18  ;;  %v5805_v43 = vunpack.i.l.bf16 %v9953_v18  ;;  %v5796_v54 = vunpack.i.h.bf16 %v9954_v16  ;;  %5588 = vmatprep.subr.bf16.mxu1 %v5587_v22  ;;  %v2254_v44 = vmax.f32 %v8091_v26, %v8100_v37  ;;  %v9960_v22 = vld [vmem:[#allocation17_spill] sm:$0xff] }
 0x3f5   : > { %v5561_v36 = vpack.c.bf16 %v9952_v53, %v5790_v41  ;;  %5560 = vmatprep.subr.bf16.mxu0 %v5559_v7  ;;  %2252 = vmax.xlane.f32.xlu0 %v2251_v11  ;;  %v8121_v15 = vadd.f32 %v1572_v47, %v8057_v58  ;;  %v8124_v59 = vadd.f32 %v1573_v35, %v8067_v39  ;;  %v5795_v10 = vunpack.i.l.bf16 %v9954_v16  ;;  %v9961_v18 = vld [vmem:[#allocation57_spill] sm:$0xff] }
 0x3f6   : > { %v5931_v32 = vunpack.i.h.bf16 %v9957_v46  ;;  %v5930_v41 = vunpack.i.l.bf16 %v9957_v46  ;;  %v5563_v63 = vpack.c.bf16 %v5916_v8, %v5915_v30  ;;  %v5921_v45 = vunpack.i.h.bf16 %v9959_v60  ;;  %2255 = vmax.xlane.f32.xlu1 %v2254_v44 }
 0x3f7   : > { %9955 = vst [vmem:[#allocation26_spill] sm:$0xff] %v8121_v15  ;;  %9956 = vst [vmem:[#allocation13_spill] sm:$0xff] %v8124_v59  ;;  %v5920_v9 = vunpack.i.l.bf16 %v9959_v60  ;;  %5562 = vmatpush3.bf16.msra.mxu0 %v5561_v36  ;;  %v5591_v7 = vpack.c.bf16 %v5906_v49, %v5905_v56  ;;  %5590 = vmatpush3.bf16.msra.mxu1 %v5589_v61  ;;  %v5565_v47 = vpack.c.bf16 %v5806_v5, %v5805_v43  ;;  %v9962_v36 = vld [vmem:[#allocation34_spill] sm:$0xff]  ;;  %v9963_v49 = vld [vmem:[#allocation33_spill] sm:$0xff]  ;;  %v8141_v61 = vpop.xlane.xlu0 %1624 }
 0x3f8   : > { %5564 = vmatprep.subr.bf16.mxu0 %v5563_v63  ;;  %v1650_v35 = vmax.f32 %v8121_v15, %v8124_v59  ;;  %v5593_v29 = vpack.c.bf16 %v5796_v54, %v5795_v10  ;;  %v5811_v11 = vunpack.i.h.bf16 %v9960_v22  ;;  %v5810_v53 = vunpack.i.l.bf16 %v9960_v22  ;;  %9964 = vst [vmem:[#allocation30_spill] sm:$0xff] %v8141_v61  ;;  %v9965_v43 = vld [vmem:[#allocation60_spill] sm:$0xff]  ;;  %v9966_v10 = vld [vmem:[#allocation65_spill] sm:$0xff]  ;;  %v9968_v60 = vld [vmem:[#allocation70_spill] sm:$0xff] }
 0x3f9   : > { %5592 = vmatprep.subr.bf16.mxu1 %v5591_v7  ;;  %v5567_v8 = vpack.c.bf16 %v5931_v32, %v5930_v41  ;;  %v5595_v30 = vpack.c.bf16 %v5921_v45, %v5920_v9  ;;  %v3487_v16 = vadd.f32 %v9962_v36, %v9961_v18  ;;  %v3488_v56 = vadd.f32 %v9963_v49, %v9961_v18  ;;  %v9969_v22 = vld [vmem:[#allocation63_spill] sm:$0xff] }
 0x3fa   : > { %1651 = vmax.xlane.f32.xlu1 %v1650_v35  ;;  %v5597_v5 = vpack.c.bf16 %v5811_v11, %v5810_v53  ;;  %v8145_v54 = vadd.f32 %v9962_v36, %v9965_v43  ;;  %v8149_v44 = vadd.f32 %v9963_v49, %v9965_v43  ;;  %v2794_v46 = vadd.f32 %v7231_v34, %v9966_v10 }
 0x3fb   : > { %5566 = vmatpush3.bf16.msra.mxu0 %v5565_v47  ;;  %5594 = vmatpush3.bf16.msra.mxu1 %v5593_v29  ;;  %v2795_v32 = vadd.f32 %v7228_v19, %v9966_v10  ;;  %vm3519_vm1 = vcmp.ge.f32.partialorder %v3487_v16, 0.0  ;;  %vm3520_vm2 = vcmp.ge.f32.partialorder %v3488_v56, 0.0  ;;  %v3551_v63 = vmul.f32 0.2, %v3487_v16 }
 0x3fc   : > { %5568 = vmatprep.subr.bf16.mxu0 %v5567_v8  ;;  %5596 = vmatprep.subr.bf16.mxu1 %v5595_v30  ;;  %v8159_v45 = vadd.f32 %v7231_v34, %v9968_v60  ;;  %v8163_v9 = vadd.f32 %v7228_v19, %v9968_v60  ;;  %v8167_v7 = vadd.f32 %v9962_v36, %v7736_v20  ;;  %v3552_v47 = vmul.f32 0.2, %v3488_v56  ;;  %v9970_v8 = vld [vmem:[#allocation64_spill] sm:$0xff] }
 0x3fd   : > { %v8170_v35 = vmul.f32 0.2, %v8145_v54  ;;  %v8174_v29 = vadd.f32 %v9963_v49, %v7736_v20  ;;  %v2792_v11 = vadd.f32 %v7231_v34, %v9969_v22  ;;  %v8179_v53 = vmul.f32 0.2, %v8149_v44 }
 0x3fe   : > { %v8155_v41 = vpop.xlane.xlu0 %3651  ;;  %vm2826_vm3 = vcmp.ge.f32.partialorder %v2794_v46, 0.0  ;;  %vm2827_vm4 = vcmp.ge.f32.partialorder %v2795_v32, 0.0  ;;  %v3489_v30 = vadd.f32 %v9962_v36, %v9970_v8  ;;  %v2858_v18 = vmul.f32 0.2, %v2794_v46 }
 0x3ff   : > { %5598 = vmatpush3.bf16.msra.mxu1 %v5597_v5  ;;  %9967 = vst [vmem:[#allocation28_spill] sm:$0xff] %v8155_v41  ;;  %v2859_v5 = vmul.f32 0.2, %v2795_v32  ;;  %v2793_v43 = vadd.f32 %v7228_v19, %v9969_v22  ;;  %v3490_v20 = vadd.f32 %v9963_v49, %v9970_v8  ;;  %v8188_v10 = vmul.f32 0.2, %v8159_v45 }
 0x400   : > { %v8191_v60 = vmul.f32 0.2, %v8163_v9  ;;  %v8194_v41 = vmul.f32 0.2, %v8167_v7  ;;  %v8197_v59 = vmul.f32 0.2, %v8174_v29  ;;  %v8201_v37 = vadd.f32 %v9962_v36, %v7755_v24 }
 0x401   : > { %v2856_v15 = vmul.f32 0.2, %v2792_v11  ;;  %v8205_v22 = vadd.f32 %v9963_v49, %v7755_v24  ;;  %vm3531_vm5 = vcmp.ge.f32.partialorder %v8167_v7, 0.0  ;;  %v3553_v26 = vmul.f32 0.2, %v3489_v30 }
 0x402   : > { %v2796_v3 = vadd.f32 %v7231_v34, %v7646_v50  ;;  %vm2824_vm6 = vcmp.ge.f32.partialorder %v2792_v11, 0.0  ;;  %v2857_v55 = vmul.f32 0.2, %v2793_v43  ;;  %vm3521_vm7 = vcmp.ge.f32.partialorder %v3489_v30, 0.0 }
 0x403   : > { %v3554_v61 = vmul.f32 0.2, %v3490_v20  ;;  %vm3532_vm8 = vcmp.ge.f32.partialorder %v8174_v29, 0.0  ;;  %vm2825_vm9 = vcmp.ge.f32.partialorder %v2793_v43, 0.0  ;;  %vm3522_vm10 = vcmp.ge.f32.partialorder %v3490_v20, 0.0 }
 0x404   : > { %v2223_v8 = vpop.xlane.xlu0 %2222  ;;  %v8214_v2 = vmul.f32 0.2, %v8201_v37  ;;  %v8218_v23 = vadd.f32 %v7231_v34, %v7872_v38  ;;  %vm3525_vm11 = vcmp.ge.f32.partialorder %v8145_v54, 0.0  ;;  %vm3526_vm12 = vcmp.ge.f32.partialorder %v8149_v44, 0.0 }
 0x405   : > { %v2265_v17 = vsub.f32 %v9971_v51, %v2223_v8  ;;  %v2266_v21 = vsub.f32 %v9972_v48, %v2223_v8  ;;  %v2797_v48 = vadd.f32 %v7228_v19, %v7646_v50  ;;  %v3583_v51 = vsel %vm3519_vm1, %v3487_v16, %v3551_v63  ;;  %v9974_v50 = vld [vmem:[#allocation6_spill] sm:$0xff] }
 0x406   : > { %v2860_v8 = vmul.f32 0.2, %v2796_v3  ;;  %v3585_v39 = vsel %vm3521_vm7, %v3489_v30, %v3553_v26  ;;  %vm3537_vm13 = vcmp.ge.f32.partialorder %v8201_v37, 0.0  ;;  %v3586_v16 = vsel %vm3522_vm10, %v3490_v20, %v3554_v61 }
 0x407   : > { %v2305_v24 = vmul.f32 1.442695, %v2265_v17  ;;  %v2307_v52 = vmul.f32 1.442695, %v2266_v21  ;;  %v9973_v21 = vld [vmem:[#allocation5_spill] sm:$0xff]  ;;  %v3584_v17 = vsel %vm3520_vm2, %v3488_v56, %v3552_v47  ;;  %v2890_v63 = vsel %vm2826_vm3, %v2794_v46, %v2858_v18 }
 0x408   : > { %v2891_v58 = vsel %vm2827_vm4, %v2795_v32, %v2859_v5  ;;  %v3492_v56 = vadd.f32 %v9963_v49, %v7712_v14  ;;  %v2888_v26 = vsel %vm2824_vm6, %v2792_v11, %v2856_v15  ;;  %v2889_v47 = vsel %vm2825_vm9, %v2793_v43, %v2857_v55 }
 0x409   : > { %6016 = vpow2.f32 %v2305_v24  ;;  %v3491_v24 = vadd.f32 %v9962_v36, %v7712_v14  ;;  %vm2828_vm14 = vcmp.ge.f32.partialorder %v2796_v3, 0.0  ;;  %vm2829_vm15 = vcmp.ge.f32.partialorder %v2797_v48, 0.0 }
 0x40a   : > { %6018 = vpow2.f32 %v2307_v52  ;;  %v8243_v52 = vadd.f32 %v7228_v19, %v7872_v38  ;;  %v2861_v61 = vmul.f32 0.2, %v2797_v48  ;;  %vm3538_vm1 = vcmp.ge.f32.partialorder %v8205_v22, 0.0 }
 0x40b   : > { %5993 = vrot.lane.b32.xlu0 %v9973_v21, %s6457_s16  ;;  %5998 = vrot.lane.b32.xlu1 %v9974_v50, %s6459_s30  ;;  %v8247_v46 = vadd.f32 %v3583_v51, %v7536_v12  ;;  %v8250_v32 = vadd.f32 %v3584_v17, %v7538_v0  ;;  %v8253_v14 = vadd.f32 %v3585_v39, %v7491_v31  ;;  %vm2832_vm2 = vcmp.ge.f32.partialorder %v8159_v45, 0.0 }
 0x40c   : > { %v8256_v55 = vadd.f32 %v3586_v16, %v7497_v33  ;;  %v8262_v38 = vadd.f32 %v2890_v63, %v7648_v6  ;;  %v8265_v12 = vadd.f32 %v2891_v58, %v7659_v1  ;;  %v8268_v0 = vadd.f32 %v2888_v26, %v7491_v31 }
 0x40d   : > { %9975 = vst [vmem:[#allocation17_spill] sm:$0xff] %v8250_v32  ;;  %9976 = vst [vmem:[#allocation57_spill] sm:$0xff] %v8253_v14  ;;  %v8271_v39 = vadd.f32 %v2889_v47, %v7497_v33  ;;  %vm2833_vm3 = vcmp.ge.f32.partialorder %v8163_v9, 0.0  ;;  %v3570_v15 = vmul.f32 0.2, %v8205_v22  ;;  %v2892_v18 = vsel %vm2828_vm14, %v2796_v3, %v2860_v8 }
 0x40e   : > { %9977 = vst [vmem:[#allocation34_spill] sm:$0xff] %v8256_v55  ;;  %9978 = vst [vmem:[#allocation33_spill] sm:$0xff] %v8262_v38  ;;  %v3555_v11 = vmul.f32 0.2, %v3491_v24  ;;  %v3556_v30 = vmul.f32 0.2, %v3492_v56  ;;  %v2893_v5 = vsel %vm2829_vm15, %v2797_v48, %v2861_v61  ;;  %v3595_v31 = vsel %vm3531_vm5, %v8167_v7, %v8194_v41 }
 0x40f   : > { %6003 = vrot.lane.b32.xlu1 %v9973_v21, %s6459_s30  ;;  %9979 = vst [vmem:[#allocation60_spill] sm:$0xff] %v8265_v12  ;;  %9980 = vst [vmem:[#allocation65_spill] sm:$0xff] %v8268_v0  ;;  %vm3523_vm4 = vcmp.ge.f32.partialorder %v3491_v24, 0.0  ;;  %vm3524_vm6 = vcmp.ge.f32.partialorder %v3492_v56, 0.0  ;;  %vm2838_vm7 = vcmp.ge.f32.partialorder %v8218_v23, 0.0  ;;  %vm2839_vm9 = vcmp.ge.f32.partialorder %v8243_v52, 0.0 }
 0x410   : > { %9981 = vst [vmem:[#allocation70_spill] sm:$0xff] %v8271_v39  ;;  %v2870_v33 = vmul.f32 0.2, %v8218_v23  ;;  %v2871_v58 = vmul.f32 0.2, %v8243_v52  ;;  %v8294_v7 = vadd.f32 %v2892_v18, %v7559_v62  ;;  %v3596_v48 = vsel %vm3532_vm8, %v8174_v29, %v8197_v59 }
 0x411   : > { %v3587_v8 = vsel %vm3523_vm4, %v3491_v24, %v3555_v11  ;;  %v3588_v21 = vsel %vm3524_vm6, %v3492_v56, %v3556_v30  ;;  %v8303_v17 = vadd.f32 %v2893_v5, %v7561_v28  ;;  %v8306_v50 = vadd.f32 %v3595_v31, %v7841_v57  ;;  %v8361_v31 = vpop.permute.xlu1 %2767 }
 0x412   : > { %9982 = vst [vmem:[#allocation63_spill] sm:$0xff] %v8294_v7  ;;  %v3497_v63 = vadd.f32 %v9962_v36, %v7802_v4  ;;  %v3498_v26 = vadd.f32 %v9963_v49, %v7802_v4  ;;  %v3589_v59 = vsel %vm3525_vm11, %v8145_v54, %v8170_v35  ;;  %v3590_v29 = vsel %vm3526_vm12, %v8149_v44, %v8179_v53  ;;  %v9987_v35 = vld [vmem:[#allocation107_spill] sm:$0xff] }
 0x413   : > { %v8300_v51 = vpop.eup %6016  ;;  %9983 = vst [vmem:[#allocation64_spill] sm:$0xff] %v8303_v17  ;;  %9984 = vst [vmem:[#allocation55_spill] sm:$0xff] %v8306_v50  ;;  %v2798_v24 = vadd.f32 %v7231_v34, %v7819_v25  ;;  %v8325_v56 = vadd.f32 %v3596_v48, %v7843_v40  ;;  %v3601_v4 = vsel %vm3537_vm13, %v8201_v37, %v8214_v2 }
 0x414   : > { %v8308_v16 = vpop.eup %6018  ;;  %v2799_v54 = vadd.f32 %v7228_v19, %v7819_v25  ;;  %v3495_v44 = vadd.f32 %v9962_v36, %v9987_v35  ;;  %v3496_v53 = vadd.f32 %v9963_v49, %v9987_v35  ;;  %v8342_v61 = vadd.f32 %v3587_v8, %v7648_v6  ;;  %v8375_v35 = vpop.xlane.xlu0 %3648 }
 0x415   : > { %9985 = vst [vmem:[#allocation56_spill] sm:$0xff] %v8325_v56  ;;  %v8333_v47 = vadd.f32 %v8308_v16, %v8300_v51  ;;  %v8345_v11 = vadd.f32 %v3588_v21, %v7659_v1  ;;  %v8350_v37 = vadd.f32 %v3589_v59, %v7559_v62  ;;  %v8353_v25 = vadd.f32 %v3590_v29, %v7561_v28  ;;  %v9992_v21 = vld [vmem:[#allocation31_spill] sm:$0xff]  ;;  %v9993_v29 = vld [vmem:[#allocation32_spill] sm:$0xff]  ;;  %v8393_v3 = vpop.permute.xlu1 %3460 }
 0x416   : > { %9988 = vst [vmem:[#allocation6_spill] sm:$0xff] %v8342_v61  ;;  %vm3529_vm5 = vcmp.ge.f32.partialorder %v3497_v63, 0.0  ;;  %vm3530_vm8 = vcmp.ge.f32.partialorder %v3498_v26, 0.0  ;;  %v3602_v30 = vsel %vm3538_vm1, %v8205_v22, %v3570_v15  ;;  %v8359_v6 = vadd.f32 %v3601_v4, %v8041_v27  ;;  %v9991_v15 = vld [vmem:[#allocation113_spill] sm:$0xff] }
 0x417   : > { %9986 = vst [vmem:[#allocation5_spill] sm:$0xff] %v8333_v47  ;;  %9989 = vst [vmem:[#allocation107_spill] sm:$0xff] %v8345_v11  ;;  %v3561_v1 = vmul.f32 0.2, %v3497_v63  ;;  %v3562_v18 = vmul.f32 0.2, %v3498_v26  ;;  %v2896_v28 = vsel %vm2832_vm2, %v8159_v45, %v8188_v10  ;;  %v2897_v22 = vsel %vm2833_vm3, %v8163_v9, %v8191_v60 }
 0x418   : > { %9990 = vst [vmem:[#allocation127_spill] sm:$0xff] %v8359_v6  ;;  %v2862_v5 = vmul.f32 0.2, %v2798_v24  ;;  %v2863_v62 = vmul.f32 0.2, %v2799_v54  ;;  %vm2830_vm10 = vcmp.ge.f32.partialorder %v2798_v24, 0.0  ;;  %v2988_v59 = vsub.f32 %v9992_v21, %v9991_v15 }
 0x419   : > { %v3559_v48 = vmul.f32 0.2, %v3495_v44  ;;  %v3560_v8 = vmul.f32 0.2, %v3496_v53  ;;  %vm2831_vm11 = vcmp.ge.f32.partialorder %v2799_v54, 0.0  ;;  %vm3527_vm12 = vcmp.ge.f32.partialorder %v3495_v44, 0.0 }
 0x41a   : > { %vm3528_vm13 = vcmp.ge.f32.partialorder %v3496_v53, 0.0  ;;  %v2989_v4 = vsub.f32 %v9993_v29, %v9991_v15  ;;  %9994 = vst [vmem:[#allocation113_spill] sm:$0xff] %v8375_v35  ;;  %v2902_v45 = vsel %vm2838_vm7, %v8218_v23, %v2870_v33  ;;  %v2903_v9 = vsel %vm2839_vm9, %v8243_v52, %v2871_v58  ;;  %v9996_v21 = vld [vmem:[#allocation85_spill] sm:$0xff]  ;;  %v9999_v52 = vld [vmem:[#allocation86_spill] sm:$0xff] }
 0x41b   : > { %v3593_v10 = vsel %vm3529_vm5, %v3497_v63, %v3561_v1  ;;  %v3594_v60 = vsel %vm3530_vm8, %v3498_v26, %v3562_v18  ;;  %v8386_v2 = vadd.f32 %v3602_v30, %v8050_v42  ;;  %v8389_v41 = vadd.f32 %v2896_v28, %v9996_v21  ;;  %v9998_v23 = vld [vmem:[#allocation45_spill] sm:$0xff]  ;;  %v10003_v30 = vld [vmem:[#allocation24_spill] sm:$0xff]  ;;  %v10021_v47 = vld [vmem:[#allocation74_spill] sm:$0xff] }
 0x41c   : > { %v2894_v15 = vsel %vm2830_vm10, %v2798_v24, %v2862_v5  ;;  %v2895_v29 = vsel %vm2831_vm11, %v2799_v54, %v2863_v62  ;;  %v3591_v20 = vsel %vm3527_vm12, %v3495_v44, %v3559_v48  ;;  %v3592_v43 = vsel %vm3528_vm13, %v3496_v53, %v3560_v8  ;;  %v10001_v63 = vld [vmem:[#allocation25_spill] sm:$0xff]  ;;  %v10008_v5 = vld [vmem:[#allocation96_spill] sm:$0xff] }
 0x41d   : > { %9995 = vst [vmem:[#allocation31_spill] sm:$0xff] %v8386_v2  ;;  %9997 = vst [vmem:[#allocation32_spill] sm:$0xff] %v8389_v41  ;;  %v1660_v33 = vsub.f32 %v9998_v23, %v8059_v13  ;;  %v8396_v58 = vadd.f32 %v2897_v22, %v9999_v52  ;;  %v8399_v26 = vadd.f32 %v2902_v45, %v10001_v63  ;;  %v3022_v18 = vmul.f32 1.442695, %v2988_v59  ;;  %v10007_v44 = vld [vmem:[#allocation93_spill] sm:$0xff]  ;;  %v10012_v22 = vld [vmem:[#allocation46_spill] sm:$0xff] }
 0x41e   : > { %v8402_v1 = vadd.f32 %v2903_v9, %v10003_v30  ;;  %v3024_v28 = vmul.f32 1.442695, %v2989_v4  ;;  %v8405_v24 = vadd.f32 %v3593_v10, %v9996_v21  ;;  %v8408_v54 = vadd.f32 %v3594_v60, %v9999_v52  ;;  %v8424_v4 = vpop.xlane.xlu0 %1630  ;;  %v10014_v23 = vld [vmem:[#allocation67_spill] sm:$0xff]  ;;  %v10018_v9 = vld [vmem:[#allocation12_spill] sm:$0xff]  ;;  %v10020_v45 = vld [vmem:[#allocation73_spill] sm:$0xff] }
 0x41f   : > { %10000 = vst [vmem:[#allocation85_spill] sm:$0xff] %v8396_v58  ;;  %10002 = vst [vmem:[#allocation45_spill] sm:$0xff] %v8399_v26  ;;  %v8411_v53 = vadd.f32 %v2894_v15, %v10007_v44  ;;  %v8414_v62 = vadd.f32 %v2895_v29, %v10008_v5  ;;  %v8417_v48 = vadd.f32 %v3591_v20, %v10007_v44  ;;  %v1696_v60 = vmul.f32 1.442695, %v1660_v33  ;;  %v10013_v15 = vld [vmem:[#allocation66_spill] sm:$0xff]  ;;  %v10015_v33 = vld [vmem:[#allocation7_spill] sm:$0xff] }
 0x420   : > { %10004 = vst [vmem:[#allocation86_spill] sm:$0xff] %v8402_v1  ;;  %10005 = vst [vmem:[#allocation25_spill] sm:$0xff] %v8405_v24  ;;  %v8420_v8 = vadd.f32 %v3592_v43, %v10008_v5  ;;  %v1661_v59 = vsub.f32 %v10012_v22, %v8059_v13  ;;  %6020 = vpow2.f32 %v3022_v18  ;;  %v8444_v5 = vadd.f32 %v7231_v34, %v10015_v33  ;;  %v10016_v13 = vld [vmem:[#allocation37_spill] sm:$0xff]  ;;  %v10017_v18 = vld [vmem:[#allocation35_spill] sm:$0xff] }
 0x421   : > { %10006 = vst [vmem:[#allocation24_spill] sm:$0xff] %v8408_v54  ;;  %10009 = vst [vmem:[#allocation93_spill] sm:$0xff] %v8414_v62  ;;  %6022 = vpow2.f32 %v3024_v28  ;;  %v2986_v43 = vsub.f32 %v10017_v18, %v10016_v13  ;;  %v10019_v44 = vld [vmem:[#allocation40_spill] sm:$0xff]  ;;  %v10022_v22 = vld [vmem:[#allocation29_spill] sm:$0xff]  ;;  %v10024_v18 = vmax.f32 %v8247_v46, %v8250_v32  ;;  %vm4308_vm8 = vcmask 523264  }
 0x422   : > { %10010 = vst [vmem:[#allocation96_spill] sm:$0xff] %v8417_v48  ;;  %10011 = vst [vmem:[#allocation128_spill] sm:$0xff] %v8420_v8  ;;  %v1663_v28 = vsub.f32 %v10019_v44, %v10018_v9  ;;  %6024 = vpow2.f32 %v1696_v60  ;;  %v10023_v42 = vld [vmem:[#allocation48_spill] sm:$0xff]  ;;  %v10027_v58 = vld [vmem:[#allocation9_spill] sm:$0xff]  ;;  %vm2836_vm14 = vcmp.ge.f32.partialorder %v8444_v5, 0.0  ;;  %vm4325_vm10 = vcmask 785408  }
 0x423   : > { %v2262_v27 = vsub.f32 %v10023_v42, %v10022_v22  ;;  %v3501_v60 = vadd.f32 %v9962_v36, %v10027_v58 }
 0x424   : > { %v1702_v41 = vmul.f32 1.442695, %v1663_v28 }
 0x425   : > { %v1613_v20 = vpop.xlane.xlu1 %1612  ;;  %vm3533_vm15 = vcmp.ge.f32.partialorder %v3501_v60, 0.0 }
 0x426   : > { %v1658_v29 = vsub.f32 %v10013_v15, %v1613_v20  ;;  %v1659_v52 = vsub.f32 %v10014_v23, %v1613_v20  ;;  %v1698_v15 = vmul.f32 1.442695, %v1661_v59  ;;  %v2229_v23 = vpop.xlane.xlu0 %2228  ;;  %v10025_v59 = vld [vmem:[#allocation68_spill] sm:$0xff] }
 0x427   : > { %v2269_v35 = vsub.f32 %v10020_v45, %v2229_v23  ;;  %v2270_v1 = vsub.f32 %v10021_v47, %v2229_v23  ;;  %v10028_v47 = vld [vmem:[#allocation39_spill] sm:$0xff] }
 0x428   : > { %v1692_v10 = vmul.f32 1.442695, %v1658_v29  ;;  %v1694_v20 = vmul.f32 1.442695, %v1659_v52  ;;  %v10026_v52 = vld [vmem:[#allocation69_spill] sm:$0xff]  ;;  %v1662_v23 = vsub.f32 %v10028_v47, %v10018_v9 }
 0x429   : > { %v2214_v26 = vpop.xlane.xlu1 %2213  ;;  %v2313_v45 = vmul.f32 1.442695, %v2269_v35  ;;  %v2315_v44 = vmul.f32 1.442695, %v2270_v1  ;;  %v8475_v35 = vadd.f32 %v7228_v19, %v10015_v33  ;;  %v10030_v1 = vld [vmem:[#allocation18_spill] sm:$0xff] }
 0x42a   : > { %6026 = vpow2.f32 %v1692_v10  ;;  %3654 = vmax.xlane.f32.xlu0 %v10024_v18  ;;  %v2259_v29 = vsub.f32 %v10025_v59, %v2214_v26  ;;  %v2260_v21 = vsub.f32 %v10026_v52, %v2214_v26  ;;  %v3502_v18 = vadd.f32 %v9963_v49, %v10027_v58  ;;  %v10029_v59 = vld [vmem:[#allocation47_spill] sm:$0xff]  ;;  %v8484_v28 = vpop.eup %6020 }
 0x42b   : > { %6028 = vpow2.f32 %v1694_v20  ;;  %v2261_v32 = vsub.f32 %v10029_v59, %v10022_v22  ;;  %v10031_v20 = vld [vmem:[#allocation42_spill] sm:$0xff]  ;;  %v2868_v58 = vmul.f32 0.2, %v8444_v5  ;;  %v3018_v22 = vmul.f32 1.442695, %v2986_v43  ;;  %v8486_v52 = vpop.eup %6022 }
 0x42c   : > { %6030 = vpow2.f32 %v1698_v15  ;;  %v2293_v42 = vmul.f32 1.442695, %v2259_v29  ;;  %v2295_v10 = vmul.f32 1.442695, %v2260_v21  ;;  %v2264_v9 = vsub.f32 %v10031_v20, %v10030_v1  ;;  %v10034_v20 = vld [vmem:[#allocation38_spill] sm:$0xff] }
 0x42d   : > { %6032 = vpow2.f32 %v2313_v45  ;;  %v8471_v26 = vpop.xlane.xlu1 %3639  ;;  %v2299_v15 = vmul.f32 1.442695, %v2262_v27  ;;  %v10032_v21 = vmax.f32 %v8253_v14, %v8256_v55  ;;  %v1700_v29 = vmul.f32 1.442695, %v1662_v23  ;;  %v10033_v45 = vld [vmem:[#allocation41_spill] sm:$0xff] }
 0x42e   : > { %6034 = vpow2.f32 %v2315_v44  ;;  %v3565_v33 = vmul.f32 0.2, %v3501_v60  ;;  %v3566_v27 = vmul.f32 0.2, %v3502_v18  ;;  %v2263_v44 = vsub.f32 %v10033_v45, %v10030_v1 }
 0x42f   : > { %3657 = vmax.xlane.f32.xlu0 %v10032_v21  ;;  %6036 = vpow2.f32 %v2293_v42  ;;  %v2297_v47 = vmul.f32 1.442695, %v2261_v32  ;;  %v2987_v43 = vsub.f32 %v10034_v20, %v10016_v13  ;;  %vm3534_vm1 = vcmp.ge.f32.partialorder %v3502_v18, 0.0 }
 0x430   : > { %6038 = vpow2.f32 %v2295_v10  ;;  %v2303_v42 = vmul.f32 1.442695, %v2264_v9  ;;  %v10035_v23 = vmax.f32 %v8262_v38, %v8265_v12  ;;  %v8497_v10 = vpop.eup %6024  ;;  %vm2837_vm2 = vcmp.ge.f32.partialorder %v8475_v35, 0.0  ;;  %v10036_v9 = vld [vmem:[#allocation14_spill] sm:$0xff]  ;;  %v10040_v38 = vld [vmem:[#allocation11_spill] sm:$0xff] }
 0x431   : > { %6040 = vpow2.f32 %v1702_v41  ;;  %v8490_v59 = vpop.xlane.xlu1 %3636  ;;  %v3503_v32 = vadd.f32 %v9962_v36, %v8393_v3  ;;  %v3504_v41 = vadd.f32 %v9963_v49, %v8393_v3  ;;  %v2869_v13 = vmul.f32 0.2, %v8475_v35 }
 0x432   : > { %6042 = vpow2.f32 %v2299_v15  ;;  %v10037_v15 = vld [vmem:[#allocation43_spill] sm:$0xff]  ;;  %v10038_v45 = vmax.f32 %v8268_v0, %v8271_v39  ;;  %v2301_v36 = vmul.f32 1.442695, %v2263_v44 }
 0x433   : > { %2963 = vmax.xlane.f32.xlu0 %v10035_v23  ;;  %6044 = vpow2.f32 %v3018_v22  ;;  %v3689_v21 = vsub.f32 %v10037_v15, %v10036_v9  ;;  %v3597_v22 = vsel %vm3533_vm15, %v3501_v60, %v3565_v33  ;;  %v10039_v23 = vld [vmem:[#allocation44_spill] sm:$0xff]  ;;  %v3020_v15 = vmul.f32 1.442695, %v2987_v43 }
 0x434   : > { %v8504_v1 = vpop.eup %6026  ;;  %6046 = vpow2.f32 %v1700_v29  ;;  %2960 = vmax.xlane.f32.xlu1 %v10038_v45  ;;  %v3690_v49 = vsub.f32 %v10039_v23, %v10036_v9  ;;  %v3598_v29 = vsel %vm3534_vm1, %v3502_v18, %v3566_v27  ;;  %v8524_v45 = vadd.f32 %v7231_v34, %v10040_v38  ;;  %v10042_v18 = vld [vmem:[#allocation16_spill] sm:$0xff]  ;;  %v10043_v27 = vld [vmem:[#allocation49_spill] sm:$0xff]  ;;  %v10044_v9 = vld [vmem:[#allocation110_spill] sm:$0xff] }
 0x435   : > { %v8513_v20 = vpop.eup %6028  ;;  %6048 = vpow2.f32 %v2297_v47  ;;  %v8517_v3 = vpop.xlane.xlu1 %2948  ;;  %v10041_v60 = vmax.f32 %v8342_v61, %v8345_v11  ;;  %v2900_v33 = vsel %vm2836_vm14, %v8444_v5, %v2868_v58  ;;  %v3687_v47 = vsub.f32 %v10043_v27, %v10042_v18  ;;  %v10047_v58 = vld [vmem:[#allocation114_spill] sm:$0xff] }
 0x436   : > { %v8520_v12 = vpop.eup %6030  ;;  %6050 = vpow2.f32 %v2303_v42  ;;  %1885 = vmatprep.mubr.f32.mxu0 %v8513_v20  ;;  %v3567_v43 = vmul.f32 0.2, %v3503_v32  ;;  %v3568_v42 = vmul.f32 0.2, %v3504_v41  ;;  %v8539_v23 = vadd.f32 %v3597_v22, %v10044_v9  ;;  %v10049_v22 = vld [vmem:[#allocation50_spill] sm:$0xff] }
 0x437   : > { %3660 = vmax.xlane.f32.xlu0 %v10041_v60  ;;  %v8533_v44 = vpop.eup %6032  ;;  %1886 = vmatmul.mubr.f32.gmra.mrb[56].mxu0 %v8504_v1  ;;  %v3727_v60 = vmul.f32 1.442695, %v3689_v21  ;;  %vm3535_vm3 = vcmp.ge.f32.partialorder %v3503_v32, 0.0  ;;  %vm3536_vm4 = vcmp.ge.f32.partialorder %v3504_v41, 0.0  ;;  %v10046_v5 = vmax.f32 %v8405_v24, %v8408_v54 }
 0x438   : > { %10045 = vst [vmem:[#allocation46_spill] sm:$0xff] %v8539_v23  ;;  %v8541_v11 = vpop.eup %6034  ;;  %1890 = vmatprep.mubr.f32.mxu0 %v8520_v12  ;;  %v8548_v27 = vadd.f32 %v3598_v29, %v10047_v58  ;;  %6052 = vpow2.f32 %v2301_v36  ;;  %v3729_v39 = vmul.f32 1.442695, %v3690_v49  ;;  %v3688_v0 = vsub.f32 %v10049_v22, %v10042_v18 }
 0x439   : > { %3669 = vmax.xlane.f32.xlu1 %v10046_v5  ;;  %v8550_v61 = vpop.eup %6036  ;;  %v8554_v55 = vpop.xlane.xlu1 %2945  ;;  %v8558_v21 = vadd.f32 %v8541_v11, %v8533_v44  ;;  %6054 = vpow2.f32 %v3020_v15  ;;  %v2803_v29 = vadd.f32 %v7228_v19, %v10040_v38  ;;  %v10050_v5 = vmax.f32 %v8294_v7, %v8303_v17  ;;  %v10062_v7 = vld [vmem:[#allocation52_spill] sm:$0xff] }
 0x43a   : > { %10048 = vst [vmem:[#allocation66_spill] sm:$0xff] %v8548_v27  ;;  %v8560_v54 = vpop.eup %6038  ;;  %v2901_v36 = vsel %vm2837_vm2, %v8475_v35, %v2869_v13  ;;  %v8571_v49 = vadd.f32 %v2900_v33, %v10044_v9  ;;  %vm2834_vm6 = vcmp.ge.f32.partialorder %v8524_v45, 0.0  ;;  %v3723_v22 = vmul.f32 1.442695, %v3687_v47  ;;  %v10052_v13 = vld [vmem:[#allocation71_spill] sm:$0xff] }
 0x43b   : > { %2966 = vmax.xlane.f32.xlu0 %v10050_v5  ;;  %v8573_v18 = vpop.eup %6040  ;;  %2614 = vmatprep.mubr.f32.mxu1 %v8560_v54  ;;  %v3599_v38 = vsel %vm3535_vm3, %v3503_v32, %v3567_v43  ;;  %v3600_v15 = vsel %vm3536_vm4, %v3504_v41, %v3568_v42  ;;  %v2866_v35 = vmul.f32 0.2, %v8524_v45  ;;  %6056 = vpow2.f32 %v3727_v60  ;;  %v10054_v43 = vld [vmem:[#allocation30_spill] sm:$0xff]  ;;  %v10055_v42 = vld [vmem:[#allocation51_spill] sm:$0xff]  ;;  %v10056_v60 = vld [vmem:[#allocation72_spill] sm:$0xff] }
 0x43c   : > { %10051 = vst [vmem:[#allocation67_spill] sm:$0xff] %v8571_v49  ;;  %1891 = vmatmul.mubr.f32.gmra.mrb[58].mxu0 %v8497_v10  ;;  %v8580_v5 = vpop.eup %6042  ;;  %v3685_v33 = vsub.f32 %v10052_v13, %v8471_v26  ;;  %v10053_v9 = vmax.f32 %v8306_v50, %v8325_v56  ;;  %2615 = vmatmul.mubr.f32.gmra.mrb[44].mxu1 %v8550_v61  ;;  %6058 = vpow2.f32 %v3729_v39  ;;  %v3725_v41 = vmul.f32 1.442695, %v3688_v0  ;;  %v10059_v0 = vld [vmem:[#allocation84_spill] sm:$0xff] }
 0x43d   : > { %v3674_v47 = vmax.f32 %v8539_v23, %v8548_v27  ;;  %v8591_v32 = vpop.eup %6044  ;;  %v1666_v24 = vsub.f32 %v10055_v42, %v10054_v43  ;;  %v3686_v17 = vsub.f32 %v10056_v60, %v8471_v26  ;;  %1895 = vmatprep.mubr.f32.mxu0 %v8573_v18  ;;  %2619 = vmatprep.mubr.f32.mxu1 %v8580_v5  ;;  %v2226_v13 = vpop.xlane.xlu1 %2225  ;;  %v10058_v27 = vld [vmem:[#allocation83_spill] sm:$0xff]  ;;  %vm2835_vm7 = vcmp.ge.f32.partialorder %v2803_v29, 0.0 }
 0x43e   : > { %3672 = vmax.xlane.f32.xlu1 %v10053_v9  ;;  %v8599_v9 = vpop.eup %6046  ;;  %v10057_v23 = vmax.f32 %v8350_v37, %v8353_v25  ;;  %v2267_v39 = vsub.f32 %v10058_v27, %v2226_v13  ;;  %v2268_v56 = vsub.f32 %v10059_v0, %v2226_v13  ;;  %v8607_v42 = vadd.f32 %v3599_v38, %v10001_v63  ;;  %v10063_v27 = vld [vmem:[#allocation61_spill] sm:$0xff]  ;;  %v8621_v38 = vpop.xlane.xlu0 %1636 }
 0x43f   : > { %v8610_v26 = vadd.f32 %v3600_v15, %v10003_v30  ;;  %v8612_v60 = vpop.eup %6048  ;;  %v2867_v50 = vmul.f32 0.2, %v2803_v29  ;;  %6060 = vpow2.f32 %v3723_v22  ;;  %v1667_v14 = vsub.f32 %v10062_v7, %v10054_v43  ;;  %v10064_v22 = vld [vmem:[#allocation62_spill] sm:$0xff] }
 0x440   : > { %3663 = vmax.xlane.f32.xlu0 %v10057_v23  ;;  %10060 = vst [vmem:[#allocation7_spill] sm:$0xff] %v8607_v42  ;;  %1896 = vmatmul.mubr.f32.gmra.mrb[60].mxu0 %v8599_v9  ;;  %v8617_v23 = vpop.eup %6050  ;;  %v1670_v13 = vsub.f32 %v10063_v27, %v8424_v4  ;;  %v3719_v63 = vmul.f32 1.442695, %v3685_v33  ;;  %v2309_v30 = vmul.f32 1.442695, %v2267_v39  ;;  %6062 = vpow2.f32 %v3725_v41 }
 0x441   : > { %10061 = vst [vmem:[#allocation37_spill] sm:$0xff] %v8610_v26  ;;  %v2311_v15 = vmul.f32 1.442695, %v2268_v56  ;;  %2620 = vmatmul.mubr.f32.gmra.mrb[46].mxu1 %v8612_v60  ;;  %v1671_v0 = vsub.f32 %v10064_v22, %v8424_v4  ;;  %v3721_v7 = vmul.f32 1.442695, %v3686_v17  ;;  %v8627_v43 = vpop.xlane.xlu1 %2954  ;;  %v2898_v33 = vsel %vm2834_vm6, %v8524_v45, %v2866_v35 }
 0x442   : > { %3675 = vmax.xlane.f32.xlu1 %v3674_v47  ;;  %2624 = vmatprep.mubr.f32.mxu1 %v8617_v23  ;;  %v1708_v27 = vmul.f32 1.442695, %v1666_v24  ;;  %6064 = vpow2.f32 %v2309_v30  ;;  %v10065_v56 = vmax.f32 %v8411_v53, %v8414_v62  ;;  %v3677_v47 = vmax.f32 %v8607_v42, %v8610_v26  ;;  %v8640_v17 = vpop.eup %6052  ;;  %v10067_v30 = vld [vmem:[#allocation77_spill] sm:$0xff] }
 0x443   : > { %v8638_v4 = vadd.f32 %v2901_v36, %v10047_v58  ;;  %v8644_v41 = vadd.f32 %v7231_v34, %v8361_v31  ;;  %v1710_v39 = vmul.f32 1.442695, %v1667_v14  ;;  %6066 = vpow2.f32 %v2311_v15  ;;  %v8647_v45 = vpop.eup %6054  ;;  %v10086_v26 = vld [vmem:[#allocation101_spill] sm:$0xff] }
 0x444   : > { %2969 = vmax.xlane.f32.xlu0 %v10065_v56  ;;  %v2899_v24 = vsel %vm2835_vm7, %v2803_v29, %v2867_v50  ;;  %v1716_v35 = vmul.f32 1.442695, %v1670_v13  ;;  %6068 = vpow2.f32 %v3719_v63  ;;  %v1674_v22 = vsub.f32 %v10067_v30, %v8621_v38  ;;  %v8651_v56 = vpop.xlane.xlu0 %2234  ;;  %v10069_v50 = vld [vmem:[#allocation79_spill] sm:$0xff]  ;;  %v10070_v63 = vld [vmem:[#allocation80_spill] sm:$0xff] }
 0x445   : > { %10066 = vst [vmem:[#allocation35_spill] sm:$0xff] %v8638_v4  ;;  %2625 = vmatmul.mubr.f32.gmra.mrb[48].mxu1 %v8640_v17  ;;  %v8655_v58 = vadd.f32 %v2898_v33, %v7841_v57  ;;  %v2809_v34 = vadd.f32 %v7228_v19, %v8361_v31  ;;  %v1718_v14 = vmul.f32 1.442695, %v1671_v0  ;;  %6070 = vpow2.f32 %v3721_v7  ;;  %v1622_v36 = vpop.xlane.xlu1 %1621  ;;  %v8662_v13 = vpop.eup %6056  ;;  %v10072_v33 = vld [vmem:[#allocation89_spill] sm:$0xff]  ;;  %v10073_v31 = vld [vmem:[#allocation92_spill] sm:$0xff] }
 0x446   : > { %3678 = vmax.xlane.f32.xlu1 %v3677_v47  ;;  %v2992_v29 = vsub.f32 %v10069_v50, %v8517_v3  ;;  %2629 = vmatprep.mubr.f32.mxu1 %v8308_v16  ;;  %6072 = vpow2.f32 %v1708_v27  ;;  %v2993_v15 = vsub.f32 %v10070_v63, %v8517_v3  ;;  %v10071_v57 = vmax.f32 %v8417_v48, %v8420_v8  ;;  %v8671_v7 = vpop.eup %6058  ;;  %v10074_v16 = vld [vmem:[#allocation91_spill] sm:$0xff] }
 0x447   : > { %10068 = vst [vmem:[#allocation12_spill] sm:$0xff] %v8655_v58  ;;  %v1664_v19 = vsub.f32 %v10072_v33, %v1622_v36  ;;  %v1665_v0 = vsub.f32 %v10073_v31, %v1622_v36  ;;  %vm2840_vm9 = vcmp.ge.f32.partialorder %v8644_v41, 0.0  ;;  %6074 = vpow2.f32 %v1710_v39 }
 0x448   : > { %3666 = vmax.xlane.f32.xlu0 %v10071_v57  ;;  %v2274_v47 = vsub.f32 %v10074_v16, %v8651_v56  ;;  %v8677_v27 = vadd.f32 %v2899_v24, %v7843_v40  ;;  %6076 = vpow2.f32 %v1716_v35  ;;  %v1724_v3 = vmul.f32 1.442695, %v1674_v22  ;;  %v10077_v35 = vld [vmem:[#allocation32_spill] sm:$0xff]  ;;  %v10078_v22 = vld [vmem:[#allocation85_spill] sm:$0xff] }
 0x449   : > { %v10076_v30 = vmax.f32 %v8359_v6, %v8386_v2  ;;  %v1704_v50 = vmul.f32 1.442695, %v1664_v19  ;;  %v1706_v63 = vmul.f32 1.442695, %v1665_v0  ;;  %2630 = vmatmul.mubr.f32.gmra.mrb[50].mxu1 %v8300_v51  ;;  %v8683_v36 = vpop.eup %6060  ;;  %vm2841_vm5 = vcmp.ge.f32.partialorder %v2809_v34, 0.0  ;;  %v8686_v33 = vpop.xlane.xlu1 %2951 }
 0x44a   : > { %10075 = vst [vmem:[#allocation40_spill] sm:$0xff] %v8677_v27  ;;  %v2872_v39 = vmul.f32 0.2, %v8644_v41  ;;  %6078 = vpow2.f32 %v1718_v14  ;;  %v3030_v57 = vmul.f32 1.442695, %v2992_v29  ;;  %v10079_v31 = vmax.f32 %v10077_v35, %v10078_v22  ;;  %v1643_v51 = vpop.xlane.xlu0 %1642  ;;  %v8693_v0 = vpop.eup %6062  ;;  %v10081_v29 = vld [vmem:[#allocation98_spill] sm:$0xff] }
 0x44b   : > { %3681 = vmax.xlane.f32.xlu1 %v10076_v30  ;;  %v2873_v40 = vmul.f32 0.2, %v2809_v34  ;;  %v3032_v24 = vmul.f32 1.442695, %v2993_v15  ;;  %6080 = vpow2.f32 %v1704_v50  ;;  %v2356_v19 = vadd.f32 %v8560_v54, %v8550_v61  ;;  %v10080_v30 = vld [vmem:[#allocation97_spill] sm:$0xff]  ;;  %v10114_v22 = vld [vmem:[#allocation119_spill] sm:$0xff] }
 0x44c   : > { %2972 = vmax.xlane.f32.xlu0 %v10079_v31  ;;  %v2323_v16 = vmul.f32 1.442695, %v2274_v47  ;;  %6082 = vpow2.f32 %v1706_v63  ;;  %v1678_v14 = vsub.f32 %v10080_v30, %v1643_v51  ;;  %v1679_v6 = vsub.f32 %v10081_v29, %v1643_v51  ;;  %v8697_v2 = vpop.eup %6064  ;;  %v10082_v51 = vld [vmem:[#allocation100_spill] sm:$0xff]  ;;  %v10083_v29 = vld [vmem:[#allocation102_spill] sm:$0xff] }
 0x44d   : > { %6084 = vpow2.f32 %v1724_v3  ;;  %v2974_v15 = vmax.f32 %v8655_v58, %v8677_v27  ;;  %v3085_v50 = vadd.f32 %v8486_v52, %v8484_v28  ;;  %v2977_v61 = vmax.f32 %v8571_v49, %v8638_v4  ;;  %v8705_v54 = vpop.eup %6066  ;;  %v2232_v31 = vpop.xlane.xlu1 %2231 }
 0x44e   : > { %6086 = vpow2.f32 %v3030_v57  ;;  %v1732_v47 = vmul.f32 1.442695, %v1678_v14  ;;  %v1734_v63 = vmul.f32 1.442695, %v1679_v6  ;;  %v2904_v3 = vsel %vm2840_vm9, %v8644_v41, %v2872_v39  ;;  %2634 = vmatprep.mubr.f32.mxu1 %v8705_v54  ;;  %v2241_v4 = vpop.xlane.xlu0 %2240  ;;  %v10084_v6 = vld [vmem:[#allocation75_spill] sm:$0xff] }
 0x44f   : > { %2357 = vadd.xlane.f32.xlu1 %v2356_v19  ;;  %v8710_v19 = vpop.eup %6068  ;;  %6088 = vpow2.f32 %v3032_v24  ;;  %v2271_v30 = vsub.f32 %v10082_v51, %v2232_v31  ;;  %v2272_v42 = vsub.f32 %v10083_v29, %v2232_v31  ;;  %v2905_v57 = vsel %vm2841_vm5, %v2809_v34, %v2873_v40  ;;  %v10085_v41 = vld [vmem:[#allocation99_spill] sm:$0xff]  ;;  %2635 = vmatmul.mubr.f32.gmra.mrb[52].mxu1 %v8697_v2  ;;  %v10087_v31 = vld [vmem:[#allocation90_spill] sm:$0xff] }
 0x450   : > { %2975 = vmax.xlane.f32.xlu0 %v2974_v15  ;;  %v8716_v14 = vpop.eup %6070  ;;  %v3683_v49 = vsub.f32 %v10084_v6, %v8490_v59  ;;  %6090 = vpow2.f32 %v2323_v16  ;;  %v2277_v39 = vsub.f32 %v10085_v41, %v2241_v4  ;;  %v2278_v24 = vsub.f32 %v10086_v26, %v2241_v4  ;;  %2639 = vmatprep.mubr.f32.mxu1 %v8541_v11  ;;  %v10088_v16 = vld [vmem:[#allocation76_spill] sm:$0xff] }
 0x451   : > { %v8723_v15 = vpop.eup %6072  ;;  %v2273_v51 = vsub.f32 %v10087_v31, %v8651_v56  ;;  %6092 = vpow2.f32 %v1732_v47  ;;  %v2317_v34 = vmul.f32 1.442695, %v2271_v30  ;;  %v2319_v40 = vmul.f32 1.442695, %v2272_v42  ;;  %v1628_v41 = vpop.xlane.xlu1 %1627  ;;  %v10090_v47 = vld [vmem:[#allocation104_spill] sm:$0xff]  ;;  %v10091_v31 = vld [vmem:[#allocation78_spill] sm:$0xff] }
 0x452   : > { %v8728_v29 = vpop.eup %6074  ;;  %v3684_v6 = vsub.f32 %v10088_v16, %v8490_v59  ;;  %6094 = vpow2.f32 %v1734_v63  ;;  %v2329_v26 = vmul.f32 1.442695, %v2277_v39  ;;  %v2331_v4 = vmul.f32 1.442695, %v2278_v24  ;;  %v10092_v63 = vld [vmem:[#allocation21_spill] sm:$0xff]  ;;  %v10094_v24 = vld [vmem:[#allocation23_spill] sm:$0xff] }
 0x453   : > { %3086 = vadd.xlane.f32.xlu1 %v3085_v50  ;;  %v8732_v27 = vpop.eup %6076  ;;  %6096 = vpow2.f32 %v2317_v34  ;;  %v3782_v56 = vadd.f32 %v8716_v14, %v8710_v19  ;;  %v10089_v50 = vld [vmem:[#allocation103_spill] sm:$0xff]  ;;  %v1669_v11 = vsub.f32 %v10090_v47, %v1628_v41  ;;  %v1675_v59 = vsub.f32 %v10091_v31, %v8621_v38  ;;  %2640 = vmatmul.mubr.f32.gmra.mrb[54].mxu1 %v8533_v44  ;;  %v10096_v38 = vld [vmem:[#allocation81_spill] sm:$0xff] }
 0x454   : > { %2978 = vmax.xlane.f32.xlu0 %v2977_v61  ;;  %v1668_v42 = vsub.f32 %v10089_v50, %v1628_v41  ;;  %v8738_v30 = vpop.eup %6078  ;;  %6098 = vpow2.f32 %v2319_v40  ;;  %v8744_v39 = vadd.f32 %v2904_v3, %v10092_v63  ;;  %v8747_v61 = vadd.f32 %v2905_v57, %v10094_v24  ;;  %v10097_v31 = vld [vmem:[#allocation45_spill] sm:$0xff]  ;;  %v10098_v63 = vld [vmem:[#allocation86_spill] sm:$0xff] }
 0x455   : > { %v8749_v34 = vpop.eup %6080  ;;  %v2321_v16 = vmul.f32 1.442695, %v2273_v51  ;;  %6100 = vpow2.f32 %v2329_v26  ;;  %v1714_v50 = vmul.f32 1.442695, %v1669_v11  ;;  %v3715_v58 = vmul.f32 1.442695, %v3683_v49  ;;  %v8755_v44 = vpop.xlane.xlu1 %2957 }
 0x456   : > { %10093 = vst [vmem:[#allocation73_spill] sm:$0xff] %v8744_v39  ;;  %10095 = vst [vmem:[#allocation74_spill] sm:$0xff] %v8747_v61  ;;  %v1712_v41 = vmul.f32 1.442695, %v1668_v42  ;;  %v8751_v47 = vpop.eup %6082  ;;  %v2990_v40 = vsub.f32 %v10096_v38, %v8554_v55  ;;  %6102 = vpow2.f32 %v2331_v4  ;;  %v3717_v57 = vmul.f32 1.442695, %v3684_v6 }
 0x457   : > { %3783 = vadd.xlane.f32.xlu1 %v3782_v56  ;;  %v8757_v3 = vpop.eup %6084  ;;  %v10099_v51 = vmax.f32 %v10097_v31, %v10098_v63  ;;  %1900 = vmatprep.mubr.f32.mxu0 %v8751_v47  ;;  %v1726_v56 = vmul.f32 1.442695, %v1675_v59  ;;  %v10100_v4 = vld [vmem:[#allocation87_spill] sm:$0xff]  ;;  %v2983_v11 = vmax.f32 %v8744_v39, %v8747_v61  ;;  %v10104_v61 = vld [vmem:[#allocation109_spill] sm:$0xff] }
 0x458   : > { %6104 = vpow2.f32 %v1712_v41  ;;  %v8763_v26 = vpop.eup %6086  ;;  %1901 = vmatmul.mubr.f32.gmra.mrb[62].mxu0 %v8749_v34  ;;  %v2996_v42 = vsub.f32 %v10100_v4, %v8627_v43  ;;  %v10101_v6 = vld [vmem:[#allocation19_spill] sm:$0xff]  ;;  %v3026_v59 = vmul.f32 1.442695, %v2990_v40  ;;  %v10102_v41 = vld [vmem:[#allocation88_spill] sm:$0xff] }
 0x459   : > { %2981 = vmax.xlane.f32.xlu0 %v10099_v51  ;;  %6106 = vpow2.f32 %v1714_v50  ;;  %v8766_v49 = vpop.eup %6088  ;;  %1905 = vmatprep.mubr.f32.mxu0 %v8728_v29  ;;  %v2997_v50 = vsub.f32 %v10102_v41, %v8627_v43  ;;  %v2238_v38 = vpop.xlane.xlu1 %2237  ;;  %v10103_v4 = vld [vmem:[#allocation108_spill] sm:$0xff]  ;;  %v1755_v43 = vadd.f32 %v8513_v20, %v8504_v1  ;;  %v10107_v20 = vld [vmem:[#allocation111_spill] sm:$0xff] }
 0x45a   : > { %6108 = vpow2.f32 %v2321_v16  ;;  %v8774_v24 = vpop.eup %6090  ;;  %v2362_v16 = vadd.f32 %v8640_v17, %v8617_v23  ;;  %v2276_v39 = vsub.f32 %v10104_v61, %v2238_v38  ;;  %v3038_v40 = vmul.f32 1.442695, %v2996_v42  ;;  %v10106_v61 = vld [vmem:[#allocation82_spill] sm:$0xff]  ;;  %v10108_v42 = vld [vmem:[#allocation112_spill] sm:$0xff] }
 0x45b   : > { %1753 = vadd.xlane.f32.xlu1 %v10101_v6  ;;  %6110 = vpow2.f32 %v3715_v58  ;;  %v8778_v51 = vpop.eup %6092  ;;  %v2275_v6 = vsub.f32 %v10103_v4, %v2238_v38  ;;  %v3040_v41 = vmul.f32 1.442695, %v2997_v50  ;;  %v3091_v1 = vadd.f32 %v8766_v49, %v8763_v26 }
 0x45c   : > { %6112 = vpow2.f32 %v3717_v57  ;;  %v8784_v63 = vpop.eup %6094  ;;  %1906 = vmatmul.mubr.f32.gmra.mrb[64].mxu0 %v8723_v15 }
 0x45d   : > { %2984 = vmax.xlane.f32.xlu0 %v2983_v11  ;;  %6114 = vpow2.f32 %v1726_v56  ;;  %v8789_v58 = vpop.eup %6096  ;;  %v2325_v57 = vmul.f32 1.442695, %v2275_v6  ;;  %v2327_v11 = vmul.f32 1.442695, %v2276_v39  ;;  %v8793_v23 = vadd.f32 %v8784_v63, %v8778_v51  ;;  %v1634_v38 = vpop.xlane.xlu1 %1633 }
 0x45e   : > { %v8795_v17 = vpop.eup %6098  ;;  %v2991_v56 = vsub.f32 %v10106_v61, %v8554_v55  ;;  %6116 = vpow2.f32 %v3026_v59  ;;  %v1672_v39 = vsub.f32 %v10107_v20, %v1634_v38 }
 0x45f   : > { %2363 = vadd.xlane.f32.xlu1 %v2362_v16  ;;  %10105 = vst [vmem:[#allocation29_spill] sm:$0xff] %v8793_v23  ;;  %v8799_v4 = vpop.eup %6100  ;;  %6118 = vpow2.f32 %v2325_v57  ;;  %v1673_v16 = vsub.f32 %v10108_v42, %v1634_v38  ;;  %2644 = vmatprep.mubr.f32.mxu1 %v8795_v17  ;;  %v3788_v38 = vadd.f32 %v8671_v7, %v8662_v13  ;;  %v10112_v42 = vld [vmem:[#allocation116_spill] sm:$0xff] }
 0x460   : > { %v8806_v6 = vpop.eup %6102  ;;  %6120 = vpow2.f32 %v2327_v11  ;;  %2645 = vmatmul.mubr.f32.gmra.mrb[56].mxu1 %v8789_v58  ;;  %v1720_v59 = vmul.f32 1.442695, %v1672_v39  ;;  %v3028_v61 = vmul.f32 1.442695, %v2991_v56 }
 0x461   : > { %1756 = vadd.xlane.f32.xlu0 %v1755_v43  ;;  %6122 = vpow2.f32 %v3038_v40  ;;  %v1722_v50 = vmul.f32 1.442695, %v1673_v16  ;;  %2649 = vmatprep.mubr.f32.mxu1 %v8774_v24  ;;  %v8812_v43 = vadd.f32 %v8806_v6, %v8799_v4  ;;  %v2244_v11 = vpop.xlane.xlu1 %2243  ;;  %v10110_v40 = vld [vmem:[#allocation20_spill] sm:$0xff] }
 0x462   : > { %v6105_v55 = vpop.eup %6104  ;;  %6124 = vpow2.f32 %v3040_v41  ;;  %v2280_v16 = vsub.f32 %v10112_v42, %v2244_v11  ;;  %v1649_v56 = vpop.xlane.xlu0 %1648  ;;  %v3082_v41 = vadd.f32 %v8647_v45, %v8591_v32  ;;  %v10115_v42 = vld [vmem:[#allocation120_spill] sm:$0xff] }
 0x463   : > { %3092 = vadd.xlane.f32.xlu1 %v3091_v1  ;;  %10109 = vst [vmem:[#allocation48_spill] sm:$0xff] %v8812_v43  ;;  %v6107_v57 = vpop.eup %6106  ;;  %6126 = vpow2.f32 %v1720_v59  ;;  %v10111_v1 = vld [vmem:[#allocation115_spill] sm:$0xff] }
 0x464   : > { %v8816_v20 = vpop.eup %6108  ;;  %v2279_v39 = vsub.f32 %v10111_v1, %v2244_v11  ;;  %1910 = vmatprep.mubr.f32.mxu0 %v6107_v57  ;;  %v8821_v31 = vadd.f32 %v6107_v57, %v6105_v55  ;;  %6128 = vpow2.f32 %v1722_v50  ;;  %v2335_v1 = vmul.f32 1.442695, %v2280_v16 }
 0x465   : > { %2354 = vadd.xlane.f32.xlu0 %v10110_v40  ;;  %v8823_v43 = vpop.eup %6110  ;;  %1911 = vmatmul.mubr.f32.gmra.mrb[66].mxu0 %v6105_v55  ;;  %v1682_v11 = vsub.f32 %v10114_v22, %v1649_v56  ;;  %v1683_v57 = vsub.f32 %v10115_v42, %v1649_v56  ;;  %6130 = vpow2.f32 %v3028_v61  ;;  %v1758_v55 = vadd.f32 %v8520_v12, %v8497_v10  ;;  %v1640_v50 = vpop.xlane.xlu1 %1639  ;;  %v10117_v22 = vld [vmem:[#allocation118_spill] sm:$0xff]  ;;  %v10118_v10 = vld [vmem:[#allocation121_spill] sm:$0xff] }
 0x466   : > { %10113 = vst [vmem:[#allocation68_spill] sm:$0xff] %v8821_v31  ;;  %2650 = vmatmul.mubr.f32.gmra.mrb[58].mxu1 %v8816_v20  ;;  %v8828_v59 = vpop.eup %6112  ;;  %v2333_v40 = vmul.f32 1.442695, %v2279_v39  ;;  %1915 = vmatprep.mubr.f32.mxu0 %v8738_v30  ;;  %v1677_v56 = vsub.f32 %v10117_v22, %v1640_v50  ;;  %v2247_v42 = vpop.xlane.xlu0 %2246 }
 0x467   : > { %3789 = vadd.xlane.f32.xlu1 %v3788_v38  ;;  %v8833_v31 = vpop.eup %6114  ;;  %v1740_v35 = vmul.f32 1.442695, %v1682_v11  ;;  %v1742_v23 = vmul.f32 1.442695, %v1683_v57  ;;  %v10116_v38 = vld [vmem:[#allocation117_spill] sm:$0xff]  ;;  %v3779_v61 = vadd.f32 %v8828_v59, %v8823_v43 }
 0x468   : > { %6132 = vpow2.f32 %v2333_v40  ;;  %v1676_v39 = vsub.f32 %v10116_v38, %v1640_v50  ;;  %v8838_v16 = vpop.eup %6116  ;;  %v2281_v40 = vsub.f32 %v10118_v10, %v2247_v42  ;;  %v1730_v38 = vmul.f32 1.442695, %v1677_v56 }
 0x469   : > { %3083 = vadd.xlane.f32.xlu0 %v3082_v41  ;;  %6134 = vpow2.f32 %v2335_v1  ;;  %1916 = vmatmul.mubr.f32.gmra.mrb[68].mxu0 %v8732_v27  ;;  %v6119_v8 = vpop.eup %6118  ;;  %v10119_v41 = vld [vmem:[#allocation122_spill] sm:$0xff]  ;;  %v2368_v1 = vadd.f32 %v8705_v54, %v8697_v2  ;;  %v1761_v2 = vadd.f32 %v8599_v9, %v8573_v18  ;;  %v10123_v18 = vld [vmem:[#allocation95_spill] sm:$0xff] }
 0x46a   : > { %6136 = vpow2.f32 %v1740_v35  ;;  %v1728_v12 = vmul.f32 1.442695, %v1676_v39  ;;  %v2282_v11 = vsub.f32 %v10119_v41, %v2247_v42  ;;  %v6121_v57 = vpop.eup %6120  ;;  %v2337_v22 = vmul.f32 1.442695, %v2281_v40  ;;  %v2250_v62 = vpop.xlane.xlu1 %2249  ;;  %v10120_v39 = vld [vmem:[#allocation36_spill] sm:$0xff]  ;;  %v10122_v40 = vld [vmem:[#allocation94_spill] sm:$0xff] }
 0x46b   : > { %1759 = vadd.xlane.f32.xlu1 %v1758_v55  ;;  %6138 = vpow2.f32 %v1742_v23  ;;  %v8848_v50 = vpop.eup %6122  ;;  %2654 = vmatprep.mubr.f32.mxu1 %v6121_v57  ;;  %v8850_v35 = vadd.f32 %v6121_v57, %v6119_v8  ;;  %v2283_v42 = vsub.f32 %v10120_v39, %v2250_v62  ;;  %v10121_v23 = vld [vmem:[#allocation8_spill] sm:$0xff]  ;;  %v2994_v41 = vsub.f32 %v10122_v40, %v8686_v33 }
 0x46c   : > { %6140 = vpow2.f32 %v1728_v12  ;;  %v2339_v48 = vmul.f32 1.442695, %v2282_v11  ;;  %v8852_v55 = vpop.eup %6124  ;;  %v2284_v56 = vsub.f32 %v10121_v23, %v2250_v62  ;;  %2655 = vmatmul.mubr.f32.gmra.mrb[60].mxu1 %v6119_v8  ;;  %v2995_v9 = vsub.f32 %v10123_v18, %v8686_v33 }
 0x46d   : > { %3780 = vadd.xlane.f32.xlu0 %v3779_v61  ;;  %6142 = vpow2.f32 %v1730_v38  ;;  %v6127_v10 = vpop.eup %6126  ;;  %2659 = vmatprep.mubr.f32.mxu1 %v8806_v6  ;;  %v2341_v61 = vmul.f32 1.442695, %v2283_v42  ;;  %v3097_v62 = vadd.f32 %v8852_v55, %v8848_v50  ;;  %v10125_v38 = vld [vmem:[#allocation123_spill] sm:$0xff]  ;;  %v2359_v39 = vadd.f32 %v8612_v60, %v8580_v5 }
 0x46e   : > { %6144 = vpow2.f32 %v2337_v22  ;;  %v6129_v54 = vpop.eup %6128  ;;  %v2343_v12 = vmul.f32 1.442695, %v2284_v56  ;;  %v1646_v8 = vpop.xlane.xlu1 %1645 }
 0x46f   : > { %2369 = vadd.xlane.f32.xlu1 %v2368_v1  ;;  %6146 = vpow2.f32 %v2339_v48  ;;  %1920 = vmatprep.mubr.f32.mxu0 %v6129_v54  ;;  %v8863_v11 = vadd.f32 %v6129_v54, %v6127_v10  ;;  %v8865_v57 = vpop.eup %6130  ;;  %v10124_v48 = vld [vmem:[#allocation10_spill] sm:$0xff]  ;;  %v1681_v1 = vsub.f32 %v10125_v38, %v1646_v8 }
 0x470   : > { %6148 = vpow2.f32 %v2341_v61  ;;  %v1680_v6 = vsub.f32 %v10124_v48, %v1646_v8  ;;  %1921 = vmatmul.mubr.f32.gmra.mrb[70].mxu0 %v6127_v10  ;;  %2660 = vmatmul.mubr.f32.gmra.mrb[62].mxu1 %v8799_v4  ;;  %v1764_v10 = vadd.f32 %v8751_v47, %v8749_v34  ;;  %v3036_v61 = vmul.f32 1.442695, %v2995_v9  ;;  %v10126_v48 = vld [vmem:[#allocation105_spill] sm:$0xff] }
 0x471   : > { %1762 = vadd.xlane.f32.xlu0 %v1761_v2  ;;  %6150 = vpow2.f32 %v2343_v12  ;;  %1925 = vmatprep.mubr.f32.mxu0 %v8833_v31  ;;  %v1738_v56 = vmul.f32 1.442695, %v1681_v1  ;;  %v3034_v2 = vmul.f32 1.442695, %v2994_v41  ;;  %v3088_v60 = vadd.f32 %v8865_v57, %v8838_v16 }
 0x472   : > { %v6133_v22 = vpop.eup %6132  ;;  %v1736_v23 = vmul.f32 1.442695, %v1680_v6  ;;  %v2374_v47 = vadd.f32 %v8795_v17, %v8789_v58  ;;  %v3785_v8 = vadd.f32 %v8693_v0, %v8683_v36  ;;  %v2998_v6 = vsub.f32 %v10126_v48, %v8755_v44  ;;  %v10127_v17 = vld [vmem:[#allocation106_spill] sm:$0xff] }
 0x473   : > { %3098 = vadd.xlane.f32.xlu1 %v3097_v62  ;;  %v6135_v42 = vpop.eup %6134  ;;  %v2999_v38 = vsub.f32 %v10127_v17, %v8755_v44 }
 0x474   : > { %v8875_v33 = vpop.eup %6136  ;;  %2664 = vmatprep.mubr.f32.mxu1 %v6135_v42  ;;  %v8879_v4 = vadd.f32 %v6135_v42, %v6133_v22  ;;  %6152 = vpow2.f32 %v1736_v23  ;;  %1926 = vmatmul.mubr.f32.gmra.mrb[72].mxu0 %v8757_v3  ;;  %v3042_v42 = vmul.f32 1.442695, %v2998_v6 }
 0x475   : > { %2360 = vadd.xlane.f32.xlu0 %v2359_v39  ;;  %v6139_v54 = vpop.eup %6138  ;;  %2665 = vmatmul.mubr.f32.gmra.mrb[64].mxu1 %v6133_v22  ;;  %6154 = vpow2.f32 %v1738_v56  ;;  %v1767_v22 = vadd.f32 %v8728_v29, %v8723_v15  ;;  %v3044_v56 = vmul.f32 1.442695, %v2999_v38  ;;  %v10133_v38 = vld [vmem:[#allocation15_spill] sm:$0xff] }
 0x476   : > { %v6141_v5 = vpop.eup %6140  ;;  %v8885_v12 = vadd.f32 %v6139_v54, %v8875_v33  ;;  %6156 = vpow2.f32 %v3034_v2  ;;  %v10128_v2 = vld [vmem:[#allocation22_spill] sm:$0xff] }
 0x477   : > { %1765 = vadd.xlane.f32.xlu1 %v1764_v10  ;;  %v6143_v40 = vpop.eup %6142  ;;  %6158 = vpow2.f32 %v3036_v61  ;;  %v10129_v61 = vld [vmem:[#allocation27_spill] sm:$0xff] }
 0x478   : > { %v6145_v34 = vpop.eup %6144  ;;  %1930 = vmatprep.mubr.f32.mxu0 %v6143_v40  ;;  %v8889_v41 = vadd.f32 %v6143_v40, %v6141_v5  ;;  %6160 = vpow2.f32 %v3042_v42  ;;  %v10130_v40 = vld [vmem:[#allocation5_spill] sm:$0xff] }
 0x479   : > { %3089 = vadd.xlane.f32.xlu0 %v3088_v60  ;;  %v6147_v62 = vpop.eup %6146  ;;  %1931 = vmatmul.mubr.f32.gmra.mrb[74].mxu0 %v6141_v5  ;;  %6162 = vpow2.f32 %v3044_v56 }
 0x47a   : > { %2669 = vmatprep.mubr.f32.mxu1 %v6147_v62  ;;  %v8893_v18 = vadd.f32 %v6147_v62, %v6145_v34  ;;  %v6149_v9 = vpop.eup %6148  ;;  %1935 = vmatprep.mubr.f32.mxu0 %v8784_v63 }
 0x47b   : > { %2375 = vadd.xlane.f32.xlu1 %v2374_v47  ;;  %2670 = vmatmul.mubr.f32.gmra.mrb[66].mxu1 %v6145_v34  ;;  %v6151_v58 = vpop.eup %6150  ;;  %v10131_v47 = vld [vmem:[#allocation124_spill] sm:$0xff] }
 0x47c   : > { %2674 = vmatprep.mubr.f32.mxu1 %v6151_v58  ;;  %v8901_v1 = vadd.f32 %v6151_v58, %v6149_v9 }
 0x47d   : > { %3786 = vadd.xlane.f32.xlu0 %v3785_v8  ;;  %1936 = vmatmul.mubr.f32.gmra.mrb[76].mxu0 %v8778_v51  ;;  %v1655_v63 = vpop.xlane.xlu0 %1654  ;;  %v10132_v8 = vld [vmem:[#allocation125_spill] sm:$0xff] }
 0x47e   : > { %v6153_v39 = vpop.eup %6152  ;;  %v1686_v10 = vsub.f32 %v10128_v2, %v1655_v63  ;;  %v1687_v44 = vsub.f32 %v10129_v61, %v1655_v63  ;;  %v10135_v61 = vld [vmem:[#allocation26_spill] sm:$0xff] }
 0x47f   : > { %2675 = vmatmul.mubr.f32.gmra.mrb[68].mxu1 %v6149_v9  ;;  %v6155_v23 = vpop.eup %6154 }
 0x480   : > { %1940 = vmatprep.mubr.f32.mxu0 %v6155_v23  ;;  %v8907_v5 = vadd.f32 %v6155_v23, %v6153_v39  ;;  %v8909_v51 = vpop.eup %6156  ;;  %v1748_v15 = vmul.f32 1.442695, %v1686_v10  ;;  %v1750_v29 = vmul.f32 1.442695, %v1687_v44 }
 0x481   : > { %1768 = vadd.xlane.f32.xlu0 %v1767_v22  ;;  %1941 = vmatmul.mubr.f32.gmra.mrb[78].mxu0 %v6153_v39  ;;  %v8911_v60 = vpop.eup %6158  ;;  %v10134_v22 = vld [vmem:[#allocation126_spill] sm:$0xff] }
 0x482   : > { %1945 = vmatprep.mubr.f32.mxu0 %v6139_v54  ;;  %v2253_v34 = vpop.xlane.xlu0 %2252  ;;  %6164 = vpow2.f32 %v1748_v15  ;;  %v3094_v6 = vadd.f32 %v8911_v60, %v8909_v51  ;;  %v10136_v15 = vld [vmem:[#allocation13_spill] sm:$0xff] }
 0x483   : > { %v2285_v62 = vsub.f32 %v10131_v47, %v2253_v34  ;;  %v2286_v9 = vsub.f32 %v10132_v8, %v2253_v34  ;;  %6166 = vpow2.f32 %v1750_v29  ;;  %v2256_v48 = vpop.xlane.xlu1 %2255  ;;  %v8925_v34 = vpop.eup %6160 }
 0x484   : > { %v2287_v54 = vsub.f32 %v10133_v38, %v2256_v48  ;;  %v2288_v39 = vsub.f32 %v10134_v22, %v2256_v48  ;;  %v8927_v8 = vpop.eup %6162 }
 0x485   : > { %2366 = vadd.xlane.f32.xlu0 %v10130_v40  ;;  %1946 = vmatmul.mubr.f32.gmra.mrb[80].mxu0 %v8875_v33  ;;  %v2345_v58 = vmul.f32 1.442695, %v2285_v62  ;;  %v2347_v17 = vmul.f32 1.442695, %v2286_v9  ;;  %v1773_v33 = vadd.f32 %v8738_v30, %v8732_v27 }
 0x486   : > { %v5994_v42 = vpop.permute.xlu0 %5993  ;;  %v2349_v23 = vmul.f32 1.442695, %v2287_v54  ;;  %v2351_v56 = vmul.f32 1.442695, %v2288_v39  ;;  %v3100_v54 = vadd.f32 %v8927_v8, %v8925_v34 }
 0x487   : > { %6168 = vpow2.f32 %v2345_v58  ;;  %v5996_v63 = vunpack.i.h.bf16 %v5994_v42  ;;  %v5995_v2 = vunpack.i.l.bf16 %v5994_v42  ;;  %v1652_v10 = vpop.xlane.xlu1 %1651 }
 0x488   : > { %6170 = vpow2.f32 %v2347_v17  ;;  %v1684_v44 = vsub.f32 %v10135_v61, %v1652_v10  ;;  %v1685_v29 = vsub.f32 %v10136_v15, %v1652_v10  ;;  %v10137_v61 = vld [vmem:[#allocation113_spill] sm:$0xff] }
 0x489   : > { %3095 = vadd.xlane.f32.xlu0 %v3094_v6  ;;  %6172 = vpow2.f32 %v2349_v23  ;;  %v5569_v40 = vpack.c.bf16 %v5996_v63, %v5995_v2 }
 0x48a   : > { %6174 = vpow2.f32 %v2351_v56  ;;  %v1744_v47 = vmul.f32 1.442695, %v1684_v44  ;;  %v1746_v62 = vmul.f32 1.442695, %v1685_v29  ;;  %v10138_v44 = vld [vmem:[#allocation59_spill] sm:$0xff] }
 0x48b   : > { %v5999_v9 = vpop.permute.xlu1 %5998  ;;  %5570 = vmatpush3.bf16.msra.mxu0 %v5569_v40  ;;  %v3692_v15 = vsub.f32 %v10138_v44, %v10137_v61  ;;  %v10149_v44 = vld [vmem:[#allocation70_spill] sm:$0xff] }
 0x48c   : > { %v6165_v48 = vpop.eup %6164  ;;  %6176 = vpow2.f32 %v1744_v47  ;;  %v6001_v6 = vunpack.i.h.bf16 %v5999_v9  ;;  %v6000_v27 = vunpack.i.l.bf16 %v5999_v9  ;;  %v2377_v47 = vadd.f32 %v8816_v20, %v8774_v24 }
 0x48d   : > { %1774 = vadd.xlane.f32.xlu0 %v1773_v33  ;;  %v6167_v30 = vpop.eup %6166  ;;  %6178 = vpow2.f32 %v1746_v62  ;;  %v10139_v62 = vld [vmem:[#allocation58_spill] sm:$0xff] }
 0x48e   : > { %v5599_v58 = vpack.c.bf16 %v6001_v6, %v6000_v27  ;;  %v8930_v17 = vadd.f32 %v6167_v30, %v6165_v48  ;;  %v3691_v9 = vsub.f32 %v10139_v62, %v10137_v61  ;;  %v10141_v6 = vld [vmem:[#allocation54_spill] sm:$0xff] }
 0x48f   : > { %v6004_v38 = vpop.permute.xlu1 %6003  ;;  %v10150_v62 = vld [vmem:[#allocation6_spill] sm:$0xff] }
 0x490   : > { %v6006_v39 = vunpack.i.h.bf16 %v6004_v38  ;;  %v6005_v42 = vunpack.i.l.bf16 %v6004_v38  ;;  %5600 = vmatprep.subr.bf16.mxu1 %v5599_v58  ;;  %v3733_v58 = vmul.f32 1.442695, %v3692_v15  ;;  %v10142_v38 = vld [vmem:[#allocation53_spill] sm:$0xff]  ;;  %v3731_v20 = vmul.f32 1.442695, %v3691_v9 }
 0x491   : > { %2372 = vadd.xlane.f32.xlu0 %v8558_v21  ;;  %v6169_v22 = vpop.eup %6168  ;;  %v1779_v21 = vadd.f32 %v8833_v31, %v8757_v3  ;;  %v10140_v31 = vld [vmem:[#allocation28_spill] sm:$0xff] }
 0x492   : > { %v6171_v23 = vpop.eup %6170  ;;  %v5601_v63 = vpack.c.bf16 %v6006_v39, %v6005_v42  ;;  %v3694_v27 = vsub.f32 %v10141_v6, %v10140_v31  ;;  %v3693_v24 = vsub.f32 %v10142_v38, %v10140_v31  ;;  %6180 = vpow2.f32 %v3733_v58  ;;  %v10146_v39 = vld [vmem:[#allocation33_spill] sm:$0xff]  ;;  %v10151_v31 = vld [vmem:[#allocation107_spill] sm:$0xff] }
 0x493   : > { %v6173_v56 = vpop.eup %6172  ;;  %2679 = vmatprep.mubr.f32.mxu1 %v6171_v23  ;;  %v8934_v2 = vadd.f32 %v6171_v23, %v6169_v22  ;;  %6182 = vpow2.f32 %v3731_v20  ;;  %v10147_v23 = vld [vmem:[#allocation60_spill] sm:$0xff] }
 0x494   : > { %v6175_v10 = vpop.eup %6174  ;;  %2680 = vmatmul.mubr.f32.gmra.mrb[70].mxu1 %v6169_v22 }
 0x495   : > { %3101 = vadd.xlane.f32.xlu0 %v3100_v54  ;;  %2684 = vmatprep.mubr.f32.mxu1 %v6175_v10  ;;  %v8938_v33 = vadd.f32 %v6175_v10, %v6173_v56  ;;  %v3737_v54 = vmul.f32 1.442695, %v3694_v27 }
 0x496   : > { %5602 = vmatpush3.bf16.msra.mxu1 %v5601_v63  ;;  %v6177_v29 = vpop.eup %6176 }
 0x497   : > { %v6179_v40 = vpop.eup %6178  ;;  %6184 = vpow2.f32 %v3737_v54 }
 0x498   : > { %2685 = vmatmul.mubr.f32.gmra.mrb[72].mxu1 %v6173_v56  ;;  %1950 = vmatprep.mubr.f32.mxu0 %v6179_v40  ;;  %v8947_v3 = vadd.f32 %v6179_v40, %v6177_v29 }
 0x499   : > { %1780 = vadd.xlane.f32.xlu0 %v1779_v21  ;;  %4003 = vmatprep.mubr.f32.mxu1 %v8828_v59  ;;  %v3735_v59 = vmul.f32 1.442695, %v3693_v24  ;;  %v10148_v21 = vld [vmem:[#allocation65_spill] sm:$0xff] }
 0x49a   : > { %1951 = vmatmul.mubr.f32.gmra.mrb[82].mxu0 %v6177_v29 }
 0x49b   : > { %1955 = vmatprep.mubr.f32.mxu0 %v6167_v30  ;;  %6186 = vpow2.f32 %v3735_v59  ;;  %v10152_v59 = vld [vmem:[#allocation63_spill] sm:$0xff] }
 0x49c   : > { %4004 = vmatmul.mubr.f32.vlgmr.msra.gmra.mrb[74].mxu1 %v8823_v43 }
 0x49d   : > { %2378 = vadd.xlane.f32.xlu0 %v2377_v47  ;;  %4008 = vmatprep.mubr.f32.mxu1 %v8716_v14  ;;  %v10143_v14 = vld [vmem:[#allocation17_spill] sm:$0xff] }
 0x49e   : > { %1956 = vmatmul.mubr.f32.gmra.mrb[84].mxu0 %v6165_v48  ;;  %v10145_v48 = vld [vmem:[#allocation34_spill] sm:$0xff] }
 0x49f   : > { %3306 = vmatprep.mubr.f32.mxu0 %v8647_v45  ;;  %v8964_v45 = vpop.eup %6180 }
 0x4a0   : > { %4009 = vmatmul.mubr.f32.gmra.mrb[76].mxu1 %v8710_v19 }
 0x4a1   : > { %4013 = vmatprep.mubr.f32.mxu1 %v8693_v0 }
 0x4a2   : > { %3307 = vmatmul.mubr.f32.vlgmr.msra.gmra.mrb[86].mxu0 %v8591_v32  ;;  %v8969_v32 = vpop.eup %6182 }
 0x4a3   : > { %3311 = vmatprep.mubr.f32.mxu0 %v8486_v52  ;;  %v8972_v52 = vpop.eup %6184 }
 0x4a4   : > { %4014 = vmatmul.mubr.f32.gmra.mrb[78].mxu1 %v8683_v36 }
 0x4a5   : > { %4018 = vmatprep.mubr.f32.mxu1 %v8671_v7 }
 0x4a6   : > { %3312 = vmatmul.mubr.f32.gmra.mrb[88].mxu0 %v8484_v28  ;;  %v8977_v28 = vpop.eup %6186 }
 0x4a7   : > { %3316 = vmatprep.mubr.f32.mxu0 %v8865_v57 }
 0x4a8   : > { %4019 = vmatmul.mubr.f32.gmra.mrb[80].mxu1 %v8662_v13 }
 0x4a9   : > { %4023 = vmatprep.mubr.f32.mxu1 %v8964_v45 }
 0x4aa   : > { %3317 = vmatmul.mubr.f32.gmra.mrb[90].mxu0 %v8838_v16 }
 0x4ab   : > { %3321 = vmatprep.mubr.f32.mxu0 %v8766_v49 }
 0x4ac   : > { %4024 = vmatmul.mubr.f32.gmra.mrb[82].mxu1 %v8969_v32 }
 0x4ad   : > { %4028 = vmatprep.mubr.f32.mxu1 %v8972_v52 }
 0x4ae   : > { %3322 = vmatmul.mubr.f32.gmra.mrb[92].mxu0 %v8763_v26 }
 0x4af   : > { %3326 = vmatprep.mubr.f32.mxu0 %v8911_v60 }
 0x4b0   : > { %4029 = vmatmul.mubr.f32.gmra.mrb[84].mxu1 %v8977_v28 }
 0x4b2   : > { %3327 = vmatmul.mubr.f32.gmra.mrb[94].mxu0 %v8909_v51 }
 0x4b3   : > { %3331 = vmatprep.mubr.f32.mxu0 %v8852_v55 }
 0x4b4   : > { %v4883_v13 = vpop.f32.mrb[54].mxu0 }
 0x4b5   : > { %v4884_v7 = vpop.f32.mrb[55].mxu0 }
 0x4b6   : > { %3332 = vmatmul.mubr.f32.gmra.mrb[96].mxu0 %v8848_v50  ;;  %v8984_v36 = vadd.f32 %v4884_v7, %v4883_v13  ;;  %v10144_v50 = vld [vmem:[#allocation57_spill] sm:$0xff]  ;;  %v10153_v7 = vld [vmem:[#allocation64_spill] sm:$0xff] }
 0x4b7   : > { %3336 = vmatprep.mubr.f32.mxu0 %v8927_v8  ;;  %v3655_v0 = vpop.xlane.xlu0 %3654 }
 0x4b8   : > { %v3695_v19 = vsub.f32 %v8247_v46, %v3655_v0  ;;  %v3696_v26 = vsub.f32 %v10143_v14, %v3655_v0 }
 0x4b9   : > { %v4963_v16 = vpop.f32.mrb[42].mxu1 }
 0x4ba   : > { %v3739_v49 = vmul.f32 1.442695, %v3695_v19  ;;  %v3741_v43 = vmul.f32 1.442695, %v3696_v26  ;;  %3337 = vmatmul.mubr.f32.gmra.mrb[98].mxu0 %v8925_v34  ;;  %v4964_v57 = vpop.f32.mrb[43].mxu1 }
 0x4bb   : > { %v8990_v51 = vadd.f32 %v4964_v57, %v4963_v16 }
 0x4bc   : > { %v3658_v55 = vpop.xlane.xlu0 %3657  ;;  %6188 = vpow2.f32 %v3739_v49 }
 0x4bd   : > { %v3697_v60 = vsub.f32 %v10144_v50, %v3658_v55  ;;  %v3698_v30 = vsub.f32 %v10145_v48, %v3658_v55  ;;  %6190 = vpow2.f32 %v3741_v43 }
 0x4bf   : > { %v3743_v8 = vmul.f32 1.442695, %v3697_v60  ;;  %v3745_v22 = vmul.f32 1.442695, %v3698_v30 }
 0x4c0   : > { %v2964_v46 = vpop.xlane.xlu0 %2963 }
 0x4c1   : > { %6192 = vpow2.f32 %v3743_v8  ;;  %v3002_v42 = vsub.f32 %v10146_v39, %v2964_v46  ;;  %v3003_v56 = vsub.f32 %v10147_v23, %v2964_v46  ;;  %v2961_v34 = vpop.xlane.xlu1 %2960 }
 0x4c2   : > { %6194 = vpow2.f32 %v3745_v22  ;;  %v3000_v61 = vsub.f32 %v10148_v21, %v2961_v34  ;;  %v3001_v15 = vsub.f32 %v10149_v44, %v2961_v34 }
 0x4c3   : > { %v3050_v63 = vmul.f32 1.442695, %v3002_v42  ;;  %v3052_v10 = vmul.f32 1.442695, %v3003_v56 }
 0x4c4   : > { %v3661_v29 = vpop.xlane.xlu0 %3660  ;;  %v3046_v40 = vmul.f32 1.442695, %v3000_v61  ;;  %v3048_v47 = vmul.f32 1.442695, %v3001_v15  ;;  %v10156_v15 = vld [vmem:[#allocation24_spill] sm:$0xff] }
 0x4c5   : > { %6196 = vpow2.f32 %v3050_v63  ;;  %v3699_v9 = vsub.f32 %v10150_v62, %v3661_v29  ;;  %v3700_v6 = vsub.f32 %v10151_v31, %v3661_v29  ;;  %v10157_v62 = vld [vmem:[#allocation96_spill] sm:$0xff] }
 0x4c6   : > { %6198 = vpow2.f32 %v3052_v10  ;;  %v9000_v27 = vpop.xlane.xlu1 %3669  ;;  %v6189_v58 = vpop.eup %6188  ;;  %v10155_v10 = vld [vmem:[#allocation25_spill] sm:$0xff]  ;;  %v10158_v31 = vld [vmem:[#allocation128_spill] sm:$0xff] }
 0x4c7   : > { %6200 = vpow2.f32 %v3046_v40  ;;  %v3747_v38 = vmul.f32 1.442695, %v3699_v9  ;;  %v6191_v24 = vpop.eup %6190  ;;  %v3749_v20 = vmul.f32 1.442695, %v3700_v6  ;;  %v3705_v21 = vsub.f32 %v10155_v10, %v9000_v27  ;;  %v10167_v10 = vld [vmem:[#allocation12_spill] sm:$0xff] }
 0x4c8   : > { %6202 = vpow2.f32 %v3048_v47  ;;  %v2967_v54 = vpop.xlane.xlu0 %2966  ;;  %4033 = vmatprep.mubr.f32.mxu1 %v6191_v24  ;;  %v9004_v19 = vadd.f32 %v6191_v24, %v6189_v58  ;;  %v3706_v29 = vsub.f32 %v10156_v15, %v9000_v27  ;;  %v10159_v27 = vld [vmem:[#allocation55_spill] sm:$0xff] }
 0x4c9   : > { %6204 = vpow2.f32 %v3747_v38  ;;  %v3004_v13 = vsub.f32 %v10152_v59, %v2967_v54  ;;  %v3005_v0 = vsub.f32 %v10153_v7, %v2967_v54  ;;  %4034 = vmatmul.mubr.f32.gmra.mrb[86].mxu1 %v6189_v58  ;;  %v3759_v58 = vmul.f32 1.442695, %v3705_v21 }
 0x4ca   : > { %6206 = vpow2.f32 %v3749_v20  ;;  %v3761_v59 = vmul.f32 1.442695, %v3706_v29 }
 0x4cb   : > { %v6193_v14 = vpop.eup %6192  ;;  %v9006_v26 = vpop.xlane.xlu1 %3672  ;;  %v3054_v43 = vmul.f32 1.442695, %v3004_v13  ;;  %v3056_v16 = vmul.f32 1.442695, %v3005_v0  ;;  %v10160_v13 = vld [vmem:[#allocation56_spill] sm:$0xff] }
 0x4cc   : > { %v6195_v49 = vpop.eup %6194  ;;  %v3707_v38 = vsub.f32 %v10159_v27, %v9006_v26  ;;  %v3708_v7 = vsub.f32 %v10160_v13, %v9006_v26 }
 0x4cd   : > { %v3664_v57 = vpop.xlane.xlu0 %3663  ;;  %4038 = vmatprep.mubr.f32.mxu1 %v6195_v49  ;;  %6208 = vpow2.f32 %v3056_v16  ;;  %v9010_v60 = vadd.f32 %v6195_v49, %v6193_v14 }
 0x4ce   : > { %v3701_v55 = vsub.f32 %v8350_v37, %v3664_v57  ;;  %v3702_v50 = vsub.f32 %v8353_v25, %v3664_v57  ;;  %4039 = vmatmul.mubr.f32.gmra.mrb[88].mxu1 %v6193_v14  ;;  %6210 = vpow2.f32 %v3054_v43  ;;  %v10154_v37 = vld [vmem:[#allocation93_spill] sm:$0xff]  ;;  %v10162_v43 = vld [vmem:[#allocation32_spill] sm:$0xff] }
 0x4cf   : > { %v6197_v48 = vpop.eup %6196  ;;  %v9012_v42 = vpop.xlane.xlu1 %3675  ;;  %v10161_v14 = vld [vmem:[#allocation29_spill] sm:$0xff] }
 0x4d0   : > { %v3751_v30 = vmul.f32 1.442695, %v3701_v55  ;;  %v6199_v8 = vpop.eup %6198  ;;  %v3753_v22 = vmul.f32 1.442695, %v3702_v50  ;;  %v10163_v55 = vld [vmem:[#allocation68_spill] sm:$0xff]  ;;  %v10164_v50 = vld [vmem:[#allocation85_spill] sm:$0xff] }
 0x4d1   : > { %v2970_v46 = vpop.xlane.xlu0 %2969  ;;  %v6201_v39 = vpop.eup %6200  ;;  %v3106_v25 = vadd.f32 %v6199_v8, %v6197_v48 }
 0x4d2   : > { %6212 = vpow2.f32 %v3751_v30  ;;  %v3006_v23 = vsub.f32 %v8411_v53, %v2970_v46  ;;  %v6203_v56 = vpop.eup %6202  ;;  %v3007_v34 = vsub.f32 %v10154_v37, %v2970_v46  ;;  %v10166_v37 = vld [vmem:[#allocation48_spill] sm:$0xff] }
 0x4d3   : > { %6214 = vpow2.f32 %v3753_v22  ;;  %v9016_v63 = vpop.eup %6204  ;;  %3341 = vmatprep.mubr.f32.mxu0 %v6203_v56  ;;  %3107 = vadd.xlane.f32.xlu0 %v3106_v25  ;;  %v3103_v53 = vadd.f32 %v6203_v56, %v6201_v39  ;;  %v9030_v24 = vpop.xlane.xlu1 %3678  ;;  %v3763_v22 = vmul.f32 1.442695, %v3707_v38 }
 0x4d4   : > { %v3058_v61 = vmul.f32 1.442695, %v3006_v23  ;;  %v9020_v44 = vpop.eup %6206  ;;  %v3060_v40 = vmul.f32 1.442695, %v3007_v34  ;;  %3342 = vmatmul.mubr.f32.gmra.mrb[100].mxu0 %v6201_v39  ;;  %v3765_v39 = vmul.f32 1.442695, %v3708_v7 }
 0x4d5   : > { %v3667_v47 = vpop.xlane.xlu0 %3666  ;;  %3346 = vmatprep.mubr.f32.mxu0 %v6199_v8  ;;  %4043 = vmatprep.mubr.f32.mxu1 %v9020_v44 }
 0x4d6   : > { %6216 = vpow2.f32 %v3058_v61  ;;  %v3703_v9 = vsub.f32 %v10157_v62, %v3667_v47  ;;  %3104 = vadd.xlane.f32.xlu1 %v3103_v53  ;;  %v3704_v6 = vsub.f32 %v10158_v31, %v3667_v47  ;;  %4044 = vmatmul.mubr.f32.gmra.mrb[90].mxu1 %v9016_v63  ;;  %v10168_v61 = vld [vmem:[#allocation40_spill] sm:$0xff]  ;;  %v10169_v53 = vld [vmem:[#allocation46_spill] sm:$0xff] }
 0x4d7   : > { %6218 = vpow2.f32 %v3060_v40  ;;  %v6209_v54 = vpop.eup %6208  ;;  %1786 = vadd.xlane.f32.xlu0 %v10161_v14  ;;  %v3709_v47 = vsub.f32 %v10169_v53, %v9012_v42 }
 0x4d8   : > { %v3755_v20 = vmul.f32 1.442695, %v3703_v9  ;;  %v3757_v0 = vmul.f32 1.442695, %v3704_v6  ;;  %3347 = vmatmul.mubr.f32.gmra.mrb[102].mxu0 %v6197_v48  ;;  %v6211_v57 = vpop.eup %6210  ;;  %v10165_v48 = vld [vmem:[#allocation66_spill] sm:$0xff]  ;;  %v9041_v25 = vpop.xlane.xlu1 %3681 }
 0x4d9   : > { %v2973_v49 = vpop.xlane.xlu0 %2972  ;;  %3351 = vmatprep.mubr.f32.mxu0 %v6209_v54  ;;  %v3710_v23 = vsub.f32 %v10165_v48, %v9012_v42  ;;  %v3109_v38 = vadd.f32 %v6211_v57, %v6209_v54  ;;  %v3767_v14 = vmul.f32 1.442695, %v3709_v47 }
 0x4da   : > { %6220 = vpow2.f32 %v3755_v20  ;;  %v3008_v16 = vsub.f32 %v10162_v43, %v2973_v49  ;;  %1771 = vadd.xlane.f32.xlu1 %v10163_v55  ;;  %v3009_v30 = vsub.f32 %v10164_v50, %v2973_v49  ;;  %v10173_v49 = vld [vmem:[#allocation7_spill] sm:$0xff] }
 0x4db   : > { %6222 = vpow2.f32 %v3757_v0  ;;  %2384 = vadd.xlane.f32.xlu0 %v10166_v37  ;;  %v3769_v6 = vmul.f32 1.442695, %v3710_v23  ;;  %v3711_v43 = vsub.f32 %v10173_v49, %v9030_v24 }
 0x4dc   : > { %v6213_v8 = vpop.eup %6212  ;;  %6224 = vpow2.f32 %v3759_v58  ;;  %v3062_v46 = vmul.f32 1.442695, %v3008_v16  ;;  %v3064_v56 = vmul.f32 1.442695, %v3009_v30  ;;  %3352 = vmatmul.mubr.f32.gmra.mrb[104].mxu0 %v6211_v57  ;;  %v10170_v58 = vld [vmem:[#allocation37_spill] sm:$0xff]  ;;  %v9058_v16 = vpop.xlane.xlu1 %2357  ;;  %v10174_v30 = vld [vmem:[#allocation31_spill] sm:$0xff] }
 0x4dd   : > { %v6215_v26 = vpop.eup %6214  ;;  %6226 = vpow2.f32 %v3761_v59  ;;  %v2976_v34 = vpop.xlane.xlu0 %2975  ;;  %v3712_v27 = vsub.f32 %v10170_v58, %v9030_v24  ;;  %v10171_v59 = vld [vmem:[#allocation67_spill] sm:$0xff]  ;;  %v3771_v37 = vmul.f32 1.442695, %v3711_v43 }
 0x4de   : > { %6228 = vpow2.f32 %v3062_v46  ;;  %4048 = vmatprep.mubr.f32.mxu1 %v6215_v26  ;;  %v3010_v21 = vsub.f32 %v10167_v10, %v2976_v34  ;;  %v3011_v15 = vsub.f32 %v10168_v61, %v2976_v34  ;;  %v9045_v29 = vadd.f32 %v6215_v26, %v6213_v8  ;;  %2381 = vadd.xlane.f32.xlu1 %v8850_v35  ;;  %v10172_v35 = vld [vmem:[#allocation35_spill] sm:$0xff]  ;;  %v10175_v26 = vld [vmem:[#allocation45_spill] sm:$0xff] }
 0x4df   : > { %6230 = vpow2.f32 %v3064_v56  ;;  %4049 = vmatmul.mubr.f32.gmra.mrb[92].mxu1 %v6213_v8  ;;  %v3773_v50 = vmul.f32 1.442695, %v3712_v27  ;;  %v3714_v8 = vsub.f32 %v10174_v30, %v9041_v25  ;;  %v10177_v61 = vld [vmem:[#allocation127_spill] sm:$0xff] }
 0x4e0   : > { %v6217_v40 = vpop.eup %6216  ;;  %6232 = vpow2.f32 %v3763_v22  ;;  %v3066_v62 = vmul.f32 1.442695, %v3010_v21  ;;  %v3068_v9 = vmul.f32 1.442695, %v3011_v15  ;;  %v3713_v15 = vsub.f32 %v10177_v61, %v9041_v25 }
 0x4e1   : > { %v6219_v31 = vpop.eup %6218  ;;  %6234 = vpow2.f32 %v3765_v39  ;;  %v2979_v20 = vpop.xlane.xlu0 %2978  ;;  %v10176_v39 = vld [vmem:[#allocation86_spill] sm:$0xff]  ;;  %v3803_v61 = vadd.f32 %v9020_v44, %v9016_v63 }
 0x4e2   : > { %6236 = vpow2.f32 %v3066_v62  ;;  %v3012_v13 = vsub.f32 %v10171_v59, %v2979_v20  ;;  %v3013_v7 = vsub.f32 %v10172_v35, %v2979_v20  ;;  %3356 = vmatprep.mubr.f32.mxu0 %v6219_v31  ;;  %v3112_v0 = vadd.f32 %v6219_v31, %v6217_v40  ;;  %3110 = vadd.xlane.f32.xlu1 %v3109_v38  ;;  %v10178_v62 = vld [vmem:[#allocation73_spill] sm:$0xff]  ;;  %v10179_v31 = vld [vmem:[#allocation74_spill] sm:$0xff] }
 0x4e3   : > { %6238 = vpow2.f32 %v3068_v9  ;;  %3357 = vmatmul.mubr.f32.gmra.mrb[106].mxu0 %v6217_v40  ;;  %v3777_v40 = vmul.f32 1.442695, %v3714_v8  ;;  %v3775_v59 = vmul.f32 1.442695, %v3713_v15 }
 0x4e4   : > { %v9054_v42 = vpop.eup %6220  ;;  %v3070_v54 = vmul.f32 1.442695, %v3012_v13  ;;  %v3072_v57 = vmul.f32 1.442695, %v3013_v7  ;;  %3113 = vadd.xlane.f32.xlu0 %v3112_v0  ;;  %6240 = vpow2.f32 %v3769_v6 }
 0x4e5   : > { %v9060_v55 = vpop.eup %6222 }
 0x4e6   : > { %v2982_v22 = vpop.xlane.xlu0 %2981  ;;  %v9064_v46 = vpop.eup %6224  ;;  %6242 = vpow2.f32 %v3070_v54  ;;  %4053 = vmatprep.mubr.f32.mxu1 %v9060_v55  ;;  %1777 = vadd.xlane.f32.xlu1 %v8863_v11 }
 0x4e7   : > { %v3014_v24 = vsub.f32 %v10175_v26, %v2982_v22  ;;  %v3015_v48 = vsub.f32 %v10176_v39, %v2982_v22  ;;  %v9069_v23 = vpop.eup %6226  ;;  %6244 = vpow2.f32 %v3072_v57  ;;  %4054 = vmatmul.mubr.f32.gmra.mrb[94].mxu1 %v9054_v42  ;;  %v9079_v11 = vpop.xlane.xlu1 %3086 }
 0x4e8   : > { %v6229_v56 = vpop.eup %6228  ;;  %6246 = vpow2.f32 %v3767_v14  ;;  %1792 = vadd.xlane.f32.xlu0 %v8885_v12  ;;  %4058 = vmatprep.mubr.f32.mxu1 %v9069_v23 }
 0x4e9   : > { %v3074_v34 = vmul.f32 1.442695, %v3014_v24  ;;  %v3076_v10 = vmul.f32 1.442695, %v3015_v48  ;;  %v6231_v21 = vpop.eup %6230  ;;  %6248 = vpow2.f32 %v3773_v50 }
 0x4ea   : > { %v2985_v53 = vpop.xlane.xlu0 %2984  ;;  %v9077_v47 = vpop.eup %6232  ;;  %3361 = vmatprep.mubr.f32.mxu0 %v6231_v21  ;;  %2387 = vadd.xlane.f32.xlu1 %v8879_v4  ;;  %v3115_v58 = vadd.f32 %v6231_v21, %v6229_v56 }
 0x4eb   : > { %6250 = vpow2.f32 %v3074_v34  ;;  %v3016_v9 = vsub.f32 %v10178_v62, %v2985_v53  ;;  %v3017_v6 = vsub.f32 %v10179_v31, %v2985_v53  ;;  %v9083_v12 = vpop.eup %6234  ;;  %3362 = vmatmul.mubr.f32.gmra.mrb[108].mxu0 %v6229_v56  ;;  %4059 = vmatmul.mubr.f32.gmra.mrb[96].mxu1 %v9064_v46  ;;  %v9093_v0 = vpop.xlane.xlu1 %3783 }
 0x4ec   : > { %6252 = vpow2.f32 %v3076_v10  ;;  %v6237_v25 = vpop.eup %6236  ;;  %2390 = vadd.xlane.f32.xlu0 %v8893_v18  ;;  %4063 = vmatprep.mubr.f32.mxu1 %v9083_v12  ;;  %v3815_v44 = vadd.f32 %v9083_v12, %v9077_v47 }
 0x4ed   : > { %6254 = vpow2.f32 %v3771_v37  ;;  %v3078_v27 = vmul.f32 1.442695, %v3016_v9  ;;  %v3080_v38 = vmul.f32 1.442695, %v3017_v6  ;;  %v6239_v20 = vpop.eup %6238 }
 0x4ee   : > { %6256 = vpow2.f32 %v3777_v40  ;;  %v9089_v13 = vpop.xlane.xlu0 %1756  ;;  %3366 = vmatprep.mubr.f32.mxu0 %v6239_v20  ;;  %v3118_v4 = vadd.f32 %v6239_v20, %v6237_v25  ;;  %v9091_v35 = vpop.eup %6240  ;;  %3116 = vadd.xlane.f32.xlu1 %v3115_v58 }
 0x4ef   : > { %6258 = vpow2.f32 %v3078_v27  ;;  %3367 = vmatmul.mubr.f32.gmra.mrb[110].mxu0 %v6237_v25  ;;  %4064 = vmatmul.mubr.f32.gmra.mrb[98].mxu1 %v9077_v47  ;;  %v9106_v8 = vpop.xlane.xlu1 %1753 }
 0x4f0   : > { %6260 = vpow2.f32 %v3080_v38  ;;  %v6243_v7 = vpop.eup %6242  ;;  %3119 = vadd.xlane.f32.xlu0 %v3118_v4  ;;  %4068 = vmatprep.mubr.f32.mxu1 %v9091_v35 }
 0x4f1   : > { %v6245_v18 = vpop.eup %6244  ;;  %6262 = vpow2.f32 %v3775_v59 }
 0x4f2   : > { %v9097_v14 = vpop.xlane.xlu0 %2354  ;;  %v9099_v49 = vpop.eup %6246  ;;  %3371 = vmatprep.mubr.f32.mxu0 %v6245_v18  ;;  %1783 = vadd.xlane.f32.xlu1 %v8889_v41 }
 0x4f3   : > { %v6249_v43 = vpop.eup %6248  ;;  %3372 = vmatmul.mubr.f32.gmra.mrb[112].mxu0 %v6243_v7  ;;  %4069 = vmatmul.mubr.f32.gmra.mrb[100].mxu1 %v9099_v49  ;;  %v9117_v56 = vpop.xlane.xlu1 %2363  ;;  %6264 = vrcp.f32 %v9097_v14 }
 0x4f4   : > { %1798 = vadd.xlane.f32.xlu0 %v8930_v17  ;;  %4073 = vmatprep.mubr.f32.mxu1 %v6249_v43  ;;  %v3121_v17 = vadd.f32 %v6245_v18, %v6243_v7 }
 0x4f5   : > { %v6251_v54 = vpop.eup %6250 }
 0x4f6   : > { %v6253_v57 = vpop.eup %6252  ;;  %v9104_v50 = vpop.xlane.xlu0 %3083  ;;  %2393 = vadd.xlane.f32.xlu1 %v8901_v1 }
 0x4f7   : > { %v6255_v30 = vpop.eup %6254  ;;  %3376 = vmatprep.mubr.f32.mxu0 %v6253_v57  ;;  %v3124_v39 = vadd.f32 %v6253_v57, %v6251_v54  ;;  %v9127_v34 = vpop.xlane.xlu1 %3092 }
 0x4f8   : > { %v9108_v22 = vpop.eup %6256  ;;  %3377 = vmatmul.mubr.f32.gmra.mrb[114].mxu0 %v6251_v54  ;;  %4074 = vmatmul.mubr.f32.gmra.mrb[102].mxu1 %v6255_v30  ;;  %v3821_v31 = vadd.f32 %v6255_v30, %v6249_v43 }
 0x4f9   : > { %v6259_v41 = vpop.eup %6258  ;;  %2396 = vadd.xlane.f32.xlu0 %v8934_v2  ;;  %4078 = vmatprep.mubr.f32.mxu1 %v9108_v22  ;;  %v3791_v2 = vadd.f32 %v8969_v32, %v8964_v45  ;;  %v3809_v45 = vadd.f32 %v9060_v55, %v9054_v42  ;;  %v3794_v32 = vadd.f32 %v8977_v28, %v8972_v52 }
 0x4fa   : > { %v6261_v26 = vpop.eup %6260  ;;  %v9113_v24 = vpop.xlane.xlu0 %3780  ;;  %3122 = vadd.xlane.f32.xlu1 %v3121_v17 }
 0x4fb   : > { %3381 = vmatprep.mubr.f32.mxu0 %v6261_v26  ;;  %v9115_v48 = vpop.eup %6262  ;;  %v3127_v10 = vadd.f32 %v6261_v26, %v6259_v41  ;;  %v9135_v15 = vpop.xlane.xlu1 %3789 }
 0x4fc   : > { %3382 = vmatmul.mubr.f32.gmra.mrb[116].mxu0 %v6259_v41  ;;  %4079 = vmatmul.mubr.f32.gmra.mrb[104].mxu1 %v9115_v48 }
 0x4fd   : > { %3125 = vadd.xlane.f32.xlu0 %v3124_v39  ;;  %v6265_v17 = vpop.eup %6264 }
 0x4fe   : > { %v9120_v1 = vpop.xlane.xlu0 %1762  ;;  %1789 = vadd.xlane.f32.xlu1 %v8907_v5 }
 0x4ff   : > { %v9144_v53 = vpop.xlane.xlu1 %1759 }
 0x501   : > { %3792 = vadd.xlane.f32.xlu0 %v3791_v2 }
 0x502   : > { %v9125_v37 = vpop.xlane.xlu0 %2360  ;;  %2399 = vadd.xlane.f32.xlu1 %v8938_v33 }
 0x503   : > { %v9153_v6 = vpop.xlane.xlu1 %2369 }
 0x505   : > { %3798 = vadd.xlane.f32.xlu0 %v9004_v19 }
 0x506   : > { %v9131_v21 = vpop.xlane.xlu0 %3089  ;;  %3128 = vadd.xlane.f32.xlu1 %v3127_v10 }
 0x507   : > { %v9167_v43 = vpop.xlane.xlu1 %3098 }
 0x509   : > { %3804 = vadd.xlane.f32.xlu0 %v3803_v61 }
 0x50a   : > { %v9137_v5 = vpop.xlane.xlu0 %3786  ;;  %1795 = vadd.xlane.f32.xlu1 %v8947_v3  ;;  %v4886_v33 = vpop.f32.mrb[56].mxu0 }
 0x50b   : > { %v4887_v40 = vpop.f32.mrb[57].mxu0 }
 0x50c   : > { %v9146_v63 = vadd.f32 %v4887_v40, %v4886_v33 }
 0x50d   : > { %3810 = vadd.xlane.f32.xlu0 %v3809_v45 }
 0x50e   : > { %v1769_v19 = vpop.xlane.xlu0 %1768  ;;  %3795 = vadd.xlane.f32.xlu1 %v3794_v32 }
 0x50f   : > { %v4889_v62 = vpop.f32.mrb[58].mxu0  ;;  %v4966_v55 = vpop.f32.mrb[44].mxu1 }
 0x510   : > { %v4890_v3 = vpop.f32.mrb[59].mxu0  ;;  %v4967_v9 = vpop.f32.mrb[45].mxu1 }
 0x511   : > { %3816 = vadd.xlane.f32.xlu0 %v3815_v44  ;;  %v9151_v52 = vadd.f32 %v4890_v3, %v4889_v62  ;;  %v4968_v28 = vadd.f32 %v4967_v9, %v4966_v55 }
 0x512   : > { %v2367_v42 = vpop.xlane.xlu0 %2366  ;;  %3801 = vadd.xlane.f32.xlu1 %v9010_v60  ;;  %v3812_v60 = vadd.f32 %v9069_v23, %v9064_v46  ;;  %v3824_v46 = vadd.f32 %v9115_v48, %v9108_v22  ;;  %v1766_v23 = vpop.xlane.xlu1 %1765 }
 0x513   : > { %v4892_v58 = vpop.f32.mrb[60].mxu0  ;;  %6266 = vrcp.f32 %v2367_v42 }
 0x514   : > { %v4969_v47 = vpop.f32.mrb[46].mxu1  ;;  %v4893_v12 = vpop.f32.mrb[61].mxu0 }
 0x515   : > { %3822 = vadd.xlane.f32.xlu0 %v3821_v31  ;;  %v4970_v27 = vpop.f32.mrb[47].mxu1  ;;  %v9158_v38 = vadd.f32 %v4893_v12, %v4892_v58 }
 0x516   : > { %v9155_v25 = vpop.xlane.xlu0 %3095  ;;  %3807 = vadd.xlane.f32.xlu1 %v9045_v29  ;;  %v9160_v20 = vadd.f32 %v4970_v27, %v4969_v47  ;;  %v3818_v29 = vadd.f32 %v9099_v49, %v9091_v35  ;;  %v2690_v49 = vmul.f32 %v6265_v17, %v8990_v51  ;;  %v2376_v58 = vpop.xlane.xlu1 %2375 }
 0x518   : > { %v4972_v4 = vpop.f32.mrb[48].mxu1 }
 0x519   : > { %v4973_v7 = vpop.f32.mrb[49].mxu1 }
 0x51a   : > { %v1775_v59 = vpop.xlane.xlu0 %1774  ;;  %3813 = vadd.xlane.f32.xlu1 %v3812_v60  ;;  %v9165_v18 = vadd.f32 %v4973_v7, %v4972_v4 }
 0x51c   : > { %v4975_v57 = vpop.f32.mrb[50].mxu1 }
 0x51d   : > { %v4976_v30 = vpop.f32.mrb[51].mxu1  ;;  %v6267_v48 = vpop.eup %6266 }
 0x51e   : > { %v2373_v54 = vpop.xlane.xlu0 %2372  ;;  %3819 = vadd.xlane.f32.xlu1 %v3818_v29  ;;  %v4977_v41 = vadd.f32 %v4976_v30, %v4975_v57 }
 0x51f   : > { %6268 = vrcp.f32 %v2373_v54 }
 0x520   : > { %6270 = vrcp.f32 %v1766_v23  ;;  %v2694_v45 = vmul.f32 %v6267_v48, %v4977_v41 }
 0x521   : > { %6272 = vrcp.f32 %v9058_v16 }
 0x522   : > { %v9173_v26 = vpop.xlane.xlu0 %3101  ;;  %3825 = vadd.xlane.f32.xlu1 %v3824_v46  ;;  %v4978_v14 = vpop.f32.mrb[52].mxu1  ;;  %6274 = vrcp.f32 %v1769_v19 }
 0x523   : > { %v4979_v39 = vpop.f32.mrb[53].mxu1  ;;  %6276 = vrcp.f32 %v9125_v37 }
 0x524   : > { %v4980_v2 = vadd.f32 %v4979_v39, %v4978_v14  ;;  %6278 = vrcp.f32 %v9117_v56 }
 0x526   : > { %v1781_v35 = vpop.xlane.xlu0 %1780  ;;  %v4981_v10 = vpop.f32.mrb[54].mxu1 }
 0x527   : > { %v4982_v61 = vpop.f32.mrb[55].mxu1 }
 0x528   : > { %v4983_v22 = vadd.f32 %v4982_v61, %v4981_v10 }
 0x529   : > { %v6269_v32 = vpop.eup %6268 }
 0x52a   : > { %v2379_v44 = vpop.xlane.xlu0 %2378  ;;  %v2696_v62 = vmul.f32 %v6269_v32, %v4983_v22  ;;  %v6271_v42 = vpop.eup %6270 }
 0x52b   : > { %4116 = vrot.lane.b32.xlu0 %v2690_v49, %s6459_s30  ;;  %v4895_v33 = vpop.f32.mrb[62].mxu0  ;;  %v6273_v55 = vpop.eup %6272  ;;  %6280 = vrcp.f32 %v2379_v44 }
 0x52c   : > { %v4896_v40 = vpop.f32.mrb[63].mxu0  ;;  %v2691_v9 = vmul.f32 %v6273_v55, %v4968_v28  ;;  %v6275_v31 = vpop.eup %6274  ;;  %6282 = vrcp.f32 %v9153_v6 }
 0x52d   : > { %v4897_v16 = vadd.f32 %v4896_v40, %v4895_v33  ;;  %v6277_v56 = vpop.eup %6276  ;;  %6284 = vrcp.f32 %v1775_v59 }
 0x52e   : > { %v2692_v60 = vmul.f32 %v6277_v56, %v9160_v20  ;;  %6286 = vrcp.f32 %v2376_v58  ;;  %v6279_v29 = vpop.eup %6278 }
 0x52f   : > { %4124 = vrot.lane.b32.xlu0 %v2694_v45, %s6459_s30  ;;  %v9181_v51 = vmul.f32 %v6271_v42, %v4897_v16  ;;  %v4898_v19 = vpop.f32.mrb[64].mxu0  ;;  %v2693_v57 = vmul.f32 %v6279_v29, %v9165_v18  ;;  %6288 = vrcp.f32 %v1781_v35 }
 0x530   : > { %v4899_v3 = vpop.f32.mrb[65].mxu0 }
 0x531   : > { %v4900_v37 = vadd.f32 %v4899_v3, %v4898_v19 }
 0x533   : > { %4128 = vrot.lane.b32.xlu0 %v2696_v62, %s6459_s30  ;;  %4118 = vrot.lane.b32.xlu1 %v2691_v9, %s6459_s30  ;;  %v9186_v47 = vmul.f32 %v6275_v31, %v4900_v37  ;;  %v4984_v12 = vpop.f32.mrb[56].mxu1 }
 0x534   : > { %v4985_v27 = vpop.f32.mrb[57].mxu1 }
 0x535   : > { %v4986_v4 = vadd.f32 %v4985_v27, %v4984_v12  ;;  %v6281_v46 = vpop.eup %6280 }
 0x536   : > { %v6283_v20 = vpop.eup %6282 }
 0x537   : > { %4120 = vrot.lane.b32.xlu1 %v2692_v60, %s6459_s30  ;;  %v2695_v17 = vmul.f32 %v6283_v20, %v4980_v2  ;;  %v6285_v49 = vpop.eup %6284 }
 0x538   : > { %v4901_v28 = vpop.f32.mrb[66].mxu0  ;;  %v6287_v61 = vpop.eup %6286 }
 0x539   : > { %v4987_v7 = vpop.f32.mrb[58].mxu1  ;;  %v4902_v54 = vpop.f32.mrb[67].mxu0  ;;  %v2697_v48 = vmul.f32 %v6287_v61, %v4986_v4 }
 0x53a   : > { %v4988_v6 = vpop.f32.mrb[59].mxu1  ;;  %v9191_v30 = vadd.f32 %v4902_v54, %v4901_v28  ;;  %v6289_v9 = vpop.eup %6288 }
 0x53b   : > { %v4989_v41 = vadd.f32 %v4988_v6, %v4987_v7  ;;  %4122 = vrot.lane.b32.xlu1 %v2693_v57, %s6459_s30 }
 0x53c   : > { %v4904_v23 = vpop.f32.mrb[68].mxu0 }
 0x53d   : > { %v2698_v59 = vmul.f32 %v6281_v46, %v4989_v41  ;;  %v4905_v14 = vpop.f32.mrb[69].mxu0 }
 0x53e   : > { %v4906_v39 = vadd.f32 %v4905_v14, %v4904_v23 }
 0x53f   : > { %4132 = vrot.lane.b32.xlu0 %v2698_v59, %s6459_s30  ;;  %4126 = vrot.lane.b32.xlu1 %v2695_v17, %s6459_s30  ;;  %v4990_v18 = vpop.f32.mrb[60].mxu1 }
 0x540   : > { %v9196_v10 = vmul.f32 %v6285_v49, %v4906_v39  ;;  %v4991_v22 = vpop.f32.mrb[61].mxu1 }
 0x541   : > { %v9198_v45 = vadd.f32 %v4991_v22, %v4990_v18 }
 0x543   : > { %4130 = vrot.lane.b32.xlu1 %v2697_v48, %s6459_s30  ;;  %v4907_v33 = vpop.f32.mrb[70].mxu0  ;;  %v4993_v32 = vpop.f32.mrb[62].mxu1 }
 0x544   : > { %v4908_v2 = vpop.f32.mrb[71].mxu0  ;;  %v4994_v40 = vpop.f32.mrb[63].mxu1 }
 0x545   : > { %v9201_v44 = vadd.f32 %v4908_v2, %v4907_v33  ;;  %v9203_v62 = vadd.f32 %v4994_v40, %v4993_v32 }
 0x547   : > { %v4910_v16 = vpop.f32.mrb[72].mxu0 }
 0x548   : > { %v4996_v42 = vpop.f32.mrb[64].mxu1  ;;  %v4911_v19 = vpop.f32.mrb[73].mxu0 }
 0x549   : > { %v4997_v55 = vpop.f32.mrb[65].mxu1  ;;  %v4912_v3 = vadd.f32 %v4911_v19, %v4910_v16 }
 0x54a   : > { %v9205_v35 = vadd.f32 %v4997_v55, %v4996_v42 }
 0x54b   : > { %v9207_v37 = vmul.f32 %v6289_v9, %v4912_v3 }
 0x54c   : > { %v4913_v31 = vpop.f32.mrb[74].mxu0 }
 0x54d   : > { %v4914_v58 = vpop.f32.mrb[75].mxu0 }
 0x54e   : > { %v9209_v12 = vadd.f32 %v4914_v58, %v4913_v31  ;;  %v4999_v56 = vpop.f32.mrb[66].mxu1 }
 0x54f   : > { %v5000_v27 = vpop.f32.mrb[67].mxu1 }
 0x550   : > { %v9211_v60 = vadd.f32 %v5000_v27, %v4999_v56  ;;  %v4916_v4 = vpop.f32.mrb[76].mxu0 }
 0x551   : > { %v4917_v28 = vpop.f32.mrb[77].mxu0 }
 0x552   : > { %v4918_v7 = vadd.f32 %v4917_v28, %v4916_v4  ;;  %v5002_v29 = vpop.f32.mrb[68].mxu1 }
 0x553   : > { %v5003_v54 = vpop.f32.mrb[69].mxu1 }
 0x554   : > { %v9213_v6 = vadd.f32 %v5003_v54, %v5002_v29  ;;  %v4919_v57 = vpop.f32.mrb[78].mxu0 }
 0x555   : > { %v4920_v41 = vpop.f32.mrb[79].mxu0 }
 0x556   : > { %v9215_v46 = vadd.f32 %v4920_v41, %v4919_v57 }
 0x558   : > { %v4922_v59 = vpop.f32.mrb[80].mxu0 }
 0x559   : > { %v4923_v23 = vpop.f32.mrb[81].mxu0 }
 0x55a   : > { %v9217_v20 = vadd.f32 %v4923_v23, %v4922_v59 }
 0x560   : > { %v9219_v14 = vpop.xlane.xlu0 %3107 }
 0x563   : > { %v9221_v17 = vpop.xlane.xlu1 %3104 }
 0x564   : > { %v1787_v39 = vpop.xlane.xlu0 %1786 }
 0x565   : > { %6290 = vrcp.f32 %v1787_v39 }
 0x567   : > { %v1772_v49 = vpop.xlane.xlu1 %1771  ;;  %v5005_v18 = vpop.f32.mrb[70].mxu1 }
 0x568   : > { %6292 = vrcp.f32 %v1772_v49  ;;  %v2385_v61 = vpop.xlane.xlu0 %2384  ;;  %v5006_v22 = vpop.f32.mrb[71].mxu1 }
 0x569   : > { %6294 = vrcp.f32 %v2385_v61  ;;  %v9223_v48 = vadd.f32 %v5006_v22, %v5005_v18 }
 0x56b   : > { %v2382_v33 = vpop.xlane.xlu1 %2381  ;;  %v5008_v32 = vpop.f32.mrb[72].mxu1 }
 0x56c   : > { %6296 = vrcp.f32 %v2382_v33  ;;  %v5009_v2 = vpop.f32.mrb[73].mxu1 }
 0x56d   : > { %v4925_v40 = vpop.f32.mrb[82].mxu0  ;;  %v9225_v16 = vadd.f32 %v5009_v2, %v5008_v32  ;;  %6298 = vrcp.f32 %v9137_v5 }
 0x56e   : > { %v4926_v19 = vpop.f32.mrb[83].mxu0 }
 0x56f   : > { %v9227_v42 = vpop.xlane.xlu1 %3110  ;;  %v6291_v55 = vpop.eup %6290  ;;  %v9229_v3 = vadd.f32 %v4926_v19, %v4925_v40 }
 0x570   : > { %v5123_v9 = vpop.f32.mrb[74].mxu1  ;;  %v9234_v56 = vmul.f32 %v6291_v55, %v4918_v7 }
 0x571   : > { %v9231_v31 = vpop.xlane.xlu0 %3113  ;;  %v5124_v58 = vpop.f32.mrb[75].mxu1 }
 0x572   : > { %v6293_v27 = vpop.eup %6292  ;;  %v4928_v4 = vpop.f32.mrb[84].mxu0  ;;  %v9236_v28 = vadd.f32 %v5124_v58, %v5123_v9 }
 0x573   : > { %v1778_v29 = vpop.xlane.xlu1 %1777  ;;  %v4929_v54 = vpop.f32.mrb[85].mxu0  ;;  %v9239_v57 = vmul.f32 %v6293_v27, %v9191_v30 }
 0x574   : > { %v6295_v41 = vpop.eup %6294  ;;  %6300 = vrcp.f32 %v1778_v29  ;;  %v9241_v59 = vadd.f32 %v4929_v54, %v4928_v4  ;;  %v5126_v23 = vpop.f32.mrb[76].mxu1 }
 0x575   : > { %v1793_v39 = vpop.xlane.xlu0 %1792  ;;  %v5127_v5 = vpop.f32.mrb[77].mxu1  ;;  %v2700_v7 = vmul.f32 %v6295_v41, %v9203_v62 }
 0x576   : > { %6302 = vrcp.f32 %v1793_v39  ;;  %v6297_v49 = vpop.eup %6296  ;;  %v9244_v18 = vadd.f32 %v5127_v5, %v5126_v23  ;;  %v5043_v61 = vpop.f32.mrb[86].mxu0 }
 0x577   : > { %6304 = vrcp.f32 %v9131_v21  ;;  %v2388_v22 = vpop.xlane.xlu1 %2387  ;;  %4136 = vrot.lane.b32.xlu0 %v2700_v7, %s6459_s30  ;;  %v5044_v30 = vpop.f32.mrb[87].mxu0  ;;  %v2699_v33 = vmul.f32 %v6297_v49, %v9198_v45 }
 0x578   : > { %6306 = vrcp.f32 %v2388_v22  ;;  %v9249_v32 = vadd.f32 %v5044_v30, %v5043_v61  ;;  %v5129_v2 = vpop.f32.mrb[78].mxu1  ;;  %v6299_v9 = vpop.eup %6298 }
 0x579   : > { %v2391_v40 = vpop.xlane.xlu0 %2390  ;;  %4134 = vrot.lane.b32.xlu1 %v2699_v33, %s6459_s30  ;;  %v5130_v62 = vpop.f32.mrb[79].mxu1 }
 0x57a   : > { %6308 = vrcp.f32 %v2391_v40  ;;  %v5131_v19 = vadd.f32 %v5130_v62, %v5129_v2  ;;  %v5046_v55 = vpop.f32.mrb[88].mxu0 }
 0x57b   : > { %v9252_v58 = vpop.xlane.xlu1 %3116  ;;  %v5047_v21 = vpop.f32.mrb[89].mxu0  ;;  %6310 = vrcp.f32 %v9155_v25 }
 0x57c   : > { %v9254_v27 = vmul.f32 %v6299_v9, %v5131_v19  ;;  %v9256_v4 = vadd.f32 %v5047_v21, %v5046_v55  ;;  %v5132_v45 = vpop.f32.mrb[80].mxu1 }
 0x57d   : > { %v9258_v29 = vpop.xlane.xlu0 %3119  ;;  %v5133_v54 = vpop.f32.mrb[81].mxu1 }
 0x57e   : > { %v6301_v41 = vpop.eup %6300  ;;  %v9260_v23 = vadd.f32 %v5133_v54, %v5132_v45  ;;  %v5049_v39 = vpop.f32.mrb[90].mxu0 }
 0x57f   : > { %v1784_v7 = vpop.xlane.xlu1 %1783  ;;  %v5050_v49 = vpop.f32.mrb[91].mxu0  ;;  %v9264_v61 = vmul.f32 %v6301_v41, %v9201_v44 }
 0x580   : > { %v6303_v5 = vpop.eup %6302  ;;  %6312 = vrcp.f32 %v1784_v7  ;;  %v5051_v22 = vadd.f32 %v5050_v49, %v5049_v39  ;;  %v5135_v30 = vpop.f32.mrb[82].mxu1 }
 0x581   : > { %v1799_v33 = vpop.xlane.xlu0 %1798  ;;  %v9267_v2 = vmul.f32 %v6303_v5, %v9217_v20  ;;  %v6305_v40 = vpop.eup %6304 }
 0x582   : > { %6314 = vrcp.f32 %v1799_v33  ;;  %v5136_v62 = vpop.f32.mrb[83].mxu1  ;;  %v6307_v19 = vpop.eup %6306  ;;  %v9269_v55 = vmul.f32 %v6305_v40, %v5051_v22 }
 0x583   : > { %v9271_v9 = vadd.f32 %v5136_v62, %v5135_v30  ;;  %v5052_v25 = vpop.f32.mrb[92].mxu0  ;;  %6316 = vrcp.f32 %v9167_v43  ;;  %v2394_v44 = vpop.xlane.xlu1 %2393  ;;  %v2701_v54 = vmul.f32 %v6307_v19, %v9205_v35 }
 0x584   : > { %v6309_v21 = vpop.eup %6308  ;;  %v5053_v45 = vpop.f32.mrb[93].mxu0  ;;  %6318 = vrcp.f32 %v2394_v44 }
 0x585   : > { %v9275_v41 = vadd.f32 %v5053_v45, %v5052_v25  ;;  %v5138_v20 = vpop.f32.mrb[84].mxu1  ;;  %v2702_v5 = vmul.f32 %v6309_v21, %v9211_v60  ;;  %4138 = vrot.lane.b32.xlu1 %v2701_v54, %s6459_s30  ;;  %v5055_v22 = vpop.f32.mrb[94].mxu0 }
 0x586   : > { %v2397_v39 = vpop.xlane.xlu0 %2396  ;;  %v5139_v7 = vpop.f32.mrb[85].mxu1 }
 0x587   : > { %6320 = vrcp.f32 %v2397_v39  ;;  %v9279_v49 = vadd.f32 %v5139_v7, %v5138_v20  ;;  %4140 = vrot.lane.b32.xlu0 %v2702_v5, %s6459_s30  ;;  %v9283_v43 = vpop.xlane.xlu1 %3122  ;;  %v5056_v35 = vpop.f32.mrb[95].mxu0 }
 0x588   : > { %6322 = vrcp.f32 %v9173_v26  ;;  %v5057_v30 = vadd.f32 %v5056_v35, %v5055_v22  ;;  %v6311_v33 = vpop.eup %6310 }
 0x589   : > { %6324 = vrcp.f32 %v9104_v50  ;;  %v5058_v62 = vpop.f32.mrb[96].mxu0 }
 0x58a   : > { %v6313_v40 = vpop.eup %6312  ;;  %v9286_v60 = vmul.f32 %v6311_v33, %v5057_v30  ;;  %v5059_v21 = vpop.f32.mrb[97].mxu0 }
 0x58b   : > { %v1790_v25 = vpop.xlane.xlu1 %1789  ;;  %v9289_v44 = vmul.f32 %v6313_v40, %v9209_v12  ;;  %v5060_v45 = vadd.f32 %v5059_v21, %v5058_v62 }
 0x58c   : > { %v6315_v19 = vpop.eup %6314  ;;  %6326 = vrcp.f32 %v1790_v25 }
 0x58d   : > { %v9292_v26 = vmul.f32 %v6315_v19, %v9241_v59  ;;  %v6317_v54 = vpop.eup %6316  ;;  %6328 = vrcp.f32 %v9113_v24  ;;  %v5061_v39 = vpop.f32.mrb[98].mxu0 }
 0x58e   : > { %v6319_v20 = vpop.eup %6318  ;;  %v9295_v50 = vmul.f32 %v6317_v54, %v5060_v45  ;;  %v5062_v22 = vpop.f32.mrb[99].mxu0 }
 0x58f   : > { %v2400_v7 = vpop.xlane.xlu1 %2399  ;;  %v2703_v35 = vmul.f32 %v6319_v20, %v9213_v6  ;;  %v5063_v12 = vadd.f32 %v5062_v22, %v5061_v39  ;;  %v9300_v59 = vpop.xlane.xlu0 %3125 }
 0x590   : > { %6330 = vrcp.f32 %v2400_v7 }
 0x591   : > { %v6321_v5 = vpop.eup %6320  ;;  %4142 = vrot.lane.b32.xlu1 %v2703_v35, %s6459_s30  ;;  %6332 = vrcp.f32 %v9079_v11 }
 0x592   : > { %v2704_v30 = vmul.f32 %v6321_v5, %v9223_v48  ;;  %v6323_v33 = vpop.eup %6322  ;;  %6334 = vrcp.f32 %v9093_v0 }
 0x593   : > { %v9302_v40 = vmul.f32 %v6323_v33, %v5063_v12  ;;  %v6325_v24 = vpop.eup %6324  ;;  %v9305_v62 = vpop.xlane.xlu1 %3128 }
 0x594   : > { %4144 = vrot.lane.b32.xlu0 %v2704_v30, %s6459_s30  ;;  %v3387_v6 = vmul.f32 %v6325_v24, %v9249_v32  ;;  %v3793_v54 = vpop.xlane.xlu0 %3792 }
 0x596   : > { %v6327_v19 = vpop.eup %6326 }
 0x597   : > { %v6329_v48 = vpop.eup %6328  ;;  %v1796_v25 = vpop.xlane.xlu1 %1795  ;;  %v9312_v21 = vmul.f32 %v6327_v19, %v9215_v46 }
 0x598   : > { %4180 = vrot.lane.b32.xlu0 %v3387_v6, %s6457_s16  ;;  %v4084_v45 = vmul.f32 %v6329_v48, %v9236_v28  ;;  %6336 = vrcp.f32 %v1796_v25  ;;  %v3799_v7 = vpop.xlane.xlu0 %3798 }
 0x599   : > { %6338 = vrcp.f32 %v3793_v54 }
 0x59a   : > { %v6331_v20 = vpop.eup %6330  ;;  %6340 = vrcp.f32 %v9127_v34 }
 0x59b   : > { %v2705_v11 = vmul.f32 %v6331_v20, %v9225_v16  ;;  %v6333_v0 = vpop.eup %6332  ;;  %6342 = vrcp.f32 %v9135_v15 }
 0x59c   : > { %4244 = vrot.lane.b32.xlu0 %v4084_v45, %s6458_s11  ;;  %v5141_v32 = vpop.f32.mrb[86].mxu1  ;;  %v3388_v46 = vmul.f32 %v6333_v0, %v9256_v4  ;;  %6344 = vrcp.f32 %v9221_v17  ;;  %v6335_v5 = vpop.eup %6334 }
 0x59d   : > { %4146 = vrot.lane.b32.xlu1 %v2705_v11, %s6459_s30  ;;  %v5142_v39 = vpop.f32.mrb[87].mxu1  ;;  %v4085_v35 = vmul.f32 %v6335_v5, %v9244_v18  ;;  %6346 = vrcp.f32 %v9219_v14  ;;  %v3805_v19 = vpop.xlane.xlu0 %3804 }
 0x59e   : > { %v5143_v28 = vadd.f32 %v5142_v39, %v5141_v32  ;;  %6348 = vrcp.f32 %v3799_v7 }
 0x5a0   : > { %4184 = vrot.lane.b32.xlu0 %v9269_v55, %s6457_s16  ;;  %v3796_v55 = vpop.xlane.xlu1 %3795 }
 0x5a1   : > { %4182 = vrot.lane.b32.xlu1 %v3388_v46, %s6457_s16  ;;  %v5144_v16 = vpop.f32.mrb[88].mxu1  ;;  %6350 = vrcp.f32 %v3796_v55 }
 0x5a2   : > { %v6337_v34 = vpop.eup %6336  ;;  %v5145_v22 = vpop.f32.mrb[89].mxu1  ;;  %6352 = vrcp.f32 %v9227_v42 }
 0x5a3   : > { %v9328_v12 = vadd.f32 %v5145_v22, %v5144_v16  ;;  %v9331_v15 = vmul.f32 %v6337_v34, %v9229_v3  ;;  %v6339_v17 = vpop.eup %6338  ;;  %6354 = vrcp.f32 %v9231_v31  ;;  %v3811_v34 = vpop.xlane.xlu0 %3810 }
 0x5a4   : > { %4248 = vrot.lane.b32.xlu0 %v9254_v27, %s6458_s11  ;;  %v6341_v4 = vpop.eup %6340  ;;  %v4088_v3 = vmul.f32 %v6339_v17, %v9271_v9  ;;  %v3802_v25 = vpop.xlane.xlu1 %3801  ;;  %6356 = vrcp.f32 %v3805_v19 }
 0x5a5   : > { %4246 = vrot.lane.b32.xlu1 %v4085_v35, %s6458_s11  ;;  %v3390_v27 = vmul.f32 %v6341_v4, %v9275_v41  ;;  %v6343_v33 = vpop.eup %6342  ;;  %6358 = vrcp.f32 %v3802_v25 }
 0x5a6   : > { %v6345_v6 = vpop.eup %6344  ;;  %6360 = vrcp.f32 %v3811_v34 }
 0x5a7   : > { %v5064_v18 = vpop.f32.mrb[100].mxu0  ;;  %v6347_v20 = vpop.eup %6346  ;;  %6362 = vrcp.f32 %v9252_v58 }
 0x5a8   : > { %4188 = vrot.lane.b32.xlu0 %v9286_v60, %s6457_s16  ;;  %v5065_v30 = vpop.f32.mrb[101].mxu0  ;;  %v4087_v60 = vmul.f32 %v6343_v33, %v9260_v23  ;;  %v6349_v11 = vpop.eup %6348 }
 0x5a9   : > { %v5066_v24 = vadd.f32 %v5065_v30, %v5064_v18  ;;  %4186 = vrot.lane.b32.xlu1 %v3390_v27, %s6457_s16  ;;  %v5147_v14 = vpop.f32.mrb[90].mxu1  ;;  %v4090_v39 = vmul.f32 %v6349_v11, %v5143_v28  ;;  %v3808_v55 = vpop.xlane.xlu1 %3807 }
 0x5aa   : > { %v5148_v48 = vpop.f32.mrb[91].mxu1  ;;  %6364 = vrcp.f32 %v3808_v55 }
 0x5ab   : > { %v3394_v41 = vmul.f32 %v6345_v6, %v5066_v24  ;;  %v5067_v45 = vpop.f32.mrb[102].mxu0  ;;  %v5149_v54 = vadd.f32 %v5148_v48, %v5147_v14  ;;  %v6351_v23 = vpop.eup %6350  ;;  %6366 = vrcp.f32 %v9258_v29 }
 0x5ac   : > { %4252 = vrot.lane.b32.xlu0 %v4088_v3, %s6458_s11  ;;  %v5068_v42 = vpop.f32.mrb[103].mxu0  ;;  %v6353_v16 = vpop.eup %6352 }
 0x5ad   : > { %v5069_v9 = vadd.f32 %v5068_v42, %v5067_v45  ;;  %4250 = vrot.lane.b32.xlu1 %v4087_v60, %s6458_s11  ;;  %v6355_v17 = vpop.eup %6354  ;;  %v3817_v24 = vpop.xlane.xlu0 %3816 }
 0x5ae   : > { %v3814_v6 = vpop.xlane.xlu1 %3813  ;;  %6368 = vrcp.f32 %v3817_v24 }
 0x5af   : > { %v3395_v32 = vmul.f32 %v6347_v20, %v5069_v9  ;;  %v5070_v0 = vpop.f32.mrb[104].mxu0  ;;  %6370 = vrcp.f32 %v3814_v6 }
 0x5b0   : > { %4192 = vrot.lane.b32.xlu0 %v9302_v40, %s6457_s16  ;;  %v5071_v46 = vpop.f32.mrb[105].mxu0  ;;  %v4089_v40 = vmul.f32 %v6351_v23, %v9279_v49  ;;  %6372 = vrcp.f32 %v9300_v59 }
 0x5b1   : > { %v5072_v5 = vadd.f32 %v5071_v46, %v5070_v0  ;;  %4190 = vrot.lane.b32.xlu1 %v9295_v50, %s6457_s16  ;;  %v6357_v50 = vpop.eup %6356  ;;  %v3823_v0 = vpop.xlane.xlu0 %3822  ;;  %6374 = vrcp.f32 %v9283_v43 }
 0x5b2   : > { %v5150_v31 = vpop.f32.mrb[92].mxu1  ;;  %v6359_v18 = vpop.eup %6358  ;;  %v4092_v30 = vmul.f32 %v6357_v50, %v5149_v54  ;;  %6376 = vrcp.f32 %v3823_v0 }
 0x5b3   : > { %v5151_v7 = vpop.f32.mrb[93].mxu1  ;;  %v3396_v22 = vmul.f32 %v6353_v16, %v5072_v5  ;;  %v4091_v58 = vmul.f32 %v6359_v18, %v9328_v12  ;;  %v6361_v25 = vpop.eup %6360 }
 0x5b4   : > { %4256 = vrot.lane.b32.xlu0 %v4090_v39, %s6458_s11  ;;  %v5152_v35 = vadd.f32 %v5151_v7, %v5150_v31  ;;  %v6363_v29 = vpop.eup %6362  ;;  %v3820_v16 = vpop.xlane.xlu1 %3819 }
 0x5b5   : > { %4254 = vrot.lane.b32.xlu1 %v4089_v40, %s6458_s11  ;;  %v6365_v20 = vpop.eup %6364  ;;  %6378 = vrcp.f32 %v3820_v16  ;;  %v4117_v0 = vpop.permute.xlu0 %4116 }
 0x5b6   : > { %v5073_v28 = vpop.f32.mrb[106].mxu0  ;;  %v4093_v23 = vmul.f32 %v6365_v20, %v5152_v35  ;;  %v6367_v5 = vpop.eup %6366  ;;  %6380 = vrcp.f32 %v9305_v62 }
 0x5b7   : > { %v5074_v4 = vpop.f32.mrb[107].mxu0 }
 0x5b8   : > { %4196 = vrot.lane.b32.xlu0 %v3395_v32, %s6457_s16  ;;  %v5075_v27 = vadd.f32 %v5074_v4, %v5073_v28  ;;  %v6369_v28 = vpop.eup %6368  ;;  %v3826_v24 = vpop.xlane.xlu1 %3825 }
 0x5b9   : > { %4194 = vrot.lane.b32.xlu1 %v3394_v41, %s6457_s16  ;;  %v6371_v4 = vpop.eup %6370  ;;  %6382 = vrcp.f32 %v3826_v24 }
 0x5ba   : > { %v3397_v3 = vmul.f32 %v6355_v17, %v5075_v27  ;;  %v5153_v49 = vpop.f32.mrb[94].mxu1  ;;  %6384 = vrcp.f32 %v9106_v8 }
 0x5bb   : > { %v5154_v33 = vpop.f32.mrb[95].mxu1  ;;  %6386 = vrcp.f32 %v9089_v13 }
 0x5bc   : > { %4260 = vrot.lane.b32.xlu0 %v4092_v30, %s6458_s11  ;;  %v5155_v14 = vadd.f32 %v5154_v33, %v5153_v49  ;;  %v6373_v49 = vpop.eup %6372  ;;  %6388 = vrcp.f32 %v9144_v53  ;;  %v9408_v53 = vld [vmem:[%s9568_s3] ss:$0 sm:$0xff] }
 0x5bd   : > { %4258 = vrot.lane.b32.xlu1 %v4091_v58, %s6458_s11  ;;  %v6375_v6 = vpop.eup %6374  ;;  %6390 = vrcp.f32 %v9120_v1 }
 0x5be   : > { %v5076_v19 = vpop.f32.mrb[108].mxu0  ;;  %v5156_v48 = vpop.f32.mrb[96].mxu1  ;;  %v4094_v54 = vmul.f32 %v6361_v25, %v5155_v14 }
 0x5bf   : > { %v5077_v60 = vpop.f32.mrb[109].mxu0  ;;  %v5157_v45 = vpop.f32.mrb[97].mxu1 }
 0x5c0   : > { %4200 = vrot.lane.b32.xlu0 %v3397_v3, %s6457_s16  ;;  %v5078_v41 = vadd.f32 %v5077_v60, %v5076_v19  ;;  %v5158_v42 = vadd.f32 %v5157_v45, %v5156_v48  ;;  %v6377_v45 = vpop.eup %6376 }
 0x5c1   : > { %4198 = vrot.lane.b32.xlu1 %v3396_v22, %s6457_s16  ;;  %v6379_v62 = vpop.eup %6378 }
 0x5c2   : > { %v3398_v9 = vmul.f32 %v6363_v29, %v5078_v41  ;;  %v5079_v12 = vpop.f32.mrb[110].mxu0  ;;  %v5159_v11 = vpop.f32.mrb[98].mxu1  ;;  %v4095_v18 = vmul.f32 %v6371_v4, %v5158_v42 }
 0x5c3   : > { %v5080_v32 = vpop.f32.mrb[111].mxu0  ;;  %v5160_v46 = vpop.f32.mrb[99].mxu1 }
 0x5c4   : > { %4264 = vrot.lane.b32.xlu0 %v4094_v54, %s6458_s11  ;;  %v5081_v39 = vadd.f32 %v5080_v32, %v5079_v12  ;;  %v5161_v31 = vadd.f32 %v5160_v46, %v5159_v11  ;;  %v4119_v32 = vpop.permute.xlu1 %4118 }
 0x5c5   : > { %4262 = vrot.lane.b32.xlu1 %v4093_v23, %s6458_s11 }
 0x5c6   : > { %v3399_v34 = vmul.f32 %v6367_v5, %v5081_v39  ;;  %v5082_v7 = vpop.f32.mrb[112].mxu0  ;;  %v5162_v22 = vpop.f32.mrb[100].mxu1  ;;  %v4096_v17 = vmul.f32 %v6369_v28, %v5161_v31 }
 0x5c7   : > { %v5083_v59 = vpop.f32.mrb[113].mxu0  ;;  %v5163_v55 = vpop.f32.mrb[101].mxu1 }
 0x5c8   : > { %v5084_v40 = vadd.f32 %v5083_v59, %v5082_v7  ;;  %4204 = vrot.lane.b32.xlu0 %v3399_v34, %s6457_s16  ;;  %v5164_v35 = vadd.f32 %v5163_v55, %v5162_v22  ;;  %v4121_v23 = vpop.permute.xlu1 %4120  ;;  %v4125_v39 = vpop.permute.xlu0 %4124 }
 0x5c9   : > { %4202 = vrot.lane.b32.xlu1 %v3398_v9, %s6457_s16  ;;  %v6381_v9 = vpop.eup %6380 }
 0x5ca   : > { %v3400_v60 = vmul.f32 %v6375_v6, %v5084_v40  ;;  %v4097_v42 = vmul.f32 %v6379_v62, %v5164_v35  ;;  %v6383_v20 = vpop.eup %6382 }
 0x5cb   : > { %v5085_v43 = vpop.f32.mrb[114].mxu0  ;;  %v5165_v50 = vpop.f32.mrb[102].mxu1 }
 0x5cc   : > { %v5086_v27 = vpop.f32.mrb[115].mxu0  ;;  %v5166_v3 = vpop.f32.mrb[103].mxu1  ;;  %4268 = vrot.lane.b32.xlu0 %v4096_v17, %s6458_s11 }
 0x5cd   : > { %v5087_v30 = vadd.f32 %v5086_v27, %v5085_v43  ;;  %v5167_v33 = vadd.f32 %v5166_v3, %v5165_v50  ;;  %4266 = vrot.lane.b32.xlu1 %v4095_v18, %s6458_s11  ;;  %v4123_v46 = vpop.permute.xlu1 %4122  ;;  %v9376_v5 = vpop.permute.xlu0 %4128 }
 0x5ce   : > { %v6385_v35 = vpop.eup %6384 }
 0x5cf   : > { %v3401_v58 = vmul.f32 %v6373_v49, %v5087_v30  ;;  %v5088_v14 = vpop.f32.mrb[116].mxu0  ;;  %v5168_v19 = vpop.f32.mrb[104].mxu1  ;;  %v4098_v54 = vmul.f32 %v6377_v45, %v5167_v33  ;;  %v1961_v4 = vmul.f32 %v6385_v35, %v8984_v36 }
 0x5d0   : > { %v5089_v48 = vpop.f32.mrb[117].mxu0  ;;  %v5169_v41 = vpop.f32.mrb[105].mxu1 }
 0x5d1   : > { %v5090_v25 = vadd.f32 %v5089_v48, %v5088_v14  ;;  %4208 = vrot.lane.b32.xlu0 %v3401_v58, %s6457_s16  ;;  %v5170_v29 = vadd.f32 %v5169_v41, %v5168_v19  ;;  %4206 = vrot.lane.b32.xlu1 %v3400_v60, %s6457_s16  ;;  %v9378_v31 = vpop.permute.xlu0 %4132  ;;  %v9380_v16 = vpop.permute.xlu1 %4126  ;;  %v4292_v50 = vsel %vm282_vm0, %v1961_v4, %v4117_v0 }
 0x5d2   : > { %v6387_v36 = vpop.eup %6386 }
 0x5d3   : > { %v3402_v12 = vmul.f32 %v6381_v9, %v5090_v25  ;;  %v4099_v11 = vmul.f32 %v6383_v20, %v5170_v29  ;;  %v1962_v3 = vmul.f32 %v6387_v36, %v9146_v63  ;;  %v6389_v33 = vpop.eup %6388 }
 0x5d4   : > { %v1963_v1 = vmul.f32 %v6389_v33, %v9151_v52  ;;  %v6391_v52 = vpop.eup %6390 }
 0x5d5   : > { %4272 = vrot.lane.b32.xlu0 %v4098_v54, %s6458_s11  ;;  %4270 = vrot.lane.b32.xlu1 %v4097_v42, %s6458_s11  ;;  %v9384_v7 = vpop.permute.xlu1 %4130  ;;  %v4293_v58 = vsel %vm282_vm0, %v1962_v3, %v4119_v32  ;;  %v1964_v62 = vmul.f32 %v6391_v52, %v9158_v38 }
 0x5d6   : > { %v4294_v19 = vsel %vm282_vm0, %v1963_v1, %v4121_v23 }
 0x5d9   : > { %4210 = vrot.lane.b32.xlu1 %v3402_v12, %s6457_s16 }
 0x5dd   : > { %4274 = vrot.lane.b32.xlu1 %v4099_v11, %s6458_s11  ;;  %v4295_v11 = vsel %vm282_vm0, %v1964_v62, %v4123_v46  ;;  %s4667_s11 = sshll.u32 %s6517_s22, 10  ;;  %s6392_s22 = scalar_lea.vmem %s9517_s23, 1024 }
 0x5de   : > { %s9515_s30 = scalar_lea.hbm %s9570_s5, %s4667_s11  ;;  %p6393_p11 = scmp.ne.s32.totalorder %s9517_s23, %s6392_s22 }
 0x5df   : > { %p6400_p1 = scmp.lt.s32.totalorder %s6398_s9, %s6392_s22 }
 0x5e0   : > { %p6394_p12 = pnand %p6393_p11, %p6534_p5 }
 0x5e1   : > { %p6401_p2 = por %p6400_p1, %p6399_p0 }
 0x5e2   : > { %p6395_p13 = pneg %p6394_p12 }
 0x5e4   : > { %p6402_p3 = pnand %p6401_p2, %p6395_p13 }
 0x5e9   : > { %v9382_v34 = vpop.permute.xlu0 %4136 }
 0x5eb   : > { %v9389_v59 = vpop.permute.xlu1 %4134 }
 0x5f7   : > { %v9393_v55 = vpop.permute.xlu1 %4138 }
 0x5f9   : > { %v9386_v22 = vpop.permute.xlu0 %4140 }
 0x603   : > { %v9397_v17 = vpop.permute.xlu1 %4142 }
 0x606   : > { %v9391_v40 = vpop.permute.xlu0 %4144 }
 0x60a   : > { %v4181_v28 = vpop.permute.xlu0 %4180 }
 0x60b   : > { %v4309_v13 = vsel %vm4308_vm8, %v4292_v50, %v4181_v28  ;;  %v4296_v28 = vsel %vm282_vm0, %v9181_v51, %v4125_v39 }
 0x60e   : > { %v4245_v43 = vpop.permute.xlu0 %4244 }
 0x60f   : > { %v9400_v8 = vpop.permute.xlu1 %4146  ;;  %v4326_v18 = vsel %vm4325_vm10, %v4309_v13, %v4245_v43 }
 0x610   : > { %v4349_v24 = vadd.f32 %v9408_v53, %v4326_v18 }
 0x612   : > { %v4185_v27 = vpop.permute.xlu0 %4184  ;;  %v4381_v25 = vmul.f32 0.2, %v4349_v24  ;;  %vm4365_vm11 = vcmp.ge.f32.partialorder %v4349_v24, 0.0 }
 0x613   : > { %v4183_v30 = vpop.permute.xlu1 %4182  ;;  %v4311_v63 = vsel %vm4308_vm8, %v4294_v19, %v4185_v27 }
 0x614   : > { %v4310_v14 = vsel %vm4308_vm8, %v4293_v58, %v4183_v30  ;;  %v4397_v9 = vsel %vm4365_vm11, %v4349_v24, %v4381_v25  ;;  %v4297_v30 = vsel %vm282_vm0, %v9186_v47, %v9380_v16  ;;  %v4298_v24 = vsel %vm282_vm0, %v9239_v57, %v9376_v5 }
 0x616   : > { %v4249_v49 = vpop.permute.xlu0 %4248 }
 0x617   : > { %v4247_v6 = vpop.permute.xlu1 %4246  ;;  %v4328_v45 = vsel %vm4325_vm10, %v4311_v63, %v4249_v49  ;;  %v4299_v63 = vsel %vm282_vm0, %v9196_v10, %v9384_v7 }
 0x618   : > { %v4327_v48 = vsel %vm4325_vm10, %v4310_v14, %v4247_v6  ;;  %v4351_v12 = vadd.f32 %v9408_v53, %v4328_v45 }
 0x619   : > { %v4350_v41 = vadd.f32 %v9408_v53, %v4327_v48 }
 0x61a   : > { %v4189_v60 = vpop.permute.xlu0 %4188  ;;  %v4383_v43 = vmul.f32 0.2, %v4351_v12  ;;  %vm4367_vm13 = vcmp.ge.f32.partialorder %v4351_v12, 0.0 }
 0x61b   : > { %vm4366_vm12 = vcmp.ge.f32.partialorder %v4350_v41, 0.0  ;;  %v4382_v29 = vmul.f32 0.2, %v4350_v41  ;;  %v4187_v54 = vpop.permute.xlu1 %4186  ;;  %v4313_v4 = vsel %vm4308_vm8, %v4296_v28, %v4189_v60 }
 0x61c   : > { %v4312_v0 = vsel %vm4308_vm8, %v4295_v11, %v4187_v54  ;;  %v4399_v39 = vsel %vm4367_vm13, %v4351_v12, %v4383_v43 }
 0x61d   : > { %v4398_v20 = vsel %vm4366_vm12, %v4350_v41, %v4382_v29  ;;  %v4300_v29 = vsel %vm282_vm0, %v9264_v61, %v9378_v31 }
 0x61e   : > { %v4253_v42 = vpop.permute.xlu0 %4252  ;;  %v4671_v32 = vpack.c.bf16 %v4398_v20, %v4397_v9 }
 0x61f   : > { %v4251_v23 = vpop.permute.xlu1 %4250  ;;  %v4330_v50 = vsel %vm4325_vm10, %v4313_v4, %v4253_v42 }
 0x620   : > { %4672 = vst [vmem:[%s9430_s17] sm:$0xff] %v4671_v32   ;;  %v4329_v38 = vsel %vm4325_vm10, %v4312_v0, %v4251_v23  ;;  %v4353_v18 = vadd.f32 %v9408_v53, %v4330_v50  ;;  %v4301_v0 = vsel %vm282_vm0, %v9207_v37, %v9389_v59 }
 0x621   : > { %v4352_v46 = vadd.f32 %v9408_v53, %v4329_v38 }
 0x622   : > { %v4193_v35 = vpop.permute.xlu0 %4192  ;;  %v4385_v14 = vmul.f32 0.2, %v4353_v18  ;;  %vm4369_vm15 = vcmp.ge.f32.partialorder %v4353_v18, 0.0 }
 0x623   : > { %vm4368_vm14 = vcmp.ge.f32.partialorder %v4352_v46, 0.0  ;;  %v4384_v27 = vmul.f32 0.2, %v4352_v46  ;;  %v4191_v13 = vpop.permute.xlu1 %4190  ;;  %v4315_v6 = vsel %vm4308_vm8, %v4298_v24, %v4193_v35  ;;  %v4302_v35 = vsel %vm282_vm0, %v9289_v44, %v9382_v34 }
 0x624   : > { %v4314_v49 = vsel %vm4308_vm8, %v4297_v30, %v4191_v13  ;;  %v4401_v25 = vsel %vm4369_vm15, %v4353_v18, %v4385_v14  ;;  %v4303_v18 = vsel %vm282_vm0, %v9234_v56, %v9393_v55 }
 0x625   : > { %v4400_v36 = vsel %vm4368_vm14, %v4352_v46, %v4384_v27 }
 0x626   : > { %v4257_v51 = vpop.permute.xlu0 %4256  ;;  %v4676_v3 = vpack.c.bf16 %v4400_v36, %v4399_v39 }
 0x627   : > { %v4255_v33 = vpop.permute.xlu1 %4254  ;;  %v4332_v47 = vsel %vm4325_vm10, %v4315_v6, %v4257_v51 }
 0x628   : > { %4708 = vst [vmem:[%s9430_s17 + $0x8] sm:$0xff] %v4676_v3   ;;  %v4331_v1 = vsel %vm4325_vm10, %v4314_v49, %v4255_v33  ;;  %v4355_v57 = vadd.f32 %v9408_v53, %v4332_v47  ;;  %v4304_v49 = vsel %vm282_vm0, %v9312_v21, %v9386_v22  ;;  %v4305_v22 = vsel %vm282_vm0, %v9267_v2, %v9397_v17 }
 0x629   : > { %v4354_v19 = vadd.f32 %v9408_v53, %v4331_v1 }
 0x62a   : > { %v4197_v58 = vpop.permute.xlu0 %4196  ;;  %v4387_v42 = vmul.f32 0.2, %v4355_v57  ;;  %vm4371_vm2 = vcmp.ge.f32.partialorder %v4355_v57, 0.0 }
 0x62b   : > { %vm4370_vm1 = vcmp.ge.f32.partialorder %v4354_v19, 0.0  ;;  %v4386_v16 = vmul.f32 0.2, %v4354_v19  ;;  %v4195_v48 = vpop.permute.xlu1 %4194  ;;  %v4317_v9 = vsel %vm4308_vm8, %v4300_v29, %v4197_v58 }
 0x62c   : > { %v4316_v45 = vsel %vm4308_vm8, %v4299_v63, %v4195_v48  ;;  %v4403_v32 = vsel %vm4371_vm2, %v4355_v57, %v4387_v42  ;;  %v4306_v57 = vsel %vm282_vm0, %v9331_v15, %v9391_v40  ;;  %v4307_v40 = vsel %vm282_vm0, %v9292_v26, %v9400_v8 }
 0x62d   : > { %v4402_v5 = vsel %vm4370_vm1, %v4354_v19, %v4386_v16 }
 0x62e   : > { %v4261_v60 = vpop.permute.xlu0 %4260  ;;  %v4681_v41 = vpack.c.bf16 %v4402_v5, %v4401_v25 }
 0x62f   : > { %v4259_v52 = vpop.permute.xlu1 %4258  ;;  %v4334_v10 = vsel %vm4325_vm10, %v4317_v9, %v4261_v60 }
 0x630   : > { %4709 = vst [vmem:[%s9430_s17 + $0x10] sm:$0xff] %v4681_v41   ;;  %v4333_v54 = vsel %vm4325_vm10, %v4316_v45, %v4259_v52  ;;  %v4357_v61 = vadd.f32 %v9408_v53, %v4334_v10 }
 0x631   : > { %v4356_v12 = vadd.f32 %v9408_v53, %v4333_v54 }
 0x632   : > { %v4201_v62 = vpop.permute.xlu0 %4200  ;;  %v4389_v4 = vmul.f32 0.2, %v4357_v61  ;;  %vm4373_vm4 = vcmp.ge.f32.partialorder %v4357_v61, 0.0 }
 0x633   : > { %vm4372_vm3 = vcmp.ge.f32.partialorder %v4356_v12, 0.0  ;;  %v4388_v7 = vmul.f32 0.2, %v4356_v12  ;;  %v4199_v20 = vpop.permute.xlu1 %4198  ;;  %v4319_v46 = vsel %vm4308_vm8, %v4302_v35, %v4201_v62 }
 0x634   : > { %v4318_v28 = vsel %vm4308_vm8, %v4301_v0, %v4199_v20  ;;  %v4405_v51 = vsel %vm4373_vm4, %v4357_v61, %v4389_v4 }
 0x635   : > { %v4404_v31 = vsel %vm4372_vm3, %v4356_v12, %v4388_v7 }
 0x636   : > { %v4265_v11 = vpop.permute.xlu0 %4264  ;;  %v4686_v23 = vpack.c.bf16 %v4404_v31, %v4403_v32 }
 0x637   : > { %v4263_v38 = vpop.permute.xlu1 %4262  ;;  %v4336_v37 = vsel %vm4325_vm10, %v4319_v46, %v4265_v11 }
 0x638   : > { %4710 = vst [vmem:[%s9430_s17 + $0x18] sm:$0xff] %v4686_v23   ;;  %v4335_v43 = vsel %vm4325_vm10, %v4318_v28, %v4263_v38  ;;  %v4359_v39 = vadd.f32 %v9408_v53, %v4336_v37 }
 0x639   : > { %v4358_v50 = vadd.f32 %v9408_v53, %v4335_v43 }
 0x63a   : > { %v4205_v27 = vpop.permute.xlu0 %4204  ;;  %v4391_v24 = vmul.f32 0.2, %v4359_v39  ;;  %vm4375_vm7 = vcmp.ge.f32.partialorder %v4359_v39, 0.0 }
 0x63b   : > { %vm4374_vm6 = vcmp.ge.f32.partialorder %v4358_v50, 0.0  ;;  %v4390_v59 = vmul.f32 0.2, %v4358_v50  ;;  %v4203_v13 = vpop.permute.xlu1 %4202  ;;  %v4321_v1 = vsel %vm4308_vm8, %v4304_v49, %v4205_v27 }
 0x63c   : > { %v4320_v30 = vsel %vm4308_vm8, %v4303_v18, %v4203_v13  ;;  %v4407_v19 = vsel %vm4375_vm7, %v4359_v39, %v4391_v24 }
 0x63d   : > { %v4406_v44 = vsel %vm4374_vm6, %v4358_v50, %v4390_v59 }
 0x63e   : > { %v4269_v34 = vpop.permute.xlu0 %4268  ;;  %v4691_v36 = vpack.c.bf16 %v4406_v44, %v4405_v51 }
 0x63f   : > { %v4267_v3 = vpop.permute.xlu1 %4266  ;;  %v4338_v56 = vsel %vm4325_vm10, %v4321_v1, %v4269_v34 }
 0x640   : > { %4711 = vst [vmem:[%s9430_s17 + $0x20] sm:$0xff] %v4691_v36   ;;  %v4337_v33 = vsel %vm4325_vm10, %v4320_v30, %v4267_v3  ;;  %v4361_v21 = vadd.f32 %v9408_v53, %v4338_v56 }
 0x641   : > { %v4360_v58 = vadd.f32 %v9408_v53, %v4337_v33 }
 0x642   : > { %v4393_v63 = vmul.f32 0.2, %v4361_v21  ;;  %vm4377_vm5 = vcmp.ge.f32.partialorder %v4361_v21, 0.0 }
 0x643   : > { %v4209_v14 = vpop.permute.xlu0 %4208  ;;  %vm4376_vm9 = vcmp.ge.f32.partialorder %v4360_v58, 0.0  ;;  %v4392_v55 = vmul.f32 0.2, %v4360_v58  ;;  %v4207_v6 = vpop.permute.xlu1 %4206 }
 0x644   : > { %v4322_v48 = vsel %vm4308_vm8, %v4305_v22, %v4207_v6  ;;  %v4323_v41 = vsel %vm4308_vm8, %v4306_v57, %v4209_v14  ;;  %v4409_v29 = vsel %vm4377_vm5, %v4361_v21, %v4393_v63 }
 0x645   : > { %v4408_v47 = vsel %vm4376_vm9, %v4360_v58, %v4392_v55 }
 0x646   : > { %v4696_v16 = vpack.c.bf16 %v4408_v47, %v4407_v19 }
 0x647   : > { %v4271_v60 = vpop.permute.xlu1 %4270  ;;  %v4273_v25 = vpop.permute.xlu0 %4272 }
 0x648   : > { %4712 = vst [vmem:[%s9430_s17 + $0x28] sm:$0xff] %v4696_v16   ;;  %v4339_v5 = vsel %vm4325_vm10, %v4322_v48, %v4271_v60  ;;  %v4340_v2 = vsel %vm4325_vm10, %v4323_v41, %v4273_v25 }
 0x649   : > { %v4362_v45 = vadd.f32 %v9408_v53, %v4339_v5  ;;  %v4363_v15 = vadd.f32 %v9408_v53, %v4340_v2 }
 0x64b   : > { %vm4378_vm11 = vcmp.ge.f32.partialorder %v4362_v45, 0.0  ;;  %v4394_v17 = vmul.f32 0.2, %v4362_v45  ;;  %v4211_v52 = vpop.permute.xlu1 %4210  ;;  %v4395_v10 = vmul.f32 0.2, %v4363_v15  ;;  %vm4379_vm12 = vcmp.ge.f32.partialorder %v4363_v15, 0.0 }
 0x64c   : > { %v4324_v42 = vsel %vm4308_vm8, %v4307_v40, %v4211_v52 }
 0x64d   : > { %v4410_v54 = vsel %vm4378_vm11, %v4362_v45, %v4394_v17  ;;  %v4411_v11 = vsel %vm4379_vm12, %v4363_v15, %v4395_v10 }
 0x64e   : > { %v4701_v62 = vpack.c.bf16 %v4410_v54, %v4409_v29 }
 0x64f   : > { %v4275_v9 = vpop.permute.xlu1 %4274 }
 0x650   : > { %4713 = vst [vmem:[%s9430_s17 + $0x30] sm:$0xff] %v4701_v62   ;;  %v4341_v12 = vsel %vm4325_vm10, %v4324_v42, %v4275_v9 }
 0x651   : > { %v4364_v7 = vadd.f32 %v9408_v53, %v4341_v12 }
 0x653   : > { %vm4380_vm13 = vcmp.ge.f32.partialorder %v4364_v7, 0.0  ;;  %v4396_v20 = vmul.f32 0.2, %v4364_v7 }
 0x655   : > { %v4412_v26 = vsel %vm4380_vm13, %v4364_v7, %v4396_v20 }
 0x656   : > { %v4706_v8 = vpack.c.bf16 %v4412_v26, %v4411_v11 }
 0x658   : > { %4714 = vst [vmem:[%s9430_s17 + $0x38] sm:$0xff] %v4706_v8  }
 0x659   : > { %6405 = shalt.err (!%p6402_p3)
}
 0x65a   : > { %s6406_s10 = scalar_lea.hbm %s9515_s30, 1024  ;;  %s6410_s14 = scalar_lea.hbm %s9570_s5, 2048 }
 0x65b   : > { %p6407_p4 = scmp.ne.s32.totalorder %s9515_s30, %s6406_s10  ;;  %p6411_p9 = scmp.lt.u32.totalorder %s9515_s30, %s9570_s5 }
 0x65c   : > { %p6412_p10 = scmp.lt.u32.totalorder %s6410_s14, %s6406_s10  ;;  %p6414_p12 = scmp.lt.u32.totalorder %s6406_s10, %s9515_s30 }
 0x65d   : > { %p6408_p7 = pnand %p6407_p4, %p6534_p5 }
 0x65e   : > { %p6413_p11 = por %p6412_p10, %p6411_p9 }
 0x65f   : > { %p6409_p8 = pneg %p6408_p7 }
 0x660   : > { %p6415_p13 = por %p6414_p12, %p6413_p11 }
 0x662   : > { %p6416_p0 = pnand %p6415_p13, %p6409_p8 }
 0x664   : > { %6419 = shalt.err (!%p6416_p0)
}
 0x665   : > { %s6465_s11 = smov 4  }
 0x666   : > { %5619 = dma.vmem_to_hbm [thread:$0]  (%p6534_p5), %s9517_s23, 1024, %s9515_s30, %s9522_s6, %s6457_s16, %s6457_s16, %s6465_s11  }
 0x667 PF: > { %p5625_p1 = scmp.ge.s32.totalorder %s6454_s21, 2  ;;  %s4522_s25 = sand.u32 1, %s6442_s18  }
 0x668   : > { %s4523_s26 = scalar_lea.sflag [#allocation3], %s4522_s25 }
 0x669   : > { %p5622_p2 = pnand %p5625_p1, %p6538_p6 }
 0x66b   : > { %6437 = dma.done.wait (!%p5622_p2), %s4523_s26, 1024  }
 0x66c   : > { %6439 = vsyncadd (!%p5622_p2), %s4523_s26, 4294966272  ;;  %p15_p3 = scmp.ge.s32.totalorder %s6521_s24, 4   ;;  %s10180_s18 = smov %s6446_s19 }
 0x66d   : > { %s10181_s19 = smov %s6450_s20  ;;  %s10182_s20 = smov %s6532_s27 }
 0x66e   : > { %s10183_s21 = smov %s6521_s24  ;;  %17 = sbr.rel (!%p15_p3) target bundleno = 3 (0x3), region = 76 }
 0x675   :  { %4528 = vsyncpa [#allocation3], 1 }
 0x676   :  { %4530 = vsyncpa [#allocation3 + $0x1], 1 }

</bundles_post_ra>
